<compile_context>
chip_gen: v5e
topology: v5e:2x2
jax: 0.10.0
libtpu: 0.0.40
codegen_flags: <defaults>
</compile_context>

<pallas_src>
import numpy as np

import jax
import jax.numpy as jnp
from jax.experimental import pallas as pl
from jax.experimental.pallas import tpu as pltpu

_MEAN = (0.485, 0.456, 0.406)
_STD = (0.229, 0.224, 0.225)


# ----------------------------------------------------------------------------
# Trace-time constant builders (selection matrices, folded weights)
# ----------------------------------------------------------------------------

def _make_shift_mats(h, w):
    """S[k] (k = (dy+1)*3 + (dx+1)) maps a [C, H*W] image to its (dy, dx)
    shifted copy with zero 'same' padding: shifted = x @ S[k]."""
    hw = h * w
    mats = np.zeros((9, hw, hw), np.float32)
    k = 0
    for dy in (-1, 0, 1):
        for dx in (-1, 0, 1):
            for r in range(h):
                rr = r + dy
                if 0 <= rr < h:
                    for c in range(w):
                        cc = c + dx
                        if 0 <= cc < w:
                            mats[k, rr * w + cc, r * w + c] = 1.0
            k += 1
    return mats


def _make_pool_mats(h, w):
    """P[d] picks the d-th element of each 2x2 window: cand_d = x @ P[d]."""
    ho, wo = h // 2, w // 2
    mats = np.zeros((4, h * w, ho * wo), np.float32)
    for d, (dy, dx) in enumerate(((0, 0), (0, 1), (1, 0), (1, 1))):
        for r in range(ho):
            for c in range(wo):
                mats[d, (2 * r + dy) * w + (2 * c + dx), r * wo + c] = 1.0
    return mats


def _chan_mask(idx, nchan):
    m = np.ones((nchan,), np.float32)
    for i in idx:
        m[i] = 0.0
    return m


# ----------------------------------------------------------------------------
# Pallas kernels
# ----------------------------------------------------------------------------

def _features_kernel(x_ref, mean_ref, w1_ref, b1_ref, s1_ref, p1_ref,
                     w2_ref, b2_ref, s2_ref, p2_ref, out_ref):
    """Per-sample fused features: normalize (mean in-kernel, 1/std folded into
    conv1 weights) -> conv1 -> relu -> pool -> conv2 -> relu -> pool.
    Activation layout is [C, H*W] with the spatial axis on the lanes."""
    f32 = jnp.float32
    x = x_ref[0] - mean_ref[...]                                   # [Cin, HW]

    # conv1: 3x3 'same' as 9 accumulating (W_k @ x) @ S_k matmuls.
    acc1 = jnp.dot(jnp.dot(w1_ref[0], x, preferred_element_type=f32),
                   s1_ref[0], preferred_element_type=f32)
    for k in range(1, 9):
        t = jnp.dot(w1_ref[k], x, preferred_element_type=f32)      # [C1, HW]
        acc1 = acc1 + jnp.dot(t, s1_ref[k], preferred_element_type=f32)
    h1 = jnp.maximum(acc1 + b1_ref[...], 0.0)                      # [C1, HW]

    # maxpool 2x2 stride 2 = elementwise max of 4 selection matmuls.
    c0 = jnp.dot(h1, p1_ref[0], preferred_element_type=f32)
    c1 = jnp.dot(h1, p1_ref[1], preferred_element_type=f32)
    c2 = jnp.dot(h1, p1_ref[2], preferred_element_type=f32)
    c3 = jnp.dot(h1, p1_ref[3], preferred_element_type=f32)
    pool1 = jnp.maximum(jnp.maximum(c0, c1), jnp.maximum(c2, c3))  # [C1, HW1]

    # conv2.
    acc2 = jnp.dot(jnp.dot(w2_ref[0], pool1, preferred_element_type=f32),
                   s2_ref[0], preferred_element_type=f32)
    for k in range(1, 9):
        t = jnp.dot(w2_ref[k], pool1, preferred_element_type=f32)  # [C2, HW1]
        acc2 = acc2 + jnp.dot(t, s2_ref[k], preferred_element_type=f32)
    h2 = jnp.maximum(acc2 + b2_ref[...], 0.0)                      # [C2, HW1]

    d0 = jnp.dot(h2, p2_ref[0], preferred_element_type=f32)
    d1 = jnp.dot(h2, p2_ref[1], preferred_element_type=f32)
    d2 = jnp.dot(h2, p2_ref[2], preferred_element_type=f32)
    d3 = jnp.dot(h2, p2_ref[3], preferred_element_type=f32)
    out_ref[0] = jnp.maximum(jnp.maximum(d0, d1), jnp.maximum(d2, d3))


def _classifier_kernel(x_ref, w1_ref, b1_ref, w2_ref, b2_ref, o_ref):
    f32 = jnp.float32
    h = jnp.dot(x_ref[...], w1_ref[...], preferred_element_type=f32)
    h = jnp.maximum(h + b1_ref[...], 0.0)
    y = jnp.dot(h, w2_ref[...], preferred_element_type=f32)
    o_ref[...] = y + b2_ref[...]


# ----------------------------------------------------------------------------
# pallas_call wrappers
# ----------------------------------------------------------------------------

def _features_call(x3d, mean_col, w1_taps, b1, s1, p1, w2_taps, b2, s2, p2):
    n, cin, hw = x3d.shape
    c2 = w2_taps.shape[1]
    hw2 = p2.shape[2]

    def full(shape):
        return pl.BlockSpec(shape, lambda i, _s=shape: (0,) * len(_s))

    return pl.pallas_call(
        _features_kernel,
        out_shape=jax.ShapeDtypeStruct((n, c2, hw2), jnp.float32),
        grid=(n,),
        in_specs=[
            pl.BlockSpec((1, cin, hw), lambda i: (i, 0, 0)),       # x (per sample)
            full(mean_col.shape),
            full(w1_taps.shape), full(b1.shape), full(s1.shape), full(p1.shape),
            full(w2_taps.shape), full(b2.shape), full(s2.shape), full(p2.shape),
        ],
        out_specs=pl.BlockSpec((1, c2, hw2), lambda i: (i, 0, 0)),
        compiler_params=pltpu.CompilerParams(
            dimension_semantics=("parallel",)),   # batch splits across v7x TCs
    )(x3d, mean_col, w1_taps, b1, s1, p1, w2_taps, b2, s2, p2)


def _classifier_call(xf, fc1_wt, fc1_b, fc2_wt, fc2_b):
    n = xf.shape[0]
    nout = fc2_wt.shape[1]
    vm = pl.BlockSpec(memory_space=pltpu.MemorySpace.VMEM)
    return pl.pallas_call(
        _classifier_kernel,
        out_shape=jax.ShapeDtypeStruct((n, nout), jnp.float32),
        in_specs=[vm, vm, vm, vm, vm],
        out_specs=vm,
    )(xf, fc1_wt, fc1_b, fc2_wt, fc2_b)


# ----------------------------------------------------------------------------
# modified_vgg forward
# ----------------------------------------------------------------------------

def modified_vgg_forward(x_nchw, params, idx_list):
    n, cin, h, w = x_nchw.shape
    c1 = params["conv1_w"].shape[0]
    c2 = params["conv2_w"].shape[0]
    h1, w1 = h // 2, w // 2
    h2, w2 = h1 // 2, w1 // 2

    # ---- trace-time folding of normalization / channel masks into weights --
    inv_std = jnp.asarray([1.0 / s for s in _STD], jnp.float32)
    mean_col = jnp.asarray(_MEAN, jnp.float32).reshape(cin, 1)

    m1 = jnp.asarray(_chan_mask(idx_list[0], c1) *
                     _chan_mask(idx_list[1], c1) *
                     _chan_mask(idx_list[2], c1))
    m2 = jnp.asarray(_chan_mask(idx_list[3], c2) *
                     _chan_mask(idx_list[4], c2) *
                     _chan_mask(idx_list[5], c2))

    # [Cout,Cin,kh,kw] -> taps [9, Cout, Cin]; 1/std over Cin, mask over Cout.
    w1_taps = (jnp.transpose(params["conv1_w"], (2, 3, 0, 1)).reshape(9, c1, cin)
               * inv_std[None, None, :] * m1[None, :, None]).astype(jnp.float32)
    b1 = (params["conv1_b"] * m1).reshape(c1, 1).astype(jnp.float32)
    w2_taps = (jnp.transpose(params["conv2_w"], (2, 3, 0, 1)).reshape(9, c2, c1)
               * m2[None, :, None]).astype(jnp.float32)
    b2 = (params["conv2_b"] * m2).reshape(c2, 1).astype(jnp.float32)

    s1 = jnp.asarray(_make_shift_mats(h, w))       # [9, HW, HW]
    p1 = jnp.asarray(_make_pool_mats(h, w))        # [4, HW, HW/4]
    s2 = jnp.asarray(_make_shift_mats(h1, w1))     # [9, HW1, HW1]
    p2 = jnp.asarray(_make_pool_mats(h1, w1))      # [4, HW1, HW1/4]

    fc1_wt = jnp.transpose(params["fc1_w"]).astype(jnp.float32)    # [C2*H2*W2, 32]
    fc1_b = params["fc1_b"].reshape(1, -1).astype(jnp.float32)
    fc2_wt = jnp.transpose(params["fc2_w"]).astype(jnp.float32)    # [32, 10]
    fc2_b = params["fc2_b"].reshape(1, -1).astype(jnp.float32)

    # ---- fused feature extractor (one pallas_call, grid over batch) --------
    x3d = x_nchw.astype(jnp.float32).reshape(n, cin, h * w)        # [N, Cin, HW]
    feats = _features_call(x3d, mean_col, w1_taps, b1, s1, p1,
                           w2_taps, b2, s2, p2)                    # [N, C2, H2*W2]

    # Row-major flatten of [C2, H2*W2] == PyTorch NCHW out.reshape(N, -1).
    xf = feats.reshape(n, c2 * h2 * w2)

    # ---- fused classifier (one pallas_call) --------------------------------
    return _classifier_call(xf, fc1_wt, fc1_b, fc2_wt, fc2_b)


# ----------------------------------------------------------------------------
# Pure-JAX reference (for a correctness self-check)
# ----------------------------------------------------------------------------

def _reference_forward(x, params, idx_list):
    hi = jax.lax.Precision.HIGHEST
    mean = jnp.asarray(_MEAN, jnp.float32).reshape(1, 3, 1, 1)
    std = jnp.asarray(_STD, jnp.float32).reshape(1, 3, 1, 1)
    out = (x.astype(jnp.float32) - mean) / std

    def conv(v, wgt, b):
        y = jax.lax.conv_general_dilated(
            v, wgt, (1, 1), ((1, 1), (1, 1)),
            dimension_numbers=("NCHW", "OIHW", "NCHW"), precision=hi)
        return y + b.reshape(1, -1, 1, 1)

    def mask(v, idx):
        if len(idx) == 0:
            return v
        m = jnp.ones((v.shape[1],), v.dtype).at[jnp.asarray(idx)].set(0.0)
        return v * m.reshape(1, -1, 1, 1)

    def pool(v):
        return jax.lax.reduce_window(v, -jnp.inf, jax.lax.max,
                                     (1, 1, 2, 2), (1, 1, 2, 2), "VALID")

    out = mask(conv(out, params["conv1_w"], params["conv1_b"]), idx_list[0])
    out = mask(jnp.maximum(out, 0.0), idx_list[1])
    out = mask(pool(out), idx_list[2])
    out = mask(conv(out, params["conv2_w"], params["conv2_b"]), idx_list[3])
    out = mask(jnp.maximum(out, 0.0), idx_list[4])
    out = mask(pool(out), idx_list[5])
    out = out.reshape(out.shape[0], -1)
    out = jnp.maximum(
        jnp.dot(out, params["fc1_w"].T, precision=hi) + params["fc1_b"], 0.0)
    return jnp.dot(out, params["fc2_w"].T, precision=hi) + params["fc2_b"]


# ----------------------------------------------------------------------------
# Deterministic synthetic parameters + example run
# ----------------------------------------------------------------------------

if __name__ == "__main__":
    key = jax.random.PRNGKey(0)
    ks = jax.random.split(key, 9)

    N, C, H, W = 2, 3, 16, 16
    x = jax.random.uniform(ks[0], (N, C, H, W), jnp.float32)

    params = {
        "conv1_w": 0.1 * jax.random.normal(ks[1], (8, 3, 3, 3), jnp.float32),
        "conv1_b": 0.1 * jax.random.normal(ks[2], (8,), jnp.float32),
        "conv2_w": 0.1 * jax.random.normal(ks[3], (16, 8, 3, 3), jnp.float32),
        "conv2_b": 0.1 * jax.random.normal(ks[4], (16,), jnp.float32),
        "fc1_w": 0.05 * jax.random.normal(ks[5], (32, 16 * 4 * 4), jnp.float32),
        "fc1_b": 0.05 * jax.random.normal(ks[6], (32,), jnp.float32),
        "fc2_w": 0.05 * jax.random.normal(ks[7], (10, 32), jnp.float32),
        "fc2_b": 0.05 * jax.random.normal(ks[8], (10,), jnp.float32),
    }

    # one zeroed-channel list per feature layer (conv, relu, pool, conv, relu, pool)
    idx_list = [[], [1], [], [2, 5], [], [0, 3]]

    fwd = jax.jit(lambda xx, pp: modified_vgg_forward(xx, pp, idx_list))
    out = jax.block_until_ready(fwd(x, params))

    ref = jax.block_until_ready(_reference_forward(x, params, idx_list))

    assert out.shape == (N, 10)
    assert bool(jnp.all(jnp.isfinite(out)))
    assert bool(jnp.allclose(out, ref, atol=2e-2, rtol=2e-2))
    print("KERNEL_OK")
</pallas_src>

<mosaic_0001>
module attributes {stable_mosaic.version = 11 : i64} {
  func.func @_features_kernel(%arg0: i32, %arg1: memref<1x3x256xf32, #tpu.memory_space<vmem>>, %arg2: memref<3x1xf32, #tpu.memory_space<vmem>>, %arg3: memref<9x8x3xf32, #tpu.memory_space<vmem>>, %arg4: memref<8x1xf32, #tpu.memory_space<vmem>>, %arg5: memref<9x256x256xf32, #tpu.memory_space<vmem>>, %arg6: memref<4x256x64xf32, #tpu.memory_space<vmem>>, %arg7: memref<9x16x8xf32, #tpu.memory_space<vmem>>, %arg8: memref<16x1xf32, #tpu.memory_space<vmem>>, %arg9: memref<9x64x64xf32, #tpu.memory_space<vmem>>, %arg10: memref<4x64x16xf32, #tpu.memory_space<vmem>>, %arg11: memref<1x16x16xf32, #tpu.memory_space<vmem>>) attributes {dimension_semantics = [#tpu.dimension_semantics<parallel>], iteration_bounds = array<i64: 2>, scalar_prefetch = 0 : i64, scratch_operands = 0 : i64, tpu.core_type = #tpu.core_type<tc>, window_params = [{transform_indices = @transform_0, window_bounds = array<i64: 1, 3, 256>}, {pipeline_mode = #tpu.pipeline_mode<synchronous>, transform_indices = @transform_1, window_bounds = array<i64: 3, 1>}, {pipeline_mode = #tpu.pipeline_mode<synchronous>, transform_indices = @transform_2, window_bounds = array<i64: 9, 8, 3>}, {pipeline_mode = #tpu.pipeline_mode<synchronous>, transform_indices = @transform_3, window_bounds = array<i64: 8, 1>}, {pipeline_mode = #tpu.pipeline_mode<synchronous>, transform_indices = @transform_4, window_bounds = array<i64: 9, 256, 256>}, {pipeline_mode = #tpu.pipeline_mode<synchronous>, transform_indices = @transform_5, window_bounds = array<i64: 4, 256, 64>}, {pipeline_mode = #tpu.pipeline_mode<synchronous>, transform_indices = @transform_6, window_bounds = array<i64: 9, 16, 8>}, {pipeline_mode = #tpu.pipeline_mode<synchronous>, transform_indices = @transform_7, window_bounds = array<i64: 16, 1>}, {pipeline_mode = #tpu.pipeline_mode<synchronous>, transform_indices = @transform_8, window_bounds = array<i64: 9, 64, 64>}, {pipeline_mode = #tpu.pipeline_mode<synchronous>, transform_indices = @transform_9, window_bounds = array<i64: 4, 64, 16>}, {transform_indices = @transform_10, window_bounds = array<i64: 1, 16, 16>}]} {
    %c0 = arith.constant 0 : index
    %c0_0 = arith.constant 0 : index
    %c0_1 = arith.constant 0 : index
    %0 = vector.load %arg1[%c0, %c0_0, %c0_1] : memref<1x3x256xf32, #tpu.memory_space<vmem>>, vector<1x3x256xf32>
    %1 = vector.shape_cast %0 : vector<1x3x256xf32> to vector<3x256xf32>
    %c0_2 = arith.constant 0 : index
    %c0_3 = arith.constant 0 : index
    %2 = vector.load %arg2[%c0_2, %c0_3] : memref<3x1xf32, #tpu.memory_space<vmem>>, vector<3x1xf32>
    %3 = vector.broadcast %2 : vector<3x1xf32> to vector<3x256xf32>
    %4 = arith.subf %1, %3 : vector<3x256xf32>
    %c0_4 = arith.constant 0 : index
    %c0_5 = arith.constant 0 : index
    %c0_6 = arith.constant 0 : index
    %5 = vector.load %arg3[%c0_4, %c0_5, %c0_6] : memref<9x8x3xf32, #tpu.memory_space<vmem>>, vector<1x8x3xf32>
    %6 = vector.shape_cast %5 : vector<1x8x3xf32> to vector<8x3xf32>
    %cst = arith.constant dense<0.000000e+00> : vector<8x256xf32>
    %7 = tpu.matmul %6, %4, %cst {dimension_numbers = #tpu.dot_dimension_numbers<[1], [0], [0], [1], [0, 0, 1, 1], [], []>} : vector<8x3xf32>, vector<3x256xf32>, vector<8x256xf32> -> vector<8x256xf32>
    %c0_7 = arith.constant 0 : index
    %c0_8 = arith.constant 0 : index
    %c0_9 = arith.constant 0 : index
    %8 = vector.load %arg5[%c0_7, %c0_8, %c0_9] : memref<9x256x256xf32, #tpu.memory_space<vmem>>, vector<1x256x256xf32>
    %9 = vector.shape_cast %8 : vector<1x256x256xf32> to vector<256x256xf32>
    %cst_10 = arith.constant dense<0.000000e+00> : vector<8x256xf32>
    %10 = tpu.matmul %7, %9, %cst_10 {dimension_numbers = #tpu.dot_dimension_numbers<[1], [0], [0], [1], [0, 0, 1, 1], [], []>} : vector<8x256xf32>, vector<256x256xf32>, vector<8x256xf32> -> vector<8x256xf32>
    %c1 = arith.constant 1 : index
    %c0_11 = arith.constant 0 : index
    %c0_12 = arith.constant 0 : index
    %11 = vector.load %arg3[%c1, %c0_11, %c0_12] : memref<9x8x3xf32, #tpu.memory_space<vmem>>, vector<1x8x3xf32>
    %12 = vector.shape_cast %11 : vector<1x8x3xf32> to vector<8x3xf32>
    %cst_13 = arith.constant dense<0.000000e+00> : vector<8x256xf32>
    %13 = tpu.matmul %12, %4, %cst_13 {dimension_numbers = #tpu.dot_dimension_numbers<[1], [0], [0], [1], [0, 0, 1, 1], [], []>} : vector<8x3xf32>, vector<3x256xf32>, vector<8x256xf32> -> vector<8x256xf32>
    %c1_14 = arith.constant 1 : index
    %c0_15 = arith.constant 0 : index
    %c0_16 = arith.constant 0 : index
    %14 = vector.load %arg5[%c1_14, %c0_15, %c0_16] : memref<9x256x256xf32, #tpu.memory_space<vmem>>, vector<1x256x256xf32>
    %15 = vector.shape_cast %14 : vector<1x256x256xf32> to vector<256x256xf32>
    %cst_17 = arith.constant dense<0.000000e+00> : vector<8x256xf32>
    %16 = tpu.matmul %13, %15, %cst_17 {dimension_numbers = #tpu.dot_dimension_numbers<[1], [0], [0], [1], [0, 0, 1, 1], [], []>} : vector<8x256xf32>, vector<256x256xf32>, vector<8x256xf32> -> vector<8x256xf32>
    %17 = arith.addf %10, %16 : vector<8x256xf32>
    %c2 = arith.constant 2 : index
    %c0_18 = arith.constant 0 : index
    %c0_19 = arith.constant 0 : index
    %18 = vector.load %arg3[%c2, %c0_18, %c0_19] : memref<9x8x3xf32, #tpu.memory_space<vmem>>, vector<1x8x3xf32>
    %19 = vector.shape_cast %18 : vector<1x8x3xf32> to vector<8x3xf32>
    %cst_20 = arith.constant dense<0.000000e+00> : vector<8x256xf32>
    %20 = tpu.matmul %19, %4, %cst_20 {dimension_numbers = #tpu.dot_dimension_numbers<[1], [0], [0], [1], [0, 0, 1, 1], [], []>} : vector<8x3xf32>, vector<3x256xf32>, vector<8x256xf32> -> vector<8x256xf32>
    %c2_21 = arith.constant 2 : index
    %c0_22 = arith.constant 0 : index
    %c0_23 = arith.constant 0 : index
    %21 = vector.load %arg5[%c2_21, %c0_22, %c0_23] : memref<9x256x256xf32, #tpu.memory_space<vmem>>, vector<1x256x256xf32>
    %22 = vector.shape_cast %21 : vector<1x256x256xf32> to vector<256x256xf32>
    %cst_24 = arith.constant dense<0.000000e+00> : vector<8x256xf32>
    %23 = tpu.matmul %20, %22, %cst_24 {dimension_numbers = #tpu.dot_dimension_numbers<[1], [0], [0], [1], [0, 0, 1, 1], [], []>} : vector<8x256xf32>, vector<256x256xf32>, vector<8x256xf32> -> vector<8x256xf32>
    %24 = arith.addf %17, %23 : vector<8x256xf32>
    %c3 = arith.constant 3 : index
    %c0_25 = arith.constant 0 : index
    %c0_26 = arith.constant 0 : index
    %25 = vector.load %arg3[%c3, %c0_25, %c0_26] : memref<9x8x3xf32, #tpu.memory_space<vmem>>, vector<1x8x3xf32>
    %26 = vector.shape_cast %25 : vector<1x8x3xf32> to vector<8x3xf32>
    %cst_27 = arith.constant dense<0.000000e+00> : vector<8x256xf32>
    %27 = tpu.matmul %26, %4, %cst_27 {dimension_numbers = #tpu.dot_dimension_numbers<[1], [0], [0], [1], [0, 0, 1, 1], [], []>} : vector<8x3xf32>, vector<3x256xf32>, vector<8x256xf32> -> vector<8x256xf32>
    %c3_28 = arith.constant 3 : index
    %c0_29 = arith.constant 0 : index
    %c0_30 = arith.constant 0 : index
    %28 = vector.load %arg5[%c3_28, %c0_29, %c0_30] : memref<9x256x256xf32, #tpu.memory_space<vmem>>, vector<1x256x256xf32>
    %29 = vector.shape_cast %28 : vector<1x256x256xf32> to vector<256x256xf32>
    %cst_31 = arith.constant dense<0.000000e+00> : vector<8x256xf32>
    %30 = tpu.matmul %27, %29, %cst_31 {dimension_numbers = #tpu.dot_dimension_numbers<[1], [0], [0], [1], [0, 0, 1, 1], [], []>} : vector<8x256xf32>, vector<256x256xf32>, vector<8x256xf32> -> vector<8x256xf32>
    %31 = arith.addf %24, %30 : vector<8x256xf32>
    %c4 = arith.constant 4 : index
    %c0_32 = arith.constant 0 : index
    %c0_33 = arith.constant 0 : index
    %32 = vector.load %arg3[%c4, %c0_32, %c0_33] : memref<9x8x3xf32, #tpu.memory_space<vmem>>, vector<1x8x3xf32>
    %33 = vector.shape_cast %32 : vector<1x8x3xf32> to vector<8x3xf32>
    %cst_34 = arith.constant dense<0.000000e+00> : vector<8x256xf32>
    %34 = tpu.matmul %33, %4, %cst_34 {dimension_numbers = #tpu.dot_dimension_numbers<[1], [0], [0], [1], [0, 0, 1, 1], [], []>} : vector<8x3xf32>, vector<3x256xf32>, vector<8x256xf32> -> vector<8x256xf32>
    %c4_35 = arith.constant 4 : index
    %c0_36 = arith.constant 0 : index
    %c0_37 = arith.constant 0 : index
    %35 = vector.load %arg5[%c4_35, %c0_36, %c0_37] : memref<9x256x256xf32, #tpu.memory_space<vmem>>, vector<1x256x256xf32>
    %36 = vector.shape_cast %35 : vector<1x256x256xf32> to vector<256x256xf32>
    %cst_38 = arith.constant dense<0.000000e+00> : vector<8x256xf32>
    %37 = tpu.matmul %34, %36, %cst_38 {dimension_numbers = #tpu.dot_dimension_numbers<[1], [0], [0], [1], [0, 0, 1, 1], [], []>} : vector<8x256xf32>, vector<256x256xf32>, vector<8x256xf32> -> vector<8x256xf32>
    %38 = arith.addf %31, %37 : vector<8x256xf32>
    %c5 = arith.constant 5 : index
    %c0_39 = arith.constant 0 : index
    %c0_40 = arith.constant 0 : index
    %39 = vector.load %arg3[%c5, %c0_39, %c0_40] : memref<9x8x3xf32, #tpu.memory_space<vmem>>, vector<1x8x3xf32>
    %40 = vector.shape_cast %39 : vector<1x8x3xf32> to vector<8x3xf32>
    %cst_41 = arith.constant dense<0.000000e+00> : vector<8x256xf32>
    %41 = tpu.matmul %40, %4, %cst_41 {dimension_numbers = #tpu.dot_dimension_numbers<[1], [0], [0], [1], [0, 0, 1, 1], [], []>} : vector<8x3xf32>, vector<3x256xf32>, vector<8x256xf32> -> vector<8x256xf32>
    %c5_42 = arith.constant 5 : index
    %c0_43 = arith.constant 0 : index
    %c0_44 = arith.constant 0 : index
    %42 = vector.load %arg5[%c5_42, %c0_43, %c0_44] : memref<9x256x256xf32, #tpu.memory_space<vmem>>, vector<1x256x256xf32>
    %43 = vector.shape_cast %42 : vector<1x256x256xf32> to vector<256x256xf32>
    %cst_45 = arith.constant dense<0.000000e+00> : vector<8x256xf32>
    %44 = tpu.matmul %41, %43, %cst_45 {dimension_numbers = #tpu.dot_dimension_numbers<[1], [0], [0], [1], [0, 0, 1, 1], [], []>} : vector<8x256xf32>, vector<256x256xf32>, vector<8x256xf32> -> vector<8x256xf32>
    %45 = arith.addf %38, %44 : vector<8x256xf32>
    %c6 = arith.constant 6 : index
    %c0_46 = arith.constant 0 : index
    %c0_47 = arith.constant 0 : index
    %46 = vector.load %arg3[%c6, %c0_46, %c0_47] : memref<9x8x3xf32, #tpu.memory_space<vmem>>, vector<1x8x3xf32>
    %47 = vector.shape_cast %46 : vector<1x8x3xf32> to vector<8x3xf32>
    %cst_48 = arith.constant dense<0.000000e+00> : vector<8x256xf32>
    %48 = tpu.matmul %47, %4, %cst_48 {dimension_numbers = #tpu.dot_dimension_numbers<[1], [0], [0], [1], [0, 0, 1, 1], [], []>} : vector<8x3xf32>, vector<3x256xf32>, vector<8x256xf32> -> vector<8x256xf32>
    %c6_49 = arith.constant 6 : index
    %c0_50 = arith.constant 0 : index
    %c0_51 = arith.constant 0 : index
    %49 = vector.load %arg5[%c6_49, %c0_50, %c0_51] : memref<9x256x256xf32, #tpu.memory_space<vmem>>, vector<1x256x256xf32>
    %50 = vector.shape_cast %49 : vector<1x256x256xf32> to vector<256x256xf32>
    %cst_52 = arith.constant dense<0.000000e+00> : vector<8x256xf32>
    %51 = tpu.matmul %48, %50, %cst_52 {dimension_numbers = #tpu.dot_dimension_numbers<[1], [0], [0], [1], [0, 0, 1, 1], [], []>} : vector<8x256xf32>, vector<256x256xf32>, vector<8x256xf32> -> vector<8x256xf32>
    %52 = arith.addf %45, %51 : vector<8x256xf32>
    %c7 = arith.constant 7 : index
    %c0_53 = arith.constant 0 : index
    %c0_54 = arith.constant 0 : index
    %53 = vector.load %arg3[%c7, %c0_53, %c0_54] : memref<9x8x3xf32, #tpu.memory_space<vmem>>, vector<1x8x3xf32>
    %54 = vector.shape_cast %53 : vector<1x8x3xf32> to vector<8x3xf32>
    %cst_55 = arith.constant dense<0.000000e+00> : vector<8x256xf32>
    %55 = tpu.matmul %54, %4, %cst_55 {dimension_numbers = #tpu.dot_dimension_numbers<[1], [0], [0], [1], [0, 0, 1, 1], [], []>} : vector<8x3xf32>, vector<3x256xf32>, vector<8x256xf32> -> vector<8x256xf32>
    %c7_56 = arith.constant 7 : index
    %c0_57 = arith.constant 0 : index
    %c0_58 = arith.constant 0 : index
    %56 = vector.load %arg5[%c7_56, %c0_57, %c0_58] : memref<9x256x256xf32, #tpu.memory_space<vmem>>, vector<1x256x256xf32>
    %57 = vector.shape_cast %56 : vector<1x256x256xf32> to vector<256x256xf32>
    %cst_59 = arith.constant dense<0.000000e+00> : vector<8x256xf32>
    %58 = tpu.matmul %55, %57, %cst_59 {dimension_numbers = #tpu.dot_dimension_numbers<[1], [0], [0], [1], [0, 0, 1, 1], [], []>} : vector<8x256xf32>, vector<256x256xf32>, vector<8x256xf32> -> vector<8x256xf32>
    %59 = arith.addf %52, %58 : vector<8x256xf32>
    %c8 = arith.constant 8 : index
    %c0_60 = arith.constant 0 : index
    %c0_61 = arith.constant 0 : index
    %60 = vector.load %arg3[%c8, %c0_60, %c0_61] : memref<9x8x3xf32, #tpu.memory_space<vmem>>, vector<1x8x3xf32>
    %61 = vector.shape_cast %60 : vector<1x8x3xf32> to vector<8x3xf32>
    %cst_62 = arith.constant dense<0.000000e+00> : vector<8x256xf32>
    %62 = tpu.matmul %61, %4, %cst_62 {dimension_numbers = #tpu.dot_dimension_numbers<[1], [0], [0], [1], [0, 0, 1, 1], [], []>} : vector<8x3xf32>, vector<3x256xf32>, vector<8x256xf32> -> vector<8x256xf32>
    %c8_63 = arith.constant 8 : index
    %c0_64 = arith.constant 0 : index
    %c0_65 = arith.constant 0 : index
    %63 = vector.load %arg5[%c8_63, %c0_64, %c0_65] : memref<9x256x256xf32, #tpu.memory_space<vmem>>, vector<1x256x256xf32>
    %64 = vector.shape_cast %63 : vector<1x256x256xf32> to vector<256x256xf32>
    %cst_66 = arith.constant dense<0.000000e+00> : vector<8x256xf32>
    %65 = tpu.matmul %62, %64, %cst_66 {dimension_numbers = #tpu.dot_dimension_numbers<[1], [0], [0], [1], [0, 0, 1, 1], [], []>} : vector<8x256xf32>, vector<256x256xf32>, vector<8x256xf32> -> vector<8x256xf32>
    %66 = arith.addf %59, %65 : vector<8x256xf32>
    %c0_67 = arith.constant 0 : index
    %c0_68 = arith.constant 0 : index
    %67 = vector.load %arg4[%c0_67, %c0_68] : memref<8x1xf32, #tpu.memory_space<vmem>>, vector<8x1xf32>
    %68 = vector.broadcast %67 : vector<8x1xf32> to vector<8x256xf32>
    %69 = arith.addf %66, %68 : vector<8x256xf32>
    %cst_69 = arith.constant 0.000000e+00 : f32
    %70 = vector.broadcast %cst_69 : f32 to vector<8x256xf32>
    %71 = arith.maximumf %69, %70 : vector<8x256xf32>
    %c0_70 = arith.constant 0 : index
    %c0_71 = arith.constant 0 : index
    %c0_72 = arith.constant 0 : index
    %72 = vector.load %arg6[%c0_70, %c0_71, %c0_72] : memref<4x256x64xf32, #tpu.memory_space<vmem>>, vector<1x256x64xf32>
    %73 = vector.shape_cast %72 : vector<1x256x64xf32> to vector<256x64xf32>
    %cst_73 = arith.constant dense<0.000000e+00> : vector<8x64xf32>
    %74 = tpu.matmul %71, %73, %cst_73 {dimension_numbers = #tpu.dot_dimension_numbers<[1], [0], [0], [1], [0, 0, 1, 1], [], []>} : vector<8x256xf32>, vector<256x64xf32>, vector<8x64xf32> -> vector<8x64xf32>
    %c1_74 = arith.constant 1 : index
    %c0_75 = arith.constant 0 : index
    %c0_76 = arith.constant 0 : index
    %75 = vector.load %arg6[%c1_74, %c0_75, %c0_76] : memref<4x256x64xf32, #tpu.memory_space<vmem>>, vector<1x256x64xf32>
    %76 = vector.shape_cast %75 : vector<1x256x64xf32> to vector<256x64xf32>
    %cst_77 = arith.constant dense<0.000000e+00> : vector<8x64xf32>
    %77 = tpu.matmul %71, %76, %cst_77 {dimension_numbers = #tpu.dot_dimension_numbers<[1], [0], [0], [1], [0, 0, 1, 1], [], []>} : vector<8x256xf32>, vector<256x64xf32>, vector<8x64xf32> -> vector<8x64xf32>
    %c2_78 = arith.constant 2 : index
    %c0_79 = arith.constant 0 : index
    %c0_80 = arith.constant 0 : index
    %78 = vector.load %arg6[%c2_78, %c0_79, %c0_80] : memref<4x256x64xf32, #tpu.memory_space<vmem>>, vector<1x256x64xf32>
    %79 = vector.shape_cast %78 : vector<1x256x64xf32> to vector<256x64xf32>
    %cst_81 = arith.constant dense<0.000000e+00> : vector<8x64xf32>
    %80 = tpu.matmul %71, %79, %cst_81 {dimension_numbers = #tpu.dot_dimension_numbers<[1], [0], [0], [1], [0, 0, 1, 1], [], []>} : vector<8x256xf32>, vector<256x64xf32>, vector<8x64xf32> -> vector<8x64xf32>
    %c3_82 = arith.constant 3 : index
    %c0_83 = arith.constant 0 : index
    %c0_84 = arith.constant 0 : index
    %81 = vector.load %arg6[%c3_82, %c0_83, %c0_84] : memref<4x256x64xf32, #tpu.memory_space<vmem>>, vector<1x256x64xf32>
    %82 = vector.shape_cast %81 : vector<1x256x64xf32> to vector<256x64xf32>
    %cst_85 = arith.constant dense<0.000000e+00> : vector<8x64xf32>
    %83 = tpu.matmul %71, %82, %cst_85 {dimension_numbers = #tpu.dot_dimension_numbers<[1], [0], [0], [1], [0, 0, 1, 1], [], []>} : vector<8x256xf32>, vector<256x64xf32>, vector<8x64xf32> -> vector<8x64xf32>
    %84 = arith.maximumf %74, %77 : vector<8x64xf32>
    %85 = arith.maximumf %80, %83 : vector<8x64xf32>
    %86 = arith.maximumf %84, %85 : vector<8x64xf32>
    %c0_86 = arith.constant 0 : index
    %c0_87 = arith.constant 0 : index
    %c0_88 = arith.constant 0 : index
    %87 = vector.load %arg7[%c0_86, %c0_87, %c0_88] : memref<9x16x8xf32, #tpu.memory_space<vmem>>, vector<1x16x8xf32>
    %88 = vector.shape_cast %87 : vector<1x16x8xf32> to vector<16x8xf32>
    %cst_89 = arith.constant dense<0.000000e+00> : vector<16x64xf32>
    %89 = tpu.matmul %88, %86, %cst_89 {dimension_numbers = #tpu.dot_dimension_numbers<[1], [0], [0], [1], [0, 0, 1, 1], [], []>} : vector<16x8xf32>, vector<8x64xf32>, vector<16x64xf32> -> vector<16x64xf32>
    %c0_90 = arith.constant 0 : index
    %c0_91 = arith.constant 0 : index
    %c0_92 = arith.constant 0 : index
    %90 = vector.load %arg9[%c0_90, %c0_91, %c0_92] : memref<9x64x64xf32, #tpu.memory_space<vmem>>, vector<1x64x64xf32>
    %91 = vector.shape_cast %90 : vector<1x64x64xf32> to vector<64x64xf32>
    %cst_93 = arith.constant dense<0.000000e+00> : vector<16x64xf32>
    %92 = tpu.matmul %89, %91, %cst_93 {dimension_numbers = #tpu.dot_dimension_numbers<[1], [0], [0], [1], [0, 0, 1, 1], [], []>} : vector<16x64xf32>, vector<64x64xf32>, vector<16x64xf32> -> vector<16x64xf32>
    %c1_94 = arith.constant 1 : index
    %c0_95 = arith.constant 0 : index
    %c0_96 = arith.constant 0 : index
    %93 = vector.load %arg7[%c1_94, %c0_95, %c0_96] : memref<9x16x8xf32, #tpu.memory_space<vmem>>, vector<1x16x8xf32>
    %94 = vector.shape_cast %93 : vector<1x16x8xf32> to vector<16x8xf32>
    %cst_97 = arith.constant dense<0.000000e+00> : vector<16x64xf32>
    %95 = tpu.matmul %94, %86, %cst_97 {dimension_numbers = #tpu.dot_dimension_numbers<[1], [0], [0], [1], [0, 0, 1, 1], [], []>} : vector<16x8xf32>, vector<8x64xf32>, vector<16x64xf32> -> vector<16x64xf32>
    %c1_98 = arith.constant 1 : index
    %c0_99 = arith.constant 0 : index
    %c0_100 = arith.constant 0 : index
    %96 = vector.load %arg9[%c1_98, %c0_99, %c0_100] : memref<9x64x64xf32, #tpu.memory_space<vmem>>, vector<1x64x64xf32>
    %97 = vector.shape_cast %96 : vector<1x64x64xf32> to vector<64x64xf32>
    %cst_101 = arith.constant dense<0.000000e+00> : vector<16x64xf32>
    %98 = tpu.matmul %95, %97, %cst_101 {dimension_numbers = #tpu.dot_dimension_numbers<[1], [0], [0], [1], [0, 0, 1, 1], [], []>} : vector<16x64xf32>, vector<64x64xf32>, vector<16x64xf32> -> vector<16x64xf32>
    %99 = arith.addf %92, %98 : vector<16x64xf32>
    %c2_102 = arith.constant 2 : index
    %c0_103 = arith.constant 0 : index
    %c0_104 = arith.constant 0 : index
    %100 = vector.load %arg7[%c2_102, %c0_103, %c0_104] : memref<9x16x8xf32, #tpu.memory_space<vmem>>, vector<1x16x8xf32>
    %101 = vector.shape_cast %100 : vector<1x16x8xf32> to vector<16x8xf32>
    %cst_105 = arith.constant dense<0.000000e+00> : vector<16x64xf32>
    %102 = tpu.matmul %101, %86, %cst_105 {dimension_numbers = #tpu.dot_dimension_numbers<[1], [0], [0], [1], [0, 0, 1, 1], [], []>} : vector<16x8xf32>, vector<8x64xf32>, vector<16x64xf32> -> vector<16x64xf32>
    %c2_106 = arith.constant 2 : index
    %c0_107 = arith.constant 0 : index
    %c0_108 = arith.constant 0 : index
    %103 = vector.load %arg9[%c2_106, %c0_107, %c0_108] : memref<9x64x64xf32, #tpu.memory_space<vmem>>, vector<1x64x64xf32>
    %104 = vector.shape_cast %103 : vector<1x64x64xf32> to vector<64x64xf32>
    %cst_109 = arith.constant dense<0.000000e+00> : vector<16x64xf32>
    %105 = tpu.matmul %102, %104, %cst_109 {dimension_numbers = #tpu.dot_dimension_numbers<[1], [0], [0], [1], [0, 0, 1, 1], [], []>} : vector<16x64xf32>, vector<64x64xf32>, vector<16x64xf32> -> vector<16x64xf32>
    %106 = arith.addf %99, %105 : vector<16x64xf32>
    %c3_110 = arith.constant 3 : index
    %c0_111 = arith.constant 0 : index
    %c0_112 = arith.constant 0 : index
    %107 = vector.load %arg7[%c3_110, %c0_111, %c0_112] : memref<9x16x8xf32, #tpu.memory_space<vmem>>, vector<1x16x8xf32>
    %108 = vector.shape_cast %107 : vector<1x16x8xf32> to vector<16x8xf32>
    %cst_113 = arith.constant dense<0.000000e+00> : vector<16x64xf32>
    %109 = tpu.matmul %108, %86, %cst_113 {dimension_numbers = #tpu.dot_dimension_numbers<[1], [0], [0], [1], [0, 0, 1, 1], [], []>} : vector<16x8xf32>, vector<8x64xf32>, vector<16x64xf32> -> vector<16x64xf32>
    %c3_114 = arith.constant 3 : index
    %c0_115 = arith.constant 0 : index
    %c0_116 = arith.constant 0 : index
    %110 = vector.load %arg9[%c3_114, %c0_115, %c0_116] : memref<9x64x64xf32, #tpu.memory_space<vmem>>, vector<1x64x64xf32>
    %111 = vector.shape_cast %110 : vector<1x64x64xf32> to vector<64x64xf32>
    %cst_117 = arith.constant dense<0.000000e+00> : vector<16x64xf32>
    %112 = tpu.matmul %109, %111, %cst_117 {dimension_numbers = #tpu.dot_dimension_numbers<[1], [0], [0], [1], [0, 0, 1, 1], [], []>} : vector<16x64xf32>, vector<64x64xf32>, vector<16x64xf32> -> vector<16x64xf32>
    %113 = arith.addf %106, %112 : vector<16x64xf32>
    %c4_118 = arith.constant 4 : index
    %c0_119 = arith.constant 0 : index
    %c0_120 = arith.constant 0 : index
    %114 = vector.load %arg7[%c4_118, %c0_119, %c0_120] : memref<9x16x8xf32, #tpu.memory_space<vmem>>, vector<1x16x8xf32>
    %115 = vector.shape_cast %114 : vector<1x16x8xf32> to vector<16x8xf32>
    %cst_121 = arith.constant dense<0.000000e+00> : vector<16x64xf32>
    %116 = tpu.matmul %115, %86, %cst_121 {dimension_numbers = #tpu.dot_dimension_numbers<[1], [0], [0], [1], [0, 0, 1, 1], [], []>} : vector<16x8xf32>, vector<8x64xf32>, vector<16x64xf32> -> vector<16x64xf32>
    %c4_122 = arith.constant 4 : index
    %c0_123 = arith.constant 0 : index
    %c0_124 = arith.constant 0 : index
    %117 = vector.load %arg9[%c4_122, %c0_123, %c0_124] : memref<9x64x64xf32, #tpu.memory_space<vmem>>, vector<1x64x64xf32>
    %118 = vector.shape_cast %117 : vector<1x64x64xf32> to vector<64x64xf32>
    %cst_125 = arith.constant dense<0.000000e+00> : vector<16x64xf32>
    %119 = tpu.matmul %116, %118, %cst_125 {dimension_numbers = #tpu.dot_dimension_numbers<[1], [0], [0], [1], [0, 0, 1, 1], [], []>} : vector<16x64xf32>, vector<64x64xf32>, vector<16x64xf32> -> vector<16x64xf32>
    %120 = arith.addf %113, %119 : vector<16x64xf32>
    %c5_126 = arith.constant 5 : index
    %c0_127 = arith.constant 0 : index
    %c0_128 = arith.constant 0 : index
    %121 = vector.load %arg7[%c5_126, %c0_127, %c0_128] : memref<9x16x8xf32, #tpu.memory_space<vmem>>, vector<1x16x8xf32>
    %122 = vector.shape_cast %121 : vector<1x16x8xf32> to vector<16x8xf32>
    %cst_129 = arith.constant dense<0.000000e+00> : vector<16x64xf32>
    %123 = tpu.matmul %122, %86, %cst_129 {dimension_numbers = #tpu.dot_dimension_numbers<[1], [0], [0], [1], [0, 0, 1, 1], [], []>} : vector<16x8xf32>, vector<8x64xf32>, vector<16x64xf32> -> vector<16x64xf32>
    %c5_130 = arith.constant 5 : index
    %c0_131 = arith.constant 0 : index
    %c0_132 = arith.constant 0 : index
    %124 = vector.load %arg9[%c5_130, %c0_131, %c0_132] : memref<9x64x64xf32, #tpu.memory_space<vmem>>, vector<1x64x64xf32>
    %125 = vector.shape_cast %124 : vector<1x64x64xf32> to vector<64x64xf32>
    %cst_133 = arith.constant dense<0.000000e+00> : vector<16x64xf32>
    %126 = tpu.matmul %123, %125, %cst_133 {dimension_numbers = #tpu.dot_dimension_numbers<[1], [0], [0], [1], [0, 0, 1, 1], [], []>} : vector<16x64xf32>, vector<64x64xf32>, vector<16x64xf32> -> vector<16x64xf32>
    %127 = arith.addf %120, %126 : vector<16x64xf32>
    %c6_134 = arith.constant 6 : index
    %c0_135 = arith.constant 0 : index
    %c0_136 = arith.constant 0 : index
    %128 = vector.load %arg7[%c6_134, %c0_135, %c0_136] : memref<9x16x8xf32, #tpu.memory_space<vmem>>, vector<1x16x8xf32>
    %129 = vector.shape_cast %128 : vector<1x16x8xf32> to vector<16x8xf32>
    %cst_137 = arith.constant dense<0.000000e+00> : vector<16x64xf32>
    %130 = tpu.matmul %129, %86, %cst_137 {dimension_numbers = #tpu.dot_dimension_numbers<[1], [0], [0], [1], [0, 0, 1, 1], [], []>} : vector<16x8xf32>, vector<8x64xf32>, vector<16x64xf32> -> vector<16x64xf32>
    %c6_138 = arith.constant 6 : index
    %c0_139 = arith.constant 0 : index
    %c0_140 = arith.constant 0 : index
    %131 = vector.load %arg9[%c6_138, %c0_139, %c0_140] : memref<9x64x64xf32, #tpu.memory_space<vmem>>, vector<1x64x64xf32>
    %132 = vector.shape_cast %131 : vector<1x64x64xf32> to vector<64x64xf32>
    %cst_141 = arith.constant dense<0.000000e+00> : vector<16x64xf32>
    %133 = tpu.matmul %130, %132, %cst_141 {dimension_numbers = #tpu.dot_dimension_numbers<[1], [0], [0], [1], [0, 0, 1, 1], [], []>} : vector<16x64xf32>, vector<64x64xf32>, vector<16x64xf32> -> vector<16x64xf32>
    %134 = arith.addf %127, %133 : vector<16x64xf32>
    %c7_142 = arith.constant 7 : index
    %c0_143 = arith.constant 0 : index
    %c0_144 = arith.constant 0 : index
    %135 = vector.load %arg7[%c7_142, %c0_143, %c0_144] : memref<9x16x8xf32, #tpu.memory_space<vmem>>, vector<1x16x8xf32>
    %136 = vector.shape_cast %135 : vector<1x16x8xf32> to vector<16x8xf32>
    %cst_145 = arith.constant dense<0.000000e+00> : vector<16x64xf32>
    %137 = tpu.matmul %136, %86, %cst_145 {dimension_numbers = #tpu.dot_dimension_numbers<[1], [0], [0], [1], [0, 0, 1, 1], [], []>} : vector<16x8xf32>, vector<8x64xf32>, vector<16x64xf32> -> vector<16x64xf32>
    %c7_146 = arith.constant 7 : index
    %c0_147 = arith.constant 0 : index
    %c0_148 = arith.constant 0 : index
    %138 = vector.load %arg9[%c7_146, %c0_147, %c0_148] : memref<9x64x64xf32, #tpu.memory_space<vmem>>, vector<1x64x64xf32>
    %139 = vector.shape_cast %138 : vector<1x64x64xf32> to vector<64x64xf32>
    %cst_149 = arith.constant dense<0.000000e+00> : vector<16x64xf32>
    %140 = tpu.matmul %137, %139, %cst_149 {dimension_numbers = #tpu.dot_dimension_numbers<[1], [0], [0], [1], [0, 0, 1, 1], [], []>} : vector<16x64xf32>, vector<64x64xf32>, vector<16x64xf32> -> vector<16x64xf32>
    %141 = arith.addf %134, %140 : vector<16x64xf32>
    %c8_150 = arith.constant 8 : index
    %c0_151 = arith.constant 0 : index
    %c0_152 = arith.constant 0 : index
    %142 = vector.load %arg7[%c8_150, %c0_151, %c0_152] : memref<9x16x8xf32, #tpu.memory_space<vmem>>, vector<1x16x8xf32>
    %143 = vector.shape_cast %142 : vector<1x16x8xf32> to vector<16x8xf32>
    %cst_153 = arith.constant dense<0.000000e+00> : vector<16x64xf32>
    %144 = tpu.matmul %143, %86, %cst_153 {dimension_numbers = #tpu.dot_dimension_numbers<[1], [0], [0], [1], [0, 0, 1, 1], [], []>} : vector<16x8xf32>, vector<8x64xf32>, vector<16x64xf32> -> vector<16x64xf32>
    %c8_154 = arith.constant 8 : index
    %c0_155 = arith.constant 0 : index
    %c0_156 = arith.constant 0 : index
    %145 = vector.load %arg9[%c8_154, %c0_155, %c0_156] : memref<9x64x64xf32, #tpu.memory_space<vmem>>, vector<1x64x64xf32>
    %146 = vector.shape_cast %145 : vector<1x64x64xf32> to vector<64x64xf32>
    %cst_157 = arith.constant dense<0.000000e+00> : vector<16x64xf32>
    %147 = tpu.matmul %144, %146, %cst_157 {dimension_numbers = #tpu.dot_dimension_numbers<[1], [0], [0], [1], [0, 0, 1, 1], [], []>} : vector<16x64xf32>, vector<64x64xf32>, vector<16x64xf32> -> vector<16x64xf32>
    %148 = arith.addf %141, %147 : vector<16x64xf32>
    %c0_158 = arith.constant 0 : index
    %c0_159 = arith.constant 0 : index
    %149 = vector.load %arg8[%c0_158, %c0_159] : memref<16x1xf32, #tpu.memory_space<vmem>>, vector<16x1xf32>
    %150 = vector.broadcast %149 : vector<16x1xf32> to vector<16x64xf32>
    %151 = arith.addf %148, %150 : vector<16x64xf32>
    %cst_160 = arith.constant 0.000000e+00 : f32
    %152 = vector.broadcast %cst_160 : f32 to vector<16x64xf32>
    %153 = arith.maximumf %151, %152 : vector<16x64xf32>
    %c0_161 = arith.constant 0 : index
    %c0_162 = arith.constant 0 : index
    %c0_163 = arith.constant 0 : index
    %154 = vector.load %arg10[%c0_161, %c0_162, %c0_163] : memref<4x64x16xf32, #tpu.memory_space<vmem>>, vector<1x64x16xf32>
    %155 = vector.shape_cast %154 : vector<1x64x16xf32> to vector<64x16xf32>
    %cst_164 = arith.constant dense<0.000000e+00> : vector<16x16xf32>
    %156 = tpu.matmul %153, %155, %cst_164 {dimension_numbers = #tpu.dot_dimension_numbers<[1], [0], [0], [1], [0, 0, 1, 1], [], []>} : vector<16x64xf32>, vector<64x16xf32>, vector<16x16xf32> -> vector<16x16xf32>
    %c1_165 = arith.constant 1 : index
    %c0_166 = arith.constant 0 : index
    %c0_167 = arith.constant 0 : index
    %157 = vector.load %arg10[%c1_165, %c0_166, %c0_167] : memref<4x64x16xf32, #tpu.memory_space<vmem>>, vector<1x64x16xf32>
    %158 = vector.shape_cast %157 : vector<1x64x16xf32> to vector<64x16xf32>
    %cst_168 = arith.constant dense<0.000000e+00> : vector<16x16xf32>
    %159 = tpu.matmul %153, %158, %cst_168 {dimension_numbers = #tpu.dot_dimension_numbers<[1], [0], [0], [1], [0, 0, 1, 1], [], []>} : vector<16x64xf32>, vector<64x16xf32>, vector<16x16xf32> -> vector<16x16xf32>
    %c2_169 = arith.constant 2 : index
    %c0_170 = arith.constant 0 : index
    %c0_171 = arith.constant 0 : index
    %160 = vector.load %arg10[%c2_169, %c0_170, %c0_171] : memref<4x64x16xf32, #tpu.memory_space<vmem>>, vector<1x64x16xf32>
    %161 = vector.shape_cast %160 : vector<1x64x16xf32> to vector<64x16xf32>
    %cst_172 = arith.constant dense<0.000000e+00> : vector<16x16xf32>
    %162 = tpu.matmul %153, %161, %cst_172 {dimension_numbers = #tpu.dot_dimension_numbers<[1], [0], [0], [1], [0, 0, 1, 1], [], []>} : vector<16x64xf32>, vector<64x16xf32>, vector<16x16xf32> -> vector<16x16xf32>
    %c3_173 = arith.constant 3 : index
    %c0_174 = arith.constant 0 : index
    %c0_175 = arith.constant 0 : index
    %163 = vector.load %arg10[%c3_173, %c0_174, %c0_175] : memref<4x64x16xf32, #tpu.memory_space<vmem>>, vector<1x64x16xf32>
    %164 = vector.shape_cast %163 : vector<1x64x16xf32> to vector<64x16xf32>
    %cst_176 = arith.constant dense<0.000000e+00> : vector<16x16xf32>
    %165 = tpu.matmul %153, %164, %cst_176 {dimension_numbers = #tpu.dot_dimension_numbers<[1], [0], [0], [1], [0, 0, 1, 1], [], []>} : vector<16x64xf32>, vector<64x16xf32>, vector<16x16xf32> -> vector<16x16xf32>
    %166 = arith.maximumf %156, %159 : vector<16x16xf32>
    %167 = arith.maximumf %162, %165 : vector<16x16xf32>
    %168 = arith.maximumf %166, %167 : vector<16x16xf32>
    %c0_177 = arith.constant 0 : index
    %c0_178 = arith.constant 0 : index
    %c0_179 = arith.constant 0 : index
    %169 = vector.load %arg11[%c0_177, %c0_178, %c0_179] : memref<1x16x16xf32, #tpu.memory_space<vmem>>, vector<1x16x16xf32>
    %170 = vector.shape_cast %169 : vector<1x16x16xf32> to vector<16x16xf32>
    %171 = vector.shape_cast %168 : vector<16x16xf32> to vector<1x16x16xf32>
    tpu.vector_store %arg11[%c0_177, %c0_178, %c0_179], %171 {strides = array<i32>} : memref<1x16x16xf32, #tpu.memory_space<vmem>>, vector<1x16x16xf32>,
    return
  }
  func.func @transform_0(%arg0: i32) -> (i32, i32, i32) {
    %c0_i32 = arith.constant 0 : i32
    %c0_i32_0 = arith.constant 0 : i32
    %c0_i32_1 = arith.constant 0 : i32
    return %arg0, %c0_i32, %c0_i32_0 : i32, i32, i32
  }
  func.func @transform_1(%arg0: i32) -> (i32, i32) {
    %c0_i32 = arith.constant 0 : i32
    %c0_i32_0 = arith.constant 0 : i32
    %c0_i32_1 = arith.constant 0 : i32
    return %c0_i32, %c0_i32_0 : i32, i32
  }
  func.func @transform_2(%arg0: i32) -> (i32, i32, i32) {
    %c0_i32 = arith.constant 0 : i32
    %c0_i32_0 = arith.constant 0 : i32
    %c0_i32_1 = arith.constant 0 : i32
    %c0_i32_2 = arith.constant 0 : i32
    return %c0_i32, %c0_i32_0, %c0_i32_1 : i32, i32, i32
  }
  func.func @transform_3(%arg0: i32) -> (i32, i32) {
    %c0_i32 = arith.constant 0 : i32
    %c0_i32_0 = arith.constant 0 : i32
    %c0_i32_1 = arith.constant 0 : i32
    return %c0_i32, %c0_i32_0 : i32, i32
  }
  func.func @transform_4(%arg0: i32) -> (i32, i32, i32) {
    %c0_i32 = arith.constant 0 : i32
    %c0_i32_0 = arith.constant 0 : i32
    %c0_i32_1 = arith.constant 0 : i32
    %c0_i32_2 = arith.constant 0 : i32
    return %c0_i32, %c0_i32_0, %c0_i32_1 : i32, i32, i32
  }
  func.func @transform_5(%arg0: i32) -> (i32, i32, i32) {
    %c0_i32 = arith.constant 0 : i32
    %c0_i32_0 = arith.constant 0 : i32
    %c0_i32_1 = arith.constant 0 : i32
    %c0_i32_2 = arith.constant 0 : i32
    return %c0_i32, %c0_i32_0, %c0_i32_1 : i32, i32, i32
  }
  func.func @transform_6(%arg0: i32) -> (i32, i32, i32) {
    %c0_i32 = arith.constant 0 : i32
    %c0_i32_0 = arith.constant 0 : i32
    %c0_i32_1 = arith.constant 0 : i32
    %c0_i32_2 = arith.constant 0 : i32
    return %c0_i32, %c0_i32_0, %c0_i32_1 : i32, i32, i32
  }
  func.func @transform_7(%arg0: i32) -> (i32, i32) {
    %c0_i32 = arith.constant 0 : i32
    %c0_i32_0 = arith.constant 0 : i32
    %c0_i32_1 = arith.constant 0 : i32
    return %c0_i32, %c0_i32_0 : i32, i32
  }
  func.func @transform_8(%arg0: i32) -> (i32, i32, i32) {
    %c0_i32 = arith.constant 0 : i32
    %c0_i32_0 = arith.constant 0 : i32
    %c0_i32_1 = arith.constant 0 : i32
    %c0_i32_2 = arith.constant 0 : i32
    return %c0_i32, %c0_i32_0, %c0_i32_1 : i32, i32, i32
  }
  func.func @transform_9(%arg0: i32) -> (i32, i32, i32) {
    %c0_i32 = arith.constant 0 : i32
    %c0_i32_0 = arith.constant 0 : i32
    %c0_i32_1 = arith.constant 0 : i32
    %c0_i32_2 = arith.constant 0 : i32
    return %c0_i32, %c0_i32_0, %c0_i32_1 : i32, i32, i32
  }
  func.func @transform_10(%arg0: i32) -> (i32, i32, i32) {
    %c0_i32 = arith.constant 0 : i32
    %c0_i32_0 = arith.constant 0 : i32
    %c0_i32_1 = arith.constant 0 : i32
    return %arg0, %c0_i32, %c0_i32_0 : i32, i32, i32
  }
}

module attributes {stable_mosaic.version = 11 : i64} {
  func.func @_classifier_kernel(%arg0: memref<2x256xf32, #tpu.memory_space<vmem>>, %arg1: memref<256x32xf32, #tpu.memory_space<vmem>>, %arg2: memref<1x32xf32, #tpu.memory_space<vmem>>, %arg3: memref<32x10xf32, #tpu.memory_space<vmem>>, %arg4: memref<1x10xf32, #tpu.memory_space<vmem>>, %arg5: memref<2x10xf32, #tpu.memory_space<vmem>>) attributes {dimension_semantics = [], scalar_prefetch = 0 : i64, scratch_operands = 0 : i64, tpu.core_type = #tpu.core_type<tc>} {
    %c0 = arith.constant 0 : index
    %c0_0 = arith.constant 0 : index
    %0 = vector.load %arg0[%c0, %c0_0] : memref<2x256xf32, #tpu.memory_space<vmem>>, vector<2x256xf32>
    %c0_1 = arith.constant 0 : index
    %c0_2 = arith.constant 0 : index
    %1 = vector.load %arg1[%c0_1, %c0_2] : memref<256x32xf32, #tpu.memory_space<vmem>>, vector<256x32xf32>
    %cst = arith.constant dense<0.000000e+00> : vector<2x32xf32>
    %2 = tpu.matmul %0, %1, %cst {dimension_numbers = #tpu.dot_dimension_numbers<[1], [0], [0], [1], [0, 0, 1, 1], [], []>} : vector<2x256xf32>, vector<256x32xf32>, vector<2x32xf32> -> vector<2x32xf32>
    %c0_3 = arith.constant 0 : index
    %c0_4 = arith.constant 0 : index
    %3 = vector.load %arg2[%c0_3, %c0_4] : memref<1x32xf32, #tpu.memory_space<vmem>>, vector<1x32xf32>
    %4 = vector.broadcast %3 : vector<1x32xf32> to vector<2x32xf32>
    %5 = arith.addf %2, %4 : vector<2x32xf32>
    %cst_5 = arith.constant 0.000000e+00 : f32
    %6 = vector.broadcast %cst_5 : f32 to vector<2x32xf32>
    %7 = arith.maximumf %5, %6 : vector<2x32xf32>
    %c0_6 = arith.constant 0 : index
    %c0_7 = arith.constant 0 : index
    %8 = vector.load %arg3[%c0_6, %c0_7] : memref<32x10xf32, #tpu.memory_space<vmem>>, vector<32x10xf32>
    %cst_8 = arith.constant dense<0.000000e+00> : vector<2x10xf32>
    %9 = tpu.matmul %7, %8, %cst_8 {dimension_numbers = #tpu.dot_dimension_numbers<[1], [0], [0], [1], [0, 0, 1, 1], [], []>} : vector<2x32xf32>, vector<32x10xf32>, vector<2x10xf32> -> vector<2x10xf32>
    %c0_9 = arith.constant 0 : index
    %c0_10 = arith.constant 0 : index
    %10 = vector.load %arg4[%c0_9, %c0_10] : memref<1x10xf32, #tpu.memory_space<vmem>>, vector<1x10xf32>
    %11 = vector.broadcast %10 : vector<1x10xf32> to vector<2x10xf32>
    %12 = arith.addf %9, %11 : vector<2x10xf32>
    %c0_11 = arith.constant 0 : index
    %c0_12 = arith.constant 0 : index
    %13 = vector.load %arg5[%c0_11, %c0_12] : memref<2x10xf32, #tpu.memory_space<vmem>>, vector<2x10xf32>
    tpu.vector_store %arg5[%c0_11, %c0_12], %12 {strides = array<i32>} : memref<2x10xf32, #tpu.memory_space<vmem>>, vector<2x10xf32>,
    return
  }
}

</mosaic_0001>

<bundles_post_ra>
// kernel: _lambda_.3
= control target key start
LH: loop header
LB: loop body
LE: loop exit
PB: predicated region body
PF: predicated region fallthrough
CT: control target
= control target key end

     0   :  { %10 = vsyncpa [#allocation3], 0  ;;  %s422_s0 = inlined_call_operand.vmem [shape: f32[2,256], index: 0, kind: input, shape index: {}]   ;;  %s423_s1 = inlined_call_operand.vmem [shape: f32[256,32], index: 1, kind: input, shape index: {}]   ;;  %s424_s2 = inlined_call_operand.hbm [shape: f32[1,32], index: 2, kind: input, shape index: {}]   ;;  %s425_s3 = inlined_call_operand.vmem [shape: f32[32,10], index: 3, kind: input, shape index: {}]   ;;  %s426_s4 = inlined_call_operand.hbm [shape: f32[1,10], index: 4, kind: input, shape index: {}]   ;;  %s427_s5 = inlined_call_operand.hbm [shape: f32[2,10], index: 5, kind: output, shape index: {}]  }
   0x1   :  { %11 = vsyncpa [#allocation6], 0 }
   0x2   :  { %12 = vsyncpa [#allocation4], 0  ;;  %s22_s20 = sshll.u32 %s424_s2, 4  ;;  %s269_s21 = smov [#allocation2]   ;;  %s23_s20 = int_to_ptr.hbm [resolvable:$true] %s22_s20 }
   0x3   :  { %s24_s22 = sshll.u32 %s269_s21, 4  ;;  %s35_s25 = sshll.u32 %s426_s4, 4  ;;  %s25_s22 = int_to_ptr.vmem [resolvable:$true] %s24_s22  ;;  %s36_s25 = int_to_ptr.hbm [resolvable:$true] %s35_s25 }
   0x4   :  { %27 = dma.hbm_to_vmem [thread:$0]  %s23_s20, 16, %s25_s22, [#allocation3]  }
   0x5   :  { %s270_s26 = smov [#allocation5]  }
   0x6   :  { %s37_s27 = sshll.u32 %s270_s26, 4  ;;  %s38_s27 = int_to_ptr.vmem [resolvable:$true] %s37_s27 }
   0x7   :  { %40 = dma.hbm_to_vmem [thread:$0]  %s36_s25, 16, %s38_s27, [#allocation6]  }
   0x8   :  { %263 = dma.done.wait [#allocation3], 16  }
   0x9   :  { %264 = vsyncadd [#allocation3], 4294967280 }
   0xa   :  { %265 = dma.done.wait [#allocation6], 16  }
   0xb   :  { %266 = vsyncadd [#allocation6], 4294967280  ;;  %v65_v0 = vld [vmem:[%s423_s1 + $0x78] sm:$0xff]  ;;  %v64_v1 = vld [vmem:[%s423_s1 + $0x70] sm:$0xff]  ;;  %vm141_vm0 = vcmask 261120   ;;  %s271_s18 = smov [#allocation7]  }
   0xc   :  { %v81_v2 = vld [vmem:[%s423_s1 + $0xf8] sm:$0xff]  ;;  %92 = vmatpush.msra.mxu0 %v65_v0  ;;  %v80_v3 = vld [vmem:[%s423_s1 + $0xf0] sm:$0xff]  ;;  %v63_v4 = vld [vmem:[%s423_s1 + $0x68] sm:$0xff]  ;;  %s172_s19 = sshll.u32 %s271_s18, 4  ;;  %s174_s22 = sshll.u32 %s427_s5, 4  ;;  %vm165_vm1 = vcmask 74752   ;;  %s173_s19 = int_to_ptr.vmem [resolvable:$true] %s172_s19  ;;  %s175_s22 = int_to_ptr.hbm [resolvable:$true] %s174_s22 }
   0xd   :  { %112 = vmatpush.msra.mxu1 %v81_v2  ;;  %v79_v5 = vld [vmem:[%s423_s1 + $0xe8] sm:$0xff]  ;;  %v62_v6 = vld [vmem:[%s423_s1 + $0x60] sm:$0xff]  ;;  %v61_v8 = vld [vmem:[%s423_s1 + $0x58] sm:$0xff] }
   0xe   :  { %93 = vmatpush.msra.mxu0 %v64_v1  ;;  %v78_v7 = vld [vmem:[%s423_s1 + $0xe0] sm:$0xff]  ;;  %v77_v9 = vld [vmem:[%s423_s1 + $0xd8] sm:$0xff]  ;;  %v60_v10 = vld [vmem:[%s423_s1 + $0x50] sm:$0xff] }
   0xf   :  { %113 = vmatpush.msra.mxu1 %v80_v3  ;;  %v76_v11 = vld [vmem:[%s423_s1 + $0xd0] sm:$0xff]  ;;  %v59_v12 = vld [vmem:[%s423_s1 + $0x48] sm:$0xff]  ;;  %v49_v14 = vld [vmem:[%s422_s0] sm:$0xf] }
  0x10   :  { %94 = vmatpush.msra.mxu0 %v63_v4  ;;  %v75_v13 = vld [vmem:[%s423_s1 + $0xc8] sm:$0xff]  ;;  %87 = vst [vmem:[#allocation1] ss:$4 sm:$0xff] %v49_v14  ;;  %v58_v15 = vld [vmem:[%s423_s1 + $0x40] sm:$0xff]  ;;  %v57_v17 = vld [vmem:[%s423_s1 + $0x38] sm:$0xff] }
  0x11   :  { %114 = vmatpush.msra.mxu1 %v79_v5  ;;  %v74_v16 = vld [vmem:[%s423_s1 + $0xc0] sm:$0xff]  ;;  %v73_v18 = vld [vmem:[%s423_s1 + $0xb8] sm:$0xff]  ;;  %v56_v19 = vld [vmem:[%s423_s1 + $0x30] sm:$0xff] }
  0x12   :  { %95 = vmatpush.msra.mxu0 %v62_v6  ;;  %v72_v20 = vld [vmem:[%s423_s1 + $0xb0] sm:$0xff]  ;;  %v55_v21 = vld [vmem:[%s423_s1 + $0x28] sm:$0xff]  ;;  %v54_v23 = vld [vmem:[%s423_s1 + $0x20] sm:$0xff] }
  0x13   :  { %115 = vmatpush.msra.mxu1 %v78_v7  ;;  %v71_v22 = vld [vmem:[%s423_s1 + $0xa8] sm:$0xff]  ;;  %v70_v24 = vld [vmem:[%s423_s1 + $0xa0] sm:$0xff]  ;;  %v53_v25 = vld [vmem:[%s423_s1 + $0x18] sm:$0xff] }
  0x14   :  { %96 = vmatpush.msra.mxu0 %v61_v8  ;;  %v69_v26 = vld [vmem:[%s423_s1 + $0x98] sm:$0xff]  ;;  %v52_v27 = vld [vmem:[%s423_s1 + $0x10] sm:$0xff]  ;;  %v51_v29 = vld [vmem:[%s423_s1 + $0x8] sm:$0xff] }
  0x15   :  { %116 = vmatpush.msra.mxu1 %v77_v9  ;;  %v68_v28 = vld [vmem:[%s423_s1 + $0x90] sm:$0xff]  ;;  %v67_v30 = vld [vmem:[%s423_s1 + $0x88] sm:$0xff]  ;;  %v50_v31 = vld [vmem:[%s423_s1] sm:$0xff] }
  0x16   :  { %97 = vmatpush.msra.mxu0 %v60_v10  ;;  %v66_v32 = vld [vmem:[%s423_s1 + $0x80] sm:$0xff]  ;;  %v136_v35 = vld [vmem:[%s425_s3 + $0x18] sm:$0xff]  ;;  %v135_v36 = vld [vmem:[%s425_s3 + $0x10] sm:$0xff] }
  0x17   :  { %117 = vmatpush.msra.mxu1 %v76_v11  ;;  %v88_v33 = vld.sshfl [vmem:[#allocation1] sm:$0xff pattern:$0x73625140]  ;;  %v89_v34 = vld.sshfl [vmem:[#allocation1 + $0x8] sm:$0xff pattern:$0x73625140]  ;;  %157 = vmatpush.msra.mxu2 %v136_v35 }
  0x18   :  { %98 = vmatpush.msra.mxu0 %v59_v12  ;;  %v134_v37 = vld [vmem:[%s425_s3 + $0x8] sm:$0xff]  ;;  %v133_v38 = vld [vmem:[%s425_s3] sm:$0xff] }
  0x19   :  { %118 = vmatpush.msra.mxu1 %v75_v13  ;;  %158 = vmatpush.msra.mxu2 %v135_v36  ;;  %v189_v39 = vld [vmem:[#allocation2] ss:$0 sm:$0xff]  ;;  %v190_v45 = vld [vmem:[#allocation5] ss:$0 sm:$0xff] }
  0x1a   :  { %99 = vmatpush.msra.mxu0 %v58_v15 }
  0x1b   :  { %119 = vmatpush.msra.mxu1 %v74_v16  ;;  %159 = vmatpush.msra.mxu2 %v134_v37 }
  0x1c   :  { %100 = vmatpush.msra.mxu0 %v57_v17 }
  0x1d   :  { %120 = vmatpush.msra.mxu1 %v73_v18  ;;  %160 = vmatpush.msra.mxu2 %v133_v38 }
  0x1e   :  { %101 = vmatpush.msra.mxu0 %v56_v19 }
  0x1f   :  { %121 = vmatpush.msra.mxu1 %v72_v20 }
  0x20   :  { %102 = vmatpush.msra.mxu0 %v55_v21 }
  0x21   :  { %122 = vmatpush.msra.mxu1 %v71_v22 }
  0x22   :  { %103 = vmatpush.msra.mxu0 %v54_v23 }
  0x23   :  { %123 = vmatpush.msra.mxu1 %v70_v24 }
  0x24   :  { %104 = vmatpush.msra.mxu0 %v53_v25 }
  0x25   :  { %124 = vmatpush.msra.mxu1 %v69_v26 }
  0x26   :  { %105 = vmatpush.msra.mxu0 %v52_v27 }
  0x27   :  { %125 = vmatpush.msra.mxu1 %v68_v28 }
  0x28   :  { %106 = vmatpush.msra.mxu0 %v51_v29 }
  0x29   :  { %126 = vmatpush.msra.mxu1 %v67_v30 }
  0x2a   :  { %107 = vmatpush.msra.mxu0 %v50_v31 }
  0x2b   :  { %127 = vmatpush.msra.mxu1 %v66_v32  ;;  %108 = vmatmul.f32.vlgmr.msra.gmra.mxu0 %v88_v33 }
  0x2c   :  { %128 = vmatmul.f32.vlgmr.msra.gmra.mxu1 %v89_v34 }
  0xa8   :  { %v109_v40 = vpop.f32.mrf.mxu0 }
  0xa9   :  { %v129_v41 = vpop.f32.mrf.mxu1  ;;  %v110_v42 = vadd.f32 %v189_v39, %v109_v40 }
  0xab   :  { %v130_v43 = vadd.f32 %v129_v41, %v110_v42 }
  0xad   :  { %v132_v44 = vmax.f32 %v130_v43, 0.0 }
  0xaf   :  { %185 = vmatmul.msk.f32.vlgmr.msra.gmra.mxu2 %vm141_vm0, %v132_v44 }
 0x132   :  { %v162_v46 = vpop.f32.mrf.mxu2 }
 0x133   :  { %v163_v47 = vadd.f32 %v190_v45, %v162_v46 }
 0x135   :  { %166 = vst.msk [vmem:[#allocation7] sm:$0x3] %vm165_vm1, %v163_v47 }
 0x136   :  { %177 = dma.vmem_to_hbm [thread:$0]  %s173_s19, 32, %s175_s22, [#allocation4]  }
 0x137   :  { %267 = dma.done.wait [#allocation4], 32  }
 0x138   :  { %268 = vsyncadd [#allocation4], 4294967264 }
 0x139   :  { %182 = vsyncpa [#allocation3], 1 }
 0x13a   :  { %183 = vsyncpa [#allocation6], 1 }
 0x13b   :  { %184 = vsyncpa [#allocation4], 1 }

// kernel: _lambda_.2
= control target key start
LH: loop header
LB: loop body
LE: loop exit
PB: predicated region body
PF: predicated region fallthrough
CT: control target
= control target key end

     0   :  { %15 = vsyncpa [#allocation3], 0  ;;  %s4271_s0 = inlined_call_operand.vmem [shape: f32[2,3,256], index: 0, kind: input, shape index: {}]   ;;  %s4272_s1 = inlined_call_operand.hbm [shape: f32[3,1], index: 1, kind: input, shape index: {}]   ;;  %s4273_s2 = inlined_call_operand.vmem [shape: f32[9,8,3], index: 2, kind: input, shape index: {}]   ;;  %s4274_s3 = inlined_call_operand.vmem [shape: f32[8,1], index: 3, kind: input, shape index: {}]   ;;  %s4275_s4 = inlined_call_operand.hbm [shape: f32[9,256,256], index: 4, kind: input, shape index: {}]   ;;  %s4276_s5 = inlined_call_operand.hbm [shape: f32[4,256,64], index: 5, kind: input, shape index: {}]   ;;  %s4277_s6 = inlined_call_operand.vmem [shape: f32[9,16,8], index: 6, kind: input, shape index: {}]   ;;  %s4278_s7 = inlined_call_operand.vmem [shape: f32[16,1], index: 7, kind: input, shape index: {}]   ;;  %s4279_s8 = inlined_call_operand.hbm [shape: f32[9,64,64], index: 8, kind: input, shape index: {}]   ;;  %s4280_s9 = inlined_call_operand.hbm [shape: f32[4,64,16], index: 9, kind: input, shape index: {}]   ;;  %s4281_s10 = inlined_call_operand.vmem [shape: f32[2,16,16], index: 10, kind: output, shape index: {}]  }
   0x1   :  { %16 = vsyncpa [#allocation5], 0 }
   0x2   :  { %17 = vsyncpa [#allocation8], 0  ;;  %s3882_s13 = smov 0  }
   0x3 LB: > { %s298_s16 = sshll.u32 %s4275_s4, 4  ;;  %s3891_s17 = sadd.s32 4294967295, %s3814_s13   ;;  %s3814_s13 = sphi %s3882_s13, %s23_s13   ;;  %s299_s16 = int_to_ptr.hbm [resolvable:$true] %s298_s16 }
   0x4   : > { %p3454_p0 = scmp.ge.s32.totalorder %s3814_s13, 1  ;;  %p269_p1 = scmp.lt.s32.totalorder %s3814_s13, 3 }
   0x5   : > { %p3615_p2 = scmp.eq.s32.totalorder %s3891_s17, 0  ;;  %s3816_s19 = smov [#allocation4]  }
   0x6   : > { %p3896_p3 = pnand %p3454_p0, %p269_p1  ;;  %s300_s20 = sshll.u32 %s3816_s19, 4  ;;  %s301_s20 = int_to_ptr.vmem [resolvable:$true] %s300_s20 }
   0x7   : > { %s332_s24 = sshll.u32 %s4279_s8, 4  ;;  %s3817_s25 = smov [#allocation7]   ;;  %s333_s24 = int_to_ptr.hbm [resolvable:$true] %s332_s24 }
   0x8   : > { %p3599_p4 = pneg %p3896_p3  ;;  %s334_s26 = sshll.u32 %s3817_s25, 4  ;;  %s335_s26 = int_to_ptr.vmem [resolvable:$true] %s334_s26 }
   0x9   : > { %s3818_s27 = smov 256   ;;  %s3819_s28 = smov 16  }
   0xa   : > { %p3904_p5 = pnand %p3615_p2, %p3599_p4  ;;  %s281_s11 = sshll.u32 %s4272_s1, 4  ;;  %s282_s11 = int_to_ptr.hbm [resolvable:$true] %s281_s11 }
   0xb   : > { %s3820_s12 = smov 128   ;;  %s3821_s14 = smov 8  }
   0xc   : > { %3605 = dma.hbm_to_vmem [thread:$0]  (!%p3904_p5), %s299_s16, 73728, %s301_s20, [#allocation5], %s3818_s27, %s3818_s27, %s3819_s28  }
   0xd   : > { %3611 = dma.hbm_to_vmem [thread:$0]  (!%p3904_p5), %s333_s24, 9216, %s335_s26, [#allocation8], %s3820_s12, %s3820_s12, %s3821_s14  }
   0xe   : > { %s3822_s15 = smov [#allocation2]   ;;  %s312_s25 = sshll.u32 %s4276_s5, 4  ;;  %s313_s25 = int_to_ptr.hbm [resolvable:$true] %s312_s25 }
   0xf   : > { %s283_s19 = sshll.u32 %s3822_s15, 4  ;;  %s346_s27 = sshll.u32 %s4280_s9, 4  ;;  %s284_s19 = int_to_ptr.vmem [resolvable:$true] %s283_s19  ;;  %s347_s27 = int_to_ptr.hbm [resolvable:$true] %s346_s27 }
  0x10   : > { %3602 = dma.hbm_to_vmem [thread:$0]  (!%p3904_p5), %s282_s11, 64, %s284_s19, [#allocation3]  }
  0x11   : > { %s3823_s28 = smov [#allocation6]   ;;  %s3824_s24 = smov [#allocation9]  }
  0x12   : > { %s314_s29 = sshll.u32 %s3823_s28, 4  ;;  %s348_s26 = sshll.u32 %s3824_s24, 4  ;;  %s315_s29 = int_to_ptr.vmem [resolvable:$true] %s314_s29  ;;  %s349_s26 = int_to_ptr.vmem [resolvable:$true] %s348_s26 }
  0x13   : > { %3608 = dma.hbm_to_vmem [thread:$0]  (!%p3904_p5), %s313_s25, 16384, %s315_s29, [#allocation5], %s3820_s12, %s3820_s12, %s3821_s14  }
  0x14   : > { %3614 = dma.hbm_to_vmem [thread:$0]  (!%p3904_p5), %s347_s27, 4096, %s349_s26, [#allocation8], %s3820_s12, %s3820_s12, %s3821_s14  }
  0x15   : > { %372 = sbr.rel (%p3896_p3) target bundleno = 2139 (0x85b), region = 60 }
  0x1a   : > { %3801 = dma.done.wait (%p3615_p2), [#allocation3], 64  }
  0x1b   : > { %3803 = vsyncadd (%p3615_p2), [#allocation3], 4294967232 }
  0x1c   : > { %3805 = dma.done.wait (%p3615_p2), [#allocation5], 90112  }
  0x1d   : > { %3807 = vsyncadd (%p3615_p2), [#allocation5], 4294877184 }
  0x1e   : > { %3809 = dma.done.wait (%p3615_p2), [#allocation8], 13312  }
  0x1f   : > { %3811 = vsyncadd (%p3615_p2), [#allocation8], 4294953984  ;;  %v3825_v0 = vmov 0   ;;  %v442_v1 = vld [vmem:[#allocation2] sm:$0x7]  ;;  %v2241_v2 = vld [vmem:[%s4274_s3] sm:$0xff] }
  0x20   : > { %3644 = vset.pattern.permute.xlu0 %v3825_v0  ;;  %3645 = vset.pattern.permute.xlu1 %v3825_v0  ;;  %p431_p6 = scmp.lt.s32.totalorder %s3891_s17, 1  ;;  %v3826_v3 = vmov 839922192   ;;  %vm462_vm0 = vcmask 1042432   ;;  %v453_v10 = vld [vmem:[%s4273_s2] sm:$0xff]  ;;  %vm458_vm1 = vcmask 23552  }
  0x21   : > { %445 = vperm.xlu0 %3644, %v442_v1   ;;  %v448_v4 = vunpack.c.l.s4 %v3826_v3  ;;  %v654_v11 = vld [vmem:[#allocation4 + $0x2f0] sm:$0xff]  ;;  %v652_v15 = vld [vmem:[#allocation4 + $0x2e0] sm:$0xff]  ;;  %v655_v20 = vld [vmem:[#allocation4 + $0x2f8] sm:$0xff]  ;;  %vm2547_vm2 = vcmask 64512   ;;  %vm2626_vm3 = vcmask 523264   ;;  %vm3344_vm4 = vcmask 130048  }
  0x22   : > { %s4285_s17 = smov (!%p431_p6, %s3891_s17), 1  ;;  %v686_v12 = vld [vmem:[#allocation4 + $0x3f0] sm:$0xff]  ;;  %v684_v16 = vld [vmem:[#allocation4 + $0x3e0] sm:$0xff]  ;;  %v687_v21 = vld [vmem:[#allocation4 + $0x3f8] sm:$0xff] }
  0x23   : > { %s3577_s30 = sshll.u32 %s4285_s17, 3  ;;  %v449_v5 = vunpack.c.0.s8 %v448_v4  ;;  %v650_v17 = vld [vmem:[#allocation4 + $0x2d0] sm:$0xff]  ;;  %v3475_v19 = vld [vmem:[%s4273_s2 + $0x8] sm:$0xff]  ;;  %v653_v26 = vld [vmem:[#allocation4 + $0x2e8] sm:$0xff]  ;;  %s3578_s25 = sshll.u32 %s4285_s17, 4 }
  0x24   : > { %s435_s14 = scalar_lea.vmem %s4271_s0, %s3577_s30  ;;  %v682_v18 = vld [vmem:[#allocation4 + $0x3d0] sm:$0xff]  ;;  %v648_v24 = vld [vmem:[#allocation4 + $0x2c0] sm:$0xff]  ;;  %v685_v27 = vld [vmem:[#allocation4 + $0x3e8] sm:$0xff]  ;;  %s440_s27 = scalar_lea.vmem %s4281_s10, %s3578_s25 }
  0x25   : > { %v441_v7 = vld [vmem:[%s435_s14] sm:$0x77]  ;;  %v680_v25 = vld [vmem:[#allocation4 + $0x3c0] sm:$0xff]  ;;  %v649_v34 = vld [vmem:[#allocation4 + $0x2c8] sm:$0xff] }
  0x26   : > { %v646_v28 = vld [vmem:[#allocation4 + $0x2b0] sm:$0xff]  ;;  %v651_v30 = vld [vmem:[#allocation4 + $0x2d8] sm:$0xff]  ;;  %v644_v32 = vld [vmem:[#allocation4 + $0x2a0] sm:$0xff] }
  0x27   : > { %v678_v29 = vld [vmem:[#allocation4 + $0x3b0] sm:$0xff]  ;;  %v683_v31 = vld [vmem:[#allocation4 + $0x3d8] sm:$0xff]  ;;  %v676_v33 = vld [vmem:[#allocation4 + $0x3a0] sm:$0xff] }
  0x28   : > { %v681_v35 = vld [vmem:[#allocation4 + $0x3c8] sm:$0xff]  ;;  %v642_v36 = vld [vmem:[#allocation4 + $0x290] sm:$0xff]  ;;  %v647_v38 = vld [vmem:[#allocation4 + $0x2b8] sm:$0xff] }
  0x29   : > { %2244 = vperm.xlu0 %3644, %v2241_v2   ;;  %v674_v37 = vld [vmem:[#allocation4 + $0x390] sm:$0xff]  ;;  %v679_v39 = vld [vmem:[#allocation4 + $0x3b8] sm:$0xff]  ;;  %v640_v40 = vld [vmem:[#allocation4 + $0x280] sm:$0xff] }
  0x2a   : > { %v672_v41 = vld [vmem:[#allocation4 + $0x380] sm:$0xff]  ;;  %v645_v43 = vld [vmem:[#allocation4 + $0x2a8] sm:$0xff]  ;;  %v638_v45 = vld [vmem:[#allocation4 + $0x270] sm:$0xff] }
  0x2b   : > { %v677_v44 = vld [vmem:[#allocation4 + $0x3a8] sm:$0xff]  ;;  %v670_v46 = vld [vmem:[#allocation4 + $0x370] sm:$0xff]  ;;  %v643_v48 = vld [vmem:[#allocation4 + $0x298] sm:$0xff] }
  0x2c   : > { %v675_v49 = vld [vmem:[#allocation4 + $0x398] sm:$0xff]  ;;  %v636_v50 = vld [vmem:[#allocation4 + $0x260] sm:$0xff]  ;;  %v641_v52 = vld [vmem:[#allocation4 + $0x288] sm:$0xff] }
  0x2d   : > { %v668_v51 = vld [vmem:[#allocation4 + $0x360] sm:$0xff]  ;;  %v673_v53 = vld [vmem:[#allocation4 + $0x388] sm:$0xff]  ;;  %v634_v54 = vld [vmem:[#allocation4 + $0x250] sm:$0xff] }
  0x2e   : > { %v666_v55 = vld [vmem:[#allocation4 + $0x350] sm:$0xff]  ;;  %v639_v56 = vld [vmem:[#allocation4 + $0x278] sm:$0xff]  ;;  %v632_v58 = vld [vmem:[#allocation4 + $0x240] sm:$0xff] }
  0x2f   : > { %v671_v57 = vld [vmem:[#allocation4 + $0x378] sm:$0xff]  ;;  %v664_v59 = vld [vmem:[#allocation4 + $0x340] sm:$0xff]  ;;  %v637_v60 = vld [vmem:[#allocation4 + $0x268] sm:$0xff] }
  0x30   : > { %v669_v61 = vld [vmem:[#allocation4 + $0x368] sm:$0xff]  ;;  %v630_v62 = vld [vmem:[#allocation4 + $0x230] sm:$0xff]  ;;  %v635_v1 = vld [vmem:[#allocation4 + $0x258] sm:$0xff] }
  0x31   : > { %v662_v63 = vld [vmem:[#allocation4 + $0x330] sm:$0xff]  ;;  %v667_v2 = vld [vmem:[#allocation4 + $0x358] sm:$0xff]  ;;  %v628_v3 = vld [vmem:[#allocation4 + $0x220] sm:$0xff] }
  0x32   : > { %v660_v4 = vld [vmem:[#allocation4 + $0x320] sm:$0xff] }
  0x93   : > { %v446_v6 = vpop.permute.xlu0 %445 }
  0x94   : > { %v450_v8 = vperm.slane %v446_v6, %v449_v5  ;;  %v633_v6 = vld [vmem:[#allocation4 + $0x248] sm:$0xff] }
  0x96   : > { %v3955_v9 = vsub.f32 %v441_v7, %v450_v8  ;;  %v665_v7 = vld [vmem:[#allocation4 + $0x348] sm:$0xff]  ;;  %v626_v8 = vld [vmem:[#allocation4 + $0x210] sm:$0xff] }
  0x98   : > { %455 = vst [vmem:[#allocation1] ss:$2 sm:$0xff] %v3955_v9 }
  0x9f   : > { %v456_v13 = vld.sshfl [vmem:[#allocation1] sm:$0xff pattern:$0x75316420]  ;;  %v457_v14 = vld.sshfl [vmem:[#allocation1 + $0x8] sm:$0xff pattern:$0x75316420] }
  0xa0   : > { %3471 = vmatpush.msk.msra.mxu0 %vm462_vm0, %v456_v13  ;;  %3473 = vmatpush.msk.msra.mxu1 %vm462_vm0, %v457_v14  ;;  %573 = vst [vmem:[#allocation1] ss:$2 sm:$0xff] %v3955_v9  ;;  %v624_v13 = vld [vmem:[#allocation4 + $0x200] sm:$0xff] }
  0xa1   : > { %3472 = vmatmul.msk.f32.vlgmr.msra.gmra.mxu0 %vm458_vm1, %v453_v10  ;;  %3474 = vmatmul.msk.f32.vlgmr.msra.gmra.mxu1 %vm458_vm1, %v453_v10  ;;  %v658_v10 = vld [vmem:[#allocation4 + $0x310] sm:$0xff]  ;;  %v656_v14 = vld [vmem:[#allocation4 + $0x300] sm:$0xff] }
  0xa2   : > { %688 = vmatpush.msrb.mxu0 %v654_v11  ;;  %708 = vmatpush.msrb.mxu1 %v686_v12  ;;  %v631_v11 = vld [vmem:[#allocation4 + $0x238] sm:$0xff] }
  0xa3   : > { %v663_v12 = vld [vmem:[#allocation4 + $0x338] sm:$0xff] }
  0xa4   : > { %689 = vmatpush.msrb.mxu0 %v652_v15  ;;  %709 = vmatpush.msrb.mxu1 %v684_v16  ;;  %v629_v15 = vld [vmem:[#allocation4 + $0x228] sm:$0xff] }
  0xa5   : > { %v661_v16 = vld [vmem:[#allocation4 + $0x328] sm:$0xff] }
  0xa6   : > { %690 = vmatpush.msrb.mxu0 %v650_v17  ;;  %710 = vmatpush.msrb.mxu1 %v682_v18  ;;  %v537_v17 = vld [vmem:[#allocation4 + $0xf0] sm:$0xff] }
  0xa7   : > { %v574_v22 = vld.sshfl [vmem:[#allocation1] sm:$0xff pattern:$0x75316420]  ;;  %v575_v23 = vld.sshfl [vmem:[#allocation1 + $0x8] sm:$0xff pattern:$0x75316420] }
  0xa8   : > { %3476 = vmatpush.msk.msra.mxu2 %vm462_vm0, %v574_v22  ;;  %3478 = vmatpush.msk.msra.mxu3 %vm462_vm0, %v575_v23  ;;  %850 = vst [vmem:[#allocation1] ss:$2 sm:$0xff] %v3955_v9  ;;  %v569_v18 = vld [vmem:[#allocation4 + $0x1f0] sm:$0xff]  ;;  %v567_v22 = vld [vmem:[#allocation4 + $0x1e0] sm:$0xff] }
  0xa9   : > { %3477 = vmatmul.msk.f32.vlgmr.msra.gmra.mxu2 %vm458_vm1, %v3475_v19  ;;  %3479 = vmatmul.msk.f32.vlgmr.msra.gmra.mxu3 %vm458_vm1, %v3475_v19  ;;  %v627_v19 = vld [vmem:[#allocation4 + $0x218] sm:$0xff] }
  0xaa   : > { %728 = vmatpush.msrb.mxu2 %v655_v20  ;;  %748 = vmatpush.msrb.mxu3 %v687_v21  ;;  %v659_v20 = vld [vmem:[#allocation4 + $0x318] sm:$0xff]  ;;  %v535_v21 = vld [vmem:[#allocation4 + $0xe0] sm:$0xff] }
  0xab   : > { %691 = vmatpush.msrb.mxu0 %v648_v24  ;;  %711 = vmatpush.msrb.mxu1 %v680_v25  ;;  %v625_v24 = vld [vmem:[#allocation4 + $0x208] sm:$0xff] }
  0xac   : > { %729 = vmatpush.msrb.mxu2 %v653_v26  ;;  %749 = vmatpush.msrb.mxu3 %v685_v27  ;;  %v657_v25 = vld [vmem:[#allocation4 + $0x308] sm:$0xff]  ;;  %v538_v27 = vld [vmem:[#allocation4 + $0xf8] sm:$0xff] }
  0xad   : > { %692 = vmatpush.msrb.mxu0 %v646_v28  ;;  %712 = vmatpush.msrb.mxu1 %v678_v29  ;;  %v570_v28 = vld [vmem:[#allocation4 + $0x1f8] sm:$0xff]  ;;  %v533_v29 = vld [vmem:[#allocation4 + $0xd0] sm:$0xff] }
  0xae   : > { %730 = vmatpush.msrb.mxu2 %v651_v30  ;;  %750 = vmatpush.msrb.mxu3 %v683_v31  ;;  %v565_v30 = vld [vmem:[#allocation4 + $0x1d0] sm:$0xff]  ;;  %v536_v31 = vld [vmem:[#allocation4 + $0xe8] sm:$0xff] }
  0xaf   : > { %693 = vmatpush.msrb.mxu0 %v644_v32  ;;  %713 = vmatpush.msrb.mxu1 %v676_v33  ;;  %v3974_v42 = vld.sshfl [vmem:[#allocation1] sm:$0xff pattern:$0x75316420]  ;;  %v3976_v47 = vld.sshfl [vmem:[#allocation1 + $0x8] sm:$0xff pattern:$0x75316420] }
  0xb0   : > { %731 = vmatpush.msrb.mxu2 %v649_v34  ;;  %751 = vmatpush.msrb.mxu3 %v681_v35  ;;  %1049 = vst [vmem:[#allocation1] ss:$2 sm:$0xff] %v3955_v9  ;;  %v568_v32 = vld [vmem:[#allocation4 + $0x1e8] sm:$0xff]  ;;  %v531_v33 = vld [vmem:[#allocation4 + $0xc0] sm:$0xff]  ;;  %v534_v35 = vld [vmem:[#allocation4 + $0xd8] sm:$0xff] }
  0xb1   : > { %694 = vmatpush.msrb.mxu0 %v642_v36  ;;  %714 = vmatpush.msrb.mxu1 %v674_v37  ;;  %v563_v34 = vld [vmem:[#allocation4 + $0x1c0] sm:$0xff]  ;;  %v566_v36 = vld [vmem:[#allocation4 + $0x1d8] sm:$0xff]  ;;  %v532_v37 = vld [vmem:[#allocation4 + $0xc8] sm:$0xff] }
  0xb2   : > { %732 = vmatpush.msrb.mxu2 %v647_v38  ;;  %752 = vmatpush.msrb.mxu3 %v679_v39  ;;  %v529_v38 = vld [vmem:[#allocation4 + $0xb0] sm:$0xff] }
  0xb3   : > { %695 = vmatpush.msrb.mxu0 %v640_v40  ;;  %715 = vmatpush.msrb.mxu1 %v672_v41  ;;  %v561_v39 = vld [vmem:[#allocation4 + $0x1b0] sm:$0xff]  ;;  %v564_v40 = vld [vmem:[#allocation4 + $0x1c8] sm:$0xff]  ;;  %v527_v41 = vld [vmem:[#allocation4 + $0xa0] sm:$0xff] }
  0xb4   : > { %733 = vmatpush.msrb.mxu2 %v645_v43  ;;  %753 = vmatpush.msrb.mxu3 %v677_v44  ;;  %v559_v43 = vld [vmem:[#allocation4 + $0x1a0] sm:$0xff] }
  0xb5   : > { %696 = vmatpush.msrb.mxu0 %v638_v45  ;;  %716 = vmatpush.msrb.mxu1 %v670_v46  ;;  %v530_v46 = vld [vmem:[#allocation4 + $0xb8] sm:$0xff] }
  0xb6   : > { %734 = vmatpush.msrb.mxu2 %v643_v48  ;;  %754 = vmatpush.msrb.mxu3 %v675_v49  ;;  %v562_v48 = vld [vmem:[#allocation4 + $0x1b8] sm:$0xff]  ;;  %v525_v49 = vld [vmem:[#allocation4 + $0x90] sm:$0xff] }
  0xb7   : > { %697 = vmatpush.msrb.mxu0 %v636_v50  ;;  %717 = vmatpush.msrb.mxu1 %v668_v51  ;;  %v3979_v0 = vld.sshfl [vmem:[#allocation1] sm:$0xff pattern:$0x75316420]  ;;  %v3981_v5 = vld.sshfl [vmem:[#allocation1 + $0x8] sm:$0xff pattern:$0x75316420] }
  0xb8   : > { %735 = vmatpush.msrb.mxu2 %v641_v52  ;;  %755 = vmatpush.msrb.mxu3 %v673_v53  ;;  %1248 = vst [vmem:[#allocation1] ss:$2 sm:$0xff] %v3955_v9  ;;  %v557_v50 = vld [vmem:[#allocation4 + $0x190] sm:$0xff]  ;;  %v528_v51 = vld [vmem:[#allocation4 + $0xa8] sm:$0xff]  ;;  %v523_v53 = vld [vmem:[#allocation4 + $0x80] sm:$0xff] }
  0xb9   : > { %698 = vmatpush.msrb.mxu0 %v634_v54  ;;  %718 = vmatpush.msrb.mxu1 %v666_v55  ;;  %v560_v52 = vld [vmem:[#allocation4 + $0x1a8] sm:$0xff]  ;;  %v555_v54 = vld [vmem:[#allocation4 + $0x180] sm:$0xff]  ;;  %v526_v55 = vld [vmem:[#allocation4 + $0x98] sm:$0xff] }
  0xba   : > { %736 = vmatpush.msrb.mxu2 %v639_v56  ;;  %756 = vmatpush.msrb.mxu3 %v671_v57  ;;  %v558_v56 = vld [vmem:[#allocation4 + $0x198] sm:$0xff]  ;;  %v524_v57 = vld [vmem:[#allocation4 + $0x88] sm:$0xff] }
  0xbb   : > { %699 = vmatpush.msrb.mxu0 %v632_v58  ;;  %719 = vmatpush.msrb.mxu1 %v664_v59  ;;  %v521_v58 = vld [vmem:[#allocation4 + $0x70] sm:$0xff] }
  0xbc   : > { %737 = vmatpush.msrb.mxu2 %v637_v60  ;;  %757 = vmatpush.msrb.mxu3 %v669_v61  ;;  %v553_v59 = vld [vmem:[#allocation4 + $0x170] sm:$0xff]  ;;  %v556_v60 = vld [vmem:[#allocation4 + $0x188] sm:$0xff]  ;;  %v519_v61 = vld [vmem:[#allocation4 + $0x60] sm:$0xff] }
  0xbd   : > { %700 = vmatpush.msrb.mxu0 %v630_v62  ;;  %720 = vmatpush.msrb.mxu1 %v662_v63  ;;  %v551_v62 = vld [vmem:[#allocation4 + $0x160] sm:$0xff] }
  0xbe   : > { %738 = vmatpush.msrb.mxu2 %v635_v1  ;;  %758 = vmatpush.msrb.mxu3 %v667_v2  ;;  %v522_v2 = vld [vmem:[#allocation4 + $0x78] sm:$0xff] }
  0xbf   : > { %701 = vmatpush.msrb.mxu0 %v628_v3  ;;  %721 = vmatpush.msrb.mxu1 %v660_v4  ;;  %v3984_v23 = vld.sshfl [vmem:[#allocation1] sm:$0xff pattern:$0x75316420]  ;;  %v3986_v26 = vld.sshfl [vmem:[#allocation1 + $0x8] sm:$0xff pattern:$0x75316420] }
  0xc0   : > { %739 = vmatpush.msrb.mxu2 %v633_v6  ;;  %759 = vmatpush.msrb.mxu3 %v665_v7  ;;  %1447 = vst [vmem:[#allocation1] ss:$2 sm:$0xff] %v3955_v9  ;;  %v554_v3 = vld [vmem:[#allocation4 + $0x178] sm:$0xff]  ;;  %v517_v4 = vld [vmem:[#allocation4 + $0x50] sm:$0xff]  ;;  %v520_v7 = vld [vmem:[#allocation4 + $0x68] sm:$0xff] }
  0xc1   : > { %702 = vmatpush.msrb.mxu0 %v626_v8  ;;  %722 = vmatpush.msrb.mxu1 %v658_v10  ;;  %v549_v6 = vld [vmem:[#allocation4 + $0x150] sm:$0xff]  ;;  %v552_v8 = vld [vmem:[#allocation4 + $0x168] sm:$0xff]  ;;  %v515_v10 = vld [vmem:[#allocation4 + $0x40] sm:$0xff] }
  0xc2   : > { %740 = vmatpush.msrb.mxu2 %v631_v11  ;;  %760 = vmatpush.msrb.mxu3 %v663_v12  ;;  %v547_v11 = vld [vmem:[#allocation4 + $0x140] sm:$0xff]  ;;  %v518_v12 = vld [vmem:[#allocation4 + $0x58] sm:$0xff] }
  0xc3   : > { %703 = vmatpush.msrb.mxu0 %v624_v13  ;;  %723 = vmatpush.msrb.mxu1 %v656_v14  ;;  %v550_v13 = vld [vmem:[#allocation4 + $0x158] sm:$0xff]  ;;  %v516_v14 = vld [vmem:[#allocation4 + $0x48] sm:$0xff] }
  0xc4   : > { %741 = vmatpush.msrb.mxu2 %v629_v15  ;;  %761 = vmatpush.msrb.mxu3 %v661_v16  ;;  %v513_v15 = vld [vmem:[#allocation4 + $0x30] sm:$0xff] }
  0xc5   : > { %768 = vmatpush.msra.mxu0 %v537_v17  ;;  %788 = vmatpush.msra.mxu1 %v569_v18  ;;  %v545_v16 = vld [vmem:[#allocation4 + $0x130] sm:$0xff]  ;;  %v548_v17 = vld [vmem:[#allocation4 + $0x148] sm:$0xff]  ;;  %v511_v18 = vld [vmem:[#allocation4 + $0x20] sm:$0xff] }
  0xc6   : > { %742 = vmatpush.msrb.mxu2 %v627_v19  ;;  %762 = vmatpush.msrb.mxu3 %v659_v20  ;;  %v543_v19 = vld [vmem:[#allocation4 + $0x120] sm:$0xff] }
  0xc7   : > { %769 = vmatpush.msra.mxu0 %v535_v21  ;;  %789 = vmatpush.msra.mxu1 %v567_v22  ;;  %v3989_v44 = vld.sshfl [vmem:[#allocation1] sm:$0xff pattern:$0x75316420]  ;;  %v3991_v45 = vld.sshfl [vmem:[#allocation1 + $0x8] sm:$0xff pattern:$0x75316420] }
  0xc8   : > { %743 = vmatpush.msrb.mxu2 %v625_v24  ;;  %763 = vmatpush.msrb.mxu3 %v657_v25  ;;  %1646 = vst [vmem:[#allocation1] ss:$2 sm:$0xff] %v3955_v9  ;;  %v514_v22 = vld [vmem:[#allocation4 + $0x38] sm:$0xff]  ;;  %v509_v25 = vld [vmem:[#allocation4 + $0x10] sm:$0xff] }
  0xc9   : > { %770 = vmatpush.msra.mxu0 %v533_v29  ;;  %790 = vmatpush.msra.mxu1 %v565_v30  ;;  %v546_v24 = vld [vmem:[#allocation4 + $0x138] sm:$0xff]  ;;  %v544_v29 = vld [vmem:[#allocation4 + $0x128] sm:$0xff] }
  0xca   : > { %808 = vmatpush.msra.mxu2 %v538_v27  ;;  %828 = vmatpush.msra.mxu3 %v570_v28  ;;  %v541_v27 = vld [vmem:[#allocation4 + $0x110] sm:$0xff]  ;;  %v512_v28 = vld [vmem:[#allocation4 + $0x28] sm:$0xff]  ;;  %v510_v30 = vld [vmem:[#allocation4 + $0x18] sm:$0xff] }
  0xcb   : > { %771 = vmatpush.msra.mxu0 %v531_v33  ;;  %791 = vmatpush.msra.mxu1 %v563_v34  ;;  %v508_v33 = vld [vmem:[#allocation4 + $0x8] sm:$0xff] }
  0xcc   : > { %809 = vmatpush.msra.mxu2 %v536_v31  ;;  %829 = vmatpush.msra.mxu3 %v568_v32  ;;  %v542_v31 = vld [vmem:[#allocation4 + $0x118] sm:$0xff]  ;;  %v507_v32 = vld [vmem:[#allocation4] sm:$0xff]  ;;  %v540_v34 = vld [vmem:[#allocation4 + $0x108] sm:$0xff] }
  0xcd   : > { %772 = vmatpush.msra.mxu0 %v529_v38  ;;  %792 = vmatpush.msra.mxu1 %v561_v39  ;;  %v963_v38 = vld [vmem:[#allocation4 + $0x5f0] sm:$0xff]  ;;  %v929_v39 = vld [vmem:[#allocation4 + $0x4e0] sm:$0xff] }
  0xce   : > { %810 = vmatpush.msra.mxu2 %v534_v35  ;;  %830 = vmatpush.msra.mxu3 %v566_v36 }
  0xcf   : > { %773 = vmatpush.msra.mxu0 %v527_v41  ;;  %793 = vmatpush.msra.mxu1 %v559_v43  ;;  %v3994_v63 = vld.sshfl [vmem:[#allocation1] sm:$0xff pattern:$0x75316420]  ;;  %v3996_v1 = vld.sshfl [vmem:[#allocation1 + $0x8] sm:$0xff pattern:$0x75316420] }
  0xd0   : > { %811 = vmatpush.msra.mxu2 %v532_v37  ;;  %831 = vmatpush.msra.mxu3 %v564_v40  ;;  %1845 = vst [vmem:[#allocation1] ss:$2 sm:$0xff] %v3955_v9  ;;  %v931_v37 = vld [vmem:[#allocation4 + $0x4f0] sm:$0xff]  ;;  %v961_v40 = vld [vmem:[#allocation4 + $0x5e0] sm:$0xff] }
  0xd1   : > { %774 = vmatpush.msra.mxu0 %v525_v49  ;;  %794 = vmatpush.msra.mxu1 %v557_v50  ;;  %v927_v41 = vld [vmem:[#allocation4 + $0x4d0] sm:$0xff]  ;;  %v925_v49 = vld [vmem:[#allocation4 + $0x4c0] sm:$0xff] }
  0xd2   : > { %812 = vmatpush.msra.mxu2 %v530_v46  ;;  %832 = vmatpush.msra.mxu3 %v562_v48  ;;  %v959_v43 = vld [vmem:[#allocation4 + $0x5d0] sm:$0xff]  ;;  %v957_v50 = vld [vmem:[#allocation4 + $0x5c0] sm:$0xff] }
  0xd3   : > { %775 = vmatpush.msra.mxu0 %v523_v53  ;;  %795 = vmatpush.msra.mxu1 %v555_v54  ;;  %v921_v53 = vld [vmem:[#allocation4 + $0x4a0] sm:$0xff] }
  0xd4   : > { %813 = vmatpush.msra.mxu2 %v528_v51  ;;  %833 = vmatpush.msra.mxu3 %v560_v52  ;;  %v955_v51 = vld [vmem:[#allocation4 + $0x5b0] sm:$0xff]  ;;  %v964_v52 = vld [vmem:[#allocation4 + $0x5f8] sm:$0xff]  ;;  %v953_v54 = vld [vmem:[#allocation4 + $0x5a0] sm:$0xff] }
  0xd5   : > { %776 = vmatpush.msra.mxu0 %v521_v58  ;;  %796 = vmatpush.msra.mxu1 %v553_v59  ;;  %v951_v58 = vld [vmem:[#allocation4 + $0x590] sm:$0xff]  ;;  %v3480_v59 = vld [vmem:[%s4273_s2 + $0x10] sm:$0xff] }
  0xd6   : > { %814 = vmatpush.msra.mxu2 %v526_v55  ;;  %834 = vmatpush.msra.mxu3 %v558_v56  ;;  %v930_v55 = vld [vmem:[#allocation4 + $0x4e8] sm:$0xff] }
  0xd7   : > { %777 = vmatpush.msra.mxu0 %v519_v61  ;;  %797 = vmatpush.msra.mxu1 %v551_v62  ;;  %v3999_v20 = vld.sshfl [vmem:[#allocation1] sm:$0xff pattern:$0x75316420]  ;;  %v4001_v21 = vld.sshfl [vmem:[#allocation1 + $0x8] sm:$0xff pattern:$0x75316420] }
  0xd8   : > { %815 = vmatpush.msra.mxu2 %v524_v57  ;;  %835 = vmatpush.msra.mxu3 %v556_v60  ;;  %2044 = vst [vmem:[#allocation1] ss:$2 sm:$0xff] %v3955_v9  ;;  %v539_v9 = vld [vmem:[#allocation4 + $0x100] sm:$0xff]  ;;  %v962_v56 = vld [vmem:[#allocation4 + $0x5e8] sm:$0xff]  ;;  %v919_v57 = vld [vmem:[#allocation4 + $0x490] sm:$0xff] }
  0xd9   : > { %778 = vmatpush.msra.mxu0 %v517_v4  ;;  %798 = vmatpush.msra.mxu1 %v549_v6  ;;  %v917_v60 = vld [vmem:[#allocation4 + $0x480] sm:$0xff]  ;;  %v928_v62 = vld [vmem:[#allocation4 + $0x4d8] sm:$0xff]  ;;  %v947_v4 = vld [vmem:[#allocation4 + $0x570] sm:$0xff] }
  0xda   : > { %816 = vmatpush.msra.mxu2 %v522_v2  ;;  %836 = vmatpush.msra.mxu3 %v554_v3  ;;  %v949_v61 = vld [vmem:[#allocation4 + $0x580] sm:$0xff]  ;;  %v960_v2 = vld [vmem:[#allocation4 + $0x5d8] sm:$0xff]  ;;  %v915_v3 = vld [vmem:[#allocation4 + $0x470] sm:$0xff] }
  0xdb   : > { %779 = vmatpush.msra.mxu0 %v515_v10  ;;  %799 = vmatpush.msra.mxu1 %v547_v11  ;;  %v926_v6 = vld [vmem:[#allocation4 + $0x4c8] sm:$0xff]  ;;  %v945_v10 = vld [vmem:[#allocation4 + $0x560] sm:$0xff]  ;;  %v924_v11 = vld [vmem:[#allocation4 + $0x4b8] sm:$0xff] }
  0xdc   : > { %817 = vmatpush.msra.mxu2 %v520_v7  ;;  %837 = vmatpush.msra.mxu3 %v552_v8  ;;  %v958_v7 = vld [vmem:[#allocation4 + $0x5c8] sm:$0xff]  ;;  %v913_v8 = vld [vmem:[#allocation4 + $0x460] sm:$0xff] }
  0xdd   : > { %780 = vmatpush.msra.mxu0 %v513_v15  ;;  %800 = vmatpush.msra.mxu1 %v545_v16  ;;  %v922_v15 = vld [vmem:[#allocation4 + $0x4a8] sm:$0xff] }
  0xde   : > { %818 = vmatpush.msra.mxu2 %v518_v12  ;;  %838 = vmatpush.msra.mxu3 %v550_v13  ;;  %v956_v12 = vld [vmem:[#allocation4 + $0x5b8] sm:$0xff]  ;;  %v911_v13 = vld [vmem:[#allocation4 + $0x450] sm:$0xff]  ;;  %v954_v16 = vld [vmem:[#allocation4 + $0x5a8] sm:$0xff] }
  0xdf   : > { %781 = vmatpush.msra.mxu0 %v511_v18  ;;  %801 = vmatpush.msra.mxu1 %v543_v19  ;;  %v941_v18 = vld [vmem:[#allocation4 + $0x540] sm:$0xff]  ;;  %v920_v19 = vld [vmem:[#allocation4 + $0x498] sm:$0xff] }
  0xe0   : > { %819 = vmatpush.msra.mxu2 %v516_v14  ;;  %839 = vmatpush.msra.mxu3 %v548_v17  ;;  %v943_v14 = vld [vmem:[#allocation4 + $0x550] sm:$0xff]  ;;  %v909_v17 = vld [vmem:[#allocation4 + $0x440] sm:$0xff] }
  0xe1   : > { %782 = vmatpush.msra.mxu0 %v509_v25  ;;  %802 = vmatpush.msra.mxu1 %v541_v27  ;;  %v939_v25 = vld [vmem:[#allocation4 + $0x530] sm:$0xff]  ;;  %v918_v27 = vld [vmem:[#allocation4 + $0x488] sm:$0xff] }
  0xe2   : > { %820 = vmatpush.msra.mxu2 %v514_v22  ;;  %840 = vmatpush.msra.mxu3 %v546_v24  ;;  %v952_v22 = vld [vmem:[#allocation4 + $0x598] sm:$0xff]  ;;  %v907_v24 = vld [vmem:[#allocation4 + $0x430] sm:$0xff] }
  0xe3   : > { %783 = vmatpush.msra.mxu0 %v507_v32  ;;  %803 = vmatpush.msra.mxu1 %v539_v9  ;;  %v948_v32 = vld [vmem:[#allocation4 + $0x578] sm:$0xff]  ;;  %v903_v9 = vld [vmem:[#allocation4 + $0x410] sm:$0xff] }
  0xe4   : > { %821 = vmatpush.msra.mxu2 %v512_v28  ;;  %841 = vmatpush.msra.mxu3 %v544_v29  ;;  %v950_v28 = vld [vmem:[#allocation4 + $0x588] sm:$0xff]  ;;  %v905_v29 = vld [vmem:[#allocation4 + $0x420] sm:$0xff] }
  0xe6   : > { %822 = vmatpush.msra.mxu2 %v510_v30  ;;  %842 = vmatpush.msra.mxu3 %v542_v31  ;;  %v937_v30 = vld [vmem:[#allocation4 + $0x520] sm:$0xff]  ;;  %v916_v31 = vld [vmem:[#allocation4 + $0x478] sm:$0xff] }
  0xe8   : > { %823 = vmatpush.msra.mxu2 %v508_v33  ;;  %843 = vmatpush.msra.mxu3 %v540_v34  ;;  %v935_v33 = vld [vmem:[#allocation4 + $0x510] sm:$0xff]  ;;  %v914_v34 = vld [vmem:[#allocation4 + $0x468] sm:$0xff] }
 0x11e   : > { %v484_v46 = vpop.f32.mrf.mxu0  ;;  %v504_v48 = vpop.f32.mrf.mxu1 }
 0x12c   : > { %v600_v35 = vpop.f32.mrf.mxu2  ;;  %v620_v36 = vpop.f32.mrf.mxu3 }
 0x12d   : > { %704 = vmatmul.f32.vlgmr.msrb.gmra.mxu0 %v600_v35  ;;  %724 = vmatmul.f32.vlgmr.msrb.gmra.mxu1 %v620_v36 }
 0x12e   : > { %744 = vmatmul.f32.vlgmr.msrb.gmra.mxu2 %v600_v35  ;;  %764 = vmatmul.f32.vlgmr.msrb.gmra.mxu3 %v620_v36  ;;  %v946_v35 = vld [vmem:[#allocation4 + $0x568] sm:$0xff]  ;;  %v901_v36 = vld [vmem:[#allocation4 + $0x400] sm:$0xff] }
 0x12f   : > { %3481 = vmatpush.msk.msrb.mxu0 %vm462_vm0, %v3974_v42  ;;  %3483 = vmatpush.msk.msrb.mxu1 %vm462_vm0, %v3976_v47  ;;  %v923_v42 = vld [vmem:[#allocation4 + $0x4b0] sm:$0xff]  ;;  %v932_v47 = vld [vmem:[#allocation4 + $0x4f8] sm:$0xff] }
 0x130   : > { %965 = vmatpush.msrb.mxu2 %v931_v37  ;;  %985 = vmatpush.msrb.mxu3 %v963_v38  ;;  %v933_v37 = vld [vmem:[#allocation4 + $0x500] sm:$0xff]  ;;  %v912_v38 = vld [vmem:[#allocation4 + $0x458] sm:$0xff] }
 0x132   : > { %966 = vmatpush.msrb.mxu2 %v929_v39  ;;  %986 = vmatpush.msrb.mxu3 %v961_v40  ;;  %v944_v39 = vld [vmem:[#allocation4 + $0x558] sm:$0xff]  ;;  %v910_v40 = vld [vmem:[#allocation4 + $0x448] sm:$0xff] }
 0x134   : > { %967 = vmatpush.msrb.mxu2 %v927_v41  ;;  %987 = vmatpush.msrb.mxu3 %v959_v43  ;;  %v942_v41 = vld [vmem:[#allocation4 + $0x548] sm:$0xff]  ;;  %v908_v43 = vld [vmem:[#allocation4 + $0x438] sm:$0xff] }
 0x135   : > { %784 = vmatmul.f32.vlgmr.msra.gmra.mxu0 %v484_v46  ;;  %804 = vmatmul.f32.vlgmr.msra.gmra.mxu1 %v504_v48 }
 0x136   : > { %968 = vmatpush.msrb.mxu2 %v925_v49  ;;  %988 = vmatpush.msrb.mxu3 %v957_v50  ;;  %v938_v49 = vld [vmem:[#allocation4 + $0x528] sm:$0xff]  ;;  %v904_v50 = vld [vmem:[#allocation4 + $0x418] sm:$0xff] }
 0x137   : > { %824 = vmatmul.f32.vlgmr.msra.gmra.mxu2 %v484_v46  ;;  %844 = vmatmul.f32.vlgmr.msra.gmra.mxu3 %v504_v48  ;;  %v940_v46 = vld [vmem:[#allocation4 + $0x538] sm:$0xff]  ;;  %v906_v48 = vld [vmem:[#allocation4 + $0x428] sm:$0xff] }
 0x138   : > { %969 = vmatpush.msrb.mxu2 %v923_v42  ;;  %989 = vmatpush.msrb.mxu3 %v955_v51  ;;  %v936_v42 = vld [vmem:[#allocation4 + $0x518] sm:$0xff]  ;;  %v934_v51 = vld [vmem:[#allocation4 + $0x508] sm:$0xff] }
 0x139   : > { %1005 = vmatpush.msra.mxu0 %v932_v47  ;;  %1025 = vmatpush.msra.mxu1 %v964_v52  ;;  %v1162_v47 = vld [vmem:[#allocation4 + $0x7f0] sm:$0xff]  ;;  %v1128_v52 = vld [vmem:[#allocation4 + $0x6e0] sm:$0xff] }
 0x13a   : > { %970 = vmatpush.msrb.mxu2 %v921_v53  ;;  %990 = vmatpush.msrb.mxu3 %v953_v54  ;;  %v1160_v53 = vld [vmem:[#allocation4 + $0x7e0] sm:$0xff]  ;;  %v1126_v54 = vld [vmem:[#allocation4 + $0x6d0] sm:$0xff] }
 0x13b   : > { %1006 = vmatpush.msra.mxu0 %v930_v55  ;;  %1026 = vmatpush.msra.mxu1 %v962_v56  ;;  %v1158_v55 = vld [vmem:[#allocation4 + $0x7d0] sm:$0xff]  ;;  %v1124_v56 = vld [vmem:[#allocation4 + $0x6c0] sm:$0xff] }
 0x13c   : > { %971 = vmatpush.msrb.mxu2 %v919_v57  ;;  %991 = vmatpush.msrb.mxu3 %v951_v58  ;;  %v1156_v57 = vld [vmem:[#allocation4 + $0x7c0] sm:$0xff]  ;;  %v1122_v58 = vld [vmem:[#allocation4 + $0x6b0] sm:$0xff] }
 0x13d   : > { %3482 = vmatmul.msk.f32.vlgmr.msrb.gmra.mxu0 %vm458_vm1, %v3480_v59  ;;  %3484 = vmatmul.msk.f32.vlgmr.msrb.gmra.mxu1 %vm458_vm1, %v3480_v59  ;;  %v1154_v59 = vld [vmem:[#allocation4 + $0x7b0] sm:$0xff] }
 0x13e   : > { %972 = vmatpush.msrb.mxu2 %v917_v60  ;;  %992 = vmatpush.msrb.mxu3 %v949_v61  ;;  %v1120_v60 = vld [vmem:[#allocation4 + $0x6a0] sm:$0xff] }
 0x13f   : > { %1007 = vmatpush.msra.mxu0 %v928_v62  ;;  %1027 = vmatpush.msra.mxu1 %v960_v2  ;;  %v1152_v61 = vld [vmem:[#allocation4 + $0x7a0] sm:$0xff]  ;;  %v1118_v62 = vld [vmem:[#allocation4 + $0x690] sm:$0xff] }
 0x140   : > { %973 = vmatpush.msrb.mxu2 %v915_v3  ;;  %993 = vmatpush.msrb.mxu3 %v947_v4  ;;  %v1150_v2 = vld [vmem:[#allocation4 + $0x790] sm:$0xff]  ;;  %v1116_v3 = vld [vmem:[#allocation4 + $0x680] sm:$0xff] }
 0x141   : > { %1008 = vmatpush.msra.mxu0 %v926_v6  ;;  %1028 = vmatpush.msra.mxu1 %v958_v7  ;;  %v1148_v4 = vld [vmem:[#allocation4 + $0x780] sm:$0xff]  ;;  %v1114_v6 = vld [vmem:[#allocation4 + $0x670] sm:$0xff] }
 0x142   : > { %974 = vmatpush.msrb.mxu2 %v913_v8  ;;  %994 = vmatpush.msrb.mxu3 %v945_v10  ;;  %v1146_v7 = vld [vmem:[#allocation4 + $0x770] sm:$0xff]  ;;  %v1112_v8 = vld [vmem:[#allocation4 + $0x660] sm:$0xff] }
 0x143   : > { %1009 = vmatpush.msra.mxu0 %v924_v11  ;;  %1029 = vmatpush.msra.mxu1 %v956_v12  ;;  %v1144_v10 = vld [vmem:[#allocation4 + $0x760] sm:$0xff]  ;;  %v1110_v11 = vld [vmem:[#allocation4 + $0x650] sm:$0xff] }
 0x144   : > { %975 = vmatpush.msrb.mxu2 %v911_v13  ;;  %995 = vmatpush.msrb.mxu3 %v943_v14  ;;  %v1142_v12 = vld [vmem:[#allocation4 + $0x750] sm:$0xff]  ;;  %v1108_v13 = vld [vmem:[#allocation4 + $0x640] sm:$0xff] }
 0x145   : > { %1010 = vmatpush.msra.mxu0 %v922_v15  ;;  %1030 = vmatpush.msra.mxu1 %v954_v16  ;;  %v1140_v14 = vld [vmem:[#allocation4 + $0x740] sm:$0xff]  ;;  %v1106_v15 = vld [vmem:[#allocation4 + $0x630] sm:$0xff] }
 0x146   : > { %976 = vmatpush.msrb.mxu2 %v909_v17  ;;  %996 = vmatpush.msrb.mxu3 %v941_v18  ;;  %v1138_v16 = vld [vmem:[#allocation4 + $0x730] sm:$0xff]  ;;  %v1104_v17 = vld [vmem:[#allocation4 + $0x620] sm:$0xff] }
 0x147   : > { %1011 = vmatpush.msra.mxu0 %v920_v19  ;;  %1031 = vmatpush.msra.mxu1 %v952_v22  ;;  %v1136_v18 = vld [vmem:[#allocation4 + $0x720] sm:$0xff]  ;;  %v1102_v19 = vld [vmem:[#allocation4 + $0x610] sm:$0xff] }
 0x148   : > { %977 = vmatpush.msrb.mxu2 %v907_v24  ;;  %997 = vmatpush.msrb.mxu3 %v939_v25  ;;  %v1134_v22 = vld [vmem:[#allocation4 + $0x710] sm:$0xff]  ;;  %v1100_v24 = vld [vmem:[#allocation4 + $0x600] sm:$0xff] }
 0x149   : > { %1012 = vmatpush.msra.mxu0 %v918_v27  ;;  %1032 = vmatpush.msra.mxu1 %v950_v28  ;;  %v1132_v25 = vld [vmem:[#allocation4 + $0x700] sm:$0xff] }
 0x14a   : > { %978 = vmatpush.msrb.mxu2 %v905_v29  ;;  %998 = vmatpush.msrb.mxu3 %v937_v30 }
 0x14b   : > { %1013 = vmatpush.msra.mxu0 %v916_v31  ;;  %1033 = vmatpush.msra.mxu1 %v948_v32 }
 0x14c   : > { %979 = vmatpush.msrb.mxu2 %v903_v9  ;;  %999 = vmatpush.msrb.mxu3 %v935_v33 }
 0x14d   : > { %1014 = vmatpush.msra.mxu0 %v914_v34  ;;  %1034 = vmatpush.msra.mxu1 %v946_v35  ;;  %v1131_v35 = vld [vmem:[#allocation4 + $0x6f8] sm:$0xff] }
 0x14e   : > { %980 = vmatpush.msrb.mxu2 %v901_v36  ;;  %1000 = vmatpush.msrb.mxu3 %v933_v37  ;;  %v1163_v36 = vld [vmem:[#allocation4 + $0x7f8] sm:$0xff]  ;;  %v1129_v37 = vld [vmem:[#allocation4 + $0x6e8] sm:$0xff] }
 0x14f   : > { %1015 = vmatpush.msra.mxu0 %v912_v38  ;;  %1035 = vmatpush.msra.mxu1 %v944_v39  ;;  %v1161_v38 = vld [vmem:[#allocation4 + $0x7e8] sm:$0xff]  ;;  %v1127_v39 = vld [vmem:[#allocation4 + $0x6d8] sm:$0xff] }
 0x150   : > { %3486 = vmatpush.msk.msra.mxu2 %vm462_vm0, %v3979_v0  ;;  %3488 = vmatpush.msk.msra.mxu3 %vm462_vm0, %v3981_v5  ;;  %v902_v0 = vld [vmem:[#allocation4 + $0x408] sm:$0xff]  ;;  %v1130_v5 = vld [vmem:[#allocation4 + $0x6f0] sm:$0xff] }
 0x151   : > { %1016 = vmatpush.msra.mxu0 %v910_v40  ;;  %1036 = vmatpush.msra.mxu1 %v942_v41  ;;  %v1159_v40 = vld [vmem:[#allocation4 + $0x7d8] sm:$0xff]  ;;  %v3485_v41 = vld [vmem:[%s4273_s2 + $0x18] sm:$0xff] }
 0x153   : > { %1017 = vmatpush.msra.mxu0 %v908_v43  ;;  %1037 = vmatpush.msra.mxu1 %v940_v46  ;;  %v1125_v43 = vld [vmem:[#allocation4 + $0x6c8] sm:$0xff] }
 0x154   : > { %v1157_v46 = vld [vmem:[#allocation4 + $0x7c8] sm:$0xff] }
 0x155   : > { %1018 = vmatpush.msra.mxu0 %v906_v48  ;;  %1038 = vmatpush.msra.mxu1 %v938_v49  ;;  %v1121_v48 = vld [vmem:[#allocation4 + $0x6a8] sm:$0xff] }
 0x156   : > { %v1153_v49 = vld [vmem:[#allocation4 + $0x7a8] sm:$0xff] }
 0x157   : > { %1019 = vmatpush.msra.mxu0 %v904_v50  ;;  %1039 = vmatpush.msra.mxu1 %v936_v42  ;;  %v1119_v50 = vld [vmem:[#allocation4 + $0x698] sm:$0xff] }
 0x158   : > { %v1151_v42 = vld [vmem:[#allocation4 + $0x798] sm:$0xff] }
 0x159   : > { %1020 = vmatpush.msra.mxu0 %v902_v0  ;;  %1040 = vmatpush.msra.mxu1 %v934_v51  ;;  %v1117_v0 = vld [vmem:[#allocation4 + $0x688] sm:$0xff] }
 0x15a   : > { %v1149_v51 = vld [vmem:[#allocation4 + $0x788] sm:$0xff] }
 0x15b   : > { %1164 = vmatpush.msrb.mxu0 %v1130_v5  ;;  %1184 = vmatpush.msrb.mxu1 %v1162_v47  ;;  %v1115_v5 = vld [vmem:[#allocation4 + $0x678] sm:$0xff] }
 0x15c   : > { %v1147_v47 = vld [vmem:[#allocation4 + $0x778] sm:$0xff] }
 0x15d   : > { %1165 = vmatpush.msrb.mxu0 %v1128_v52  ;;  %1185 = vmatpush.msrb.mxu1 %v1160_v53  ;;  %v1113_v52 = vld [vmem:[#allocation4 + $0x668] sm:$0xff] }
 0x15e   : > { %v1145_v53 = vld [vmem:[#allocation4 + $0x768] sm:$0xff] }
 0x15f   : > { %1166 = vmatpush.msrb.mxu0 %v1126_v54  ;;  %1186 = vmatpush.msrb.mxu1 %v1158_v55  ;;  %v1111_v54 = vld [vmem:[#allocation4 + $0x658] sm:$0xff] }
 0x160   : > { %v1143_v55 = vld [vmem:[#allocation4 + $0x758] sm:$0xff] }
 0x161   : > { %1167 = vmatpush.msrb.mxu0 %v1124_v56  ;;  %1187 = vmatpush.msrb.mxu1 %v1156_v57  ;;  %v1109_v56 = vld [vmem:[#allocation4 + $0x648] sm:$0xff] }
 0x162   : > { %v1141_v57 = vld [vmem:[#allocation4 + $0x748] sm:$0xff] }
 0x163   : > { %1168 = vmatpush.msrb.mxu0 %v1122_v58  ;;  %1188 = vmatpush.msrb.mxu1 %v1154_v59  ;;  %v1107_v58 = vld [vmem:[#allocation4 + $0x638] sm:$0xff] }
 0x164   : > { %v1139_v59 = vld [vmem:[#allocation4 + $0x738] sm:$0xff] }
 0x165   : > { %1169 = vmatpush.msrb.mxu0 %v1120_v60  ;;  %1189 = vmatpush.msrb.mxu1 %v1152_v61  ;;  %v1105_v60 = vld [vmem:[#allocation4 + $0x628] sm:$0xff] }
 0x166   : > { %v1137_v61 = vld [vmem:[#allocation4 + $0x728] sm:$0xff] }
 0x167   : > { %1170 = vmatpush.msrb.mxu0 %v1118_v62  ;;  %1190 = vmatpush.msrb.mxu1 %v1150_v2  ;;  %v1103_v62 = vld [vmem:[#allocation4 + $0x618] sm:$0xff] }
 0x168   : > { %v1135_v2 = vld [vmem:[#allocation4 + $0x718] sm:$0xff] }
 0x169   : > { %1171 = vmatpush.msrb.mxu0 %v1116_v3  ;;  %1191 = vmatpush.msrb.mxu1 %v1148_v4  ;;  %v1101_v3 = vld [vmem:[#allocation4 + $0x608] sm:$0xff] }
 0x16a   : > { %v1133_v4 = vld [vmem:[#allocation4 + $0x708] sm:$0xff] }
 0x16b   : > { %1172 = vmatpush.msrb.mxu0 %v1114_v6  ;;  %1192 = vmatpush.msrb.mxu1 %v1146_v7  ;;  %v1329_v6 = vld [vmem:[#allocation4 + $0x8f0] sm:$0xff] }
 0x16c   : > { %v1361_v7 = vld [vmem:[#allocation4 + $0x9f0] sm:$0xff] }
 0x16d   : > { %1173 = vmatpush.msrb.mxu0 %v1112_v8  ;;  %1193 = vmatpush.msrb.mxu1 %v1144_v10  ;;  %v1327_v8 = vld [vmem:[#allocation4 + $0x8e0] sm:$0xff] }
 0x16e   : > { %v1359_v10 = vld [vmem:[#allocation4 + $0x9e0] sm:$0xff] }
 0x16f   : > { %1174 = vmatpush.msrb.mxu0 %v1110_v11  ;;  %1194 = vmatpush.msrb.mxu1 %v1142_v12  ;;  %v1325_v11 = vld [vmem:[#allocation4 + $0x8d0] sm:$0xff] }
 0x170   : > { %v1357_v12 = vld [vmem:[#allocation4 + $0x9d0] sm:$0xff] }
 0x171   : > { %1175 = vmatpush.msrb.mxu0 %v1108_v13  ;;  %1195 = vmatpush.msrb.mxu1 %v1140_v14  ;;  %v1323_v13 = vld [vmem:[#allocation4 + $0x8c0] sm:$0xff] }
 0x172   : > { %v1355_v14 = vld [vmem:[#allocation4 + $0x9c0] sm:$0xff] }
 0x173   : > { %1176 = vmatpush.msrb.mxu0 %v1106_v15  ;;  %1196 = vmatpush.msrb.mxu1 %v1138_v16  ;;  %v1321_v15 = vld [vmem:[#allocation4 + $0x8b0] sm:$0xff] }
 0x174   : > { %v1353_v16 = vld [vmem:[#allocation4 + $0x9b0] sm:$0xff] }
 0x175   : > { %1177 = vmatpush.msrb.mxu0 %v1104_v17  ;;  %1197 = vmatpush.msrb.mxu1 %v1136_v18  ;;  %v1319_v17 = vld [vmem:[#allocation4 + $0x8a0] sm:$0xff] }
 0x176   : > { %v1351_v18 = vld [vmem:[#allocation4 + $0x9a0] sm:$0xff] }
 0x177   : > { %1178 = vmatpush.msrb.mxu0 %v1102_v19  ;;  %1198 = vmatpush.msrb.mxu1 %v1134_v22  ;;  %v1317_v19 = vld [vmem:[#allocation4 + $0x890] sm:$0xff] }
 0x178   : > { %v1349_v22 = vld [vmem:[#allocation4 + $0x990] sm:$0xff] }
 0x179   : > { %1179 = vmatpush.msrb.mxu0 %v1100_v24  ;;  %1199 = vmatpush.msrb.mxu1 %v1132_v25  ;;  %v1315_v24 = vld [vmem:[#allocation4 + $0x880] sm:$0xff] }
 0x17a   : > { %v1347_v25 = vld [vmem:[#allocation4 + $0x980] sm:$0xff] }
 0x1aa   : > { %v705_v27 = vpop.f32.mrf.mxu0  ;;  %v725_v28 = vpop.f32.mrf.mxu1 }
 0x1ab   : > { %v726_v29 = vadd.f32 %v725_v28, %v705_v27  ;;  %v1313_v27 = vld [vmem:[#allocation4 + $0x870] sm:$0xff] }
 0x1ac   : > { %v1345_v28 = vld [vmem:[#allocation4 + $0x970] sm:$0xff] }
 0x1b2   : > { %v785_v30 = vpop.f32.mrf.mxu0  ;;  %v805_v31 = vpop.f32.mrf.mxu1 }
 0x1b3   : > { %v786_v32 = vadd.f32 %v785_v30, %v726_v29  ;;  %v1311_v29 = vld [vmem:[#allocation4 + $0x860] sm:$0xff] }
 0x1b4   : > { %v1343_v30 = vld [vmem:[#allocation4 + $0x960] sm:$0xff] }
 0x1b5   : > { %v4017_v9 = vadd.f32 %v805_v31, %v786_v32  ;;  %v1309_v31 = vld [vmem:[#allocation4 + $0x850] sm:$0xff] }
 0x1b6   : > { %v1341_v32 = vld [vmem:[#allocation4 + $0x950] sm:$0xff] }
 0x1ba   : > { %v877_v33 = vpop.f32.mrf.mxu0  ;;  %v897_v34 = vpop.f32.mrf.mxu1 }
 0x1bb   : > { %981 = vmatmul.f32.vlgmr.msrb.gmra.mxu2 %v877_v33  ;;  %1001 = vmatmul.f32.vlgmr.msrb.gmra.mxu3 %v897_v34 }
 0x1bc   : > { %1021 = vmatmul.f32.vlgmr.msra.gmra.mxu0 %v877_v33  ;;  %1041 = vmatmul.f32.vlgmr.msra.gmra.mxu1 %v897_v34  ;;  %v1307_v33 = vld [vmem:[#allocation4 + $0x840] sm:$0xff] }
 0x1bd   : > { %3491 = vmatpush.msk.msra.mxu0 %vm462_vm0, %v3984_v23  ;;  %3493 = vmatpush.msk.msra.mxu1 %vm462_vm0, %v3986_v26  ;;  %v1123_v23 = vld [vmem:[#allocation4 + $0x6b8] sm:$0xff]  ;;  %v1339_v34 = vld [vmem:[#allocation4 + $0x940] sm:$0xff] }
 0x1be   : > { %1204 = vmatpush.msrb.mxu2 %v1131_v35  ;;  %1224 = vmatpush.msrb.mxu3 %v1163_v36  ;;  %v1155_v26 = vld [vmem:[#allocation4 + $0x7b8] sm:$0xff]  ;;  %v1305_v35 = vld [vmem:[#allocation4 + $0x830] sm:$0xff] }
 0x1bf   : > { %v1337_v36 = vld [vmem:[#allocation4 + $0x930] sm:$0xff] }
 0x1c0   : > { %1205 = vmatpush.msrb.mxu2 %v1129_v37  ;;  %1225 = vmatpush.msrb.mxu3 %v1161_v38  ;;  %v1303_v37 = vld [vmem:[#allocation4 + $0x820] sm:$0xff] }
 0x1c1   : > { %v1335_v38 = vld [vmem:[#allocation4 + $0x920] sm:$0xff] }
 0x1c2   : > { %1206 = vmatpush.msrb.mxu2 %v1127_v39  ;;  %1226 = vmatpush.msrb.mxu3 %v1159_v40  ;;  %v1301_v39 = vld [vmem:[#allocation4 + $0x810] sm:$0xff] }
 0x1c3   : > { %3487 = vmatmul.msk.f32.vlgmr.msra.gmra.mxu2 %vm458_vm1, %v3485_v41  ;;  %3489 = vmatmul.msk.f32.vlgmr.msra.gmra.mxu3 %vm458_vm1, %v3485_v41  ;;  %v1333_v40 = vld [vmem:[#allocation4 + $0x910] sm:$0xff]  ;;  %v1299_v41 = vld [vmem:[#allocation4 + $0x800] sm:$0xff] }
 0x1c4   : > { %1207 = vmatpush.msrb.mxu2 %v1125_v43  ;;  %1227 = vmatpush.msrb.mxu3 %v1157_v46  ;;  %v1331_v43 = vld [vmem:[#allocation4 + $0x900] sm:$0xff]  ;;  %v4028_v46 = vpop.f32.mrf.mxu2 }
 0x1c6   : > { %1208 = vmatpush.msrb.mxu2 %v1123_v23  ;;  %1228 = vmatpush.msrb.mxu3 %v1155_v26  ;;  %v4030_v23 = vpop.f32.mrf.mxu3 }
 0x1c8   : > { %1209 = vmatpush.msrb.mxu2 %v1121_v48  ;;  %1229 = vmatpush.msrb.mxu3 %v1153_v49 }
 0x1ca   : > { %1210 = vmatpush.msrb.mxu2 %v1119_v50  ;;  %1230 = vmatpush.msrb.mxu3 %v1151_v42 }
 0x1cc   : > { %1211 = vmatpush.msrb.mxu2 %v1117_v0  ;;  %1231 = vmatpush.msrb.mxu3 %v1149_v51  ;;  %v4032_v26 = vpop.f32.mrf.mxu2 }
 0x1ce   : > { %1212 = vmatpush.msrb.mxu2 %v1115_v5  ;;  %1232 = vmatpush.msrb.mxu3 %v1147_v47  ;;  %v4034_v48 = vpop.f32.mrf.mxu3  ;;  %v1330_v47 = vld [vmem:[#allocation4 + $0x8f8] sm:$0xff] }
 0x1d0   : > { %1213 = vmatpush.msrb.mxu2 %v1113_v52  ;;  %1233 = vmatpush.msrb.mxu3 %v1145_v53  ;;  %v1362_v52 = vld [vmem:[#allocation4 + $0x9f8] sm:$0xff]  ;;  %v1328_v53 = vld [vmem:[#allocation4 + $0x8e8] sm:$0xff] }
 0x1d2   : > { %1214 = vmatpush.msrb.mxu2 %v1111_v54  ;;  %1234 = vmatpush.msrb.mxu3 %v1143_v55  ;;  %v1360_v54 = vld [vmem:[#allocation4 + $0x9e8] sm:$0xff]  ;;  %v1358_v55 = vld [vmem:[#allocation4 + $0x9d8] sm:$0xff] }
 0x1d4   : > { %1215 = vmatpush.msrb.mxu2 %v1109_v56  ;;  %1235 = vmatpush.msrb.mxu3 %v1141_v57  ;;  %v3490_v56 = vld [vmem:[%s4273_s2 + $0x20] sm:$0xff]  ;;  %v1324_v57 = vld [vmem:[#allocation4 + $0x8c8] sm:$0xff] }
 0x1d6   : > { %1216 = vmatpush.msrb.mxu2 %v1107_v58  ;;  %1236 = vmatpush.msrb.mxu3 %v1139_v59  ;;  %v1356_v58 = vld [vmem:[#allocation4 + $0x9c8] sm:$0xff] }
 0x1d7   : > { %v1320_v59 = vld [vmem:[#allocation4 + $0x8a8] sm:$0xff] }
 0x1d8   : > { %1217 = vmatpush.msrb.mxu2 %v1105_v60  ;;  %1237 = vmatpush.msrb.mxu3 %v1137_v61  ;;  %v1352_v60 = vld [vmem:[#allocation4 + $0x9a8] sm:$0xff]  ;;  %v1318_v61 = vld [vmem:[#allocation4 + $0x898] sm:$0xff] }
 0x1da   : > { %1218 = vmatpush.msrb.mxu2 %v1103_v62  ;;  %1238 = vmatpush.msrb.mxu3 %v1135_v2  ;;  %v1350_v62 = vld [vmem:[#allocation4 + $0x998] sm:$0xff]  ;;  %v1316_v2 = vld [vmem:[#allocation4 + $0x888] sm:$0xff] }
 0x1dc   : > { %1219 = vmatpush.msrb.mxu2 %v1101_v3  ;;  %1239 = vmatpush.msrb.mxu3 %v1133_v4  ;;  %v1348_v3 = vld [vmem:[#allocation4 + $0x988] sm:$0xff]  ;;  %v1314_v4 = vld [vmem:[#allocation4 + $0x878] sm:$0xff] }
 0x1de   : > { %1363 = vmatpush.msra.mxu2 %v1329_v6  ;;  %1383 = vmatpush.msra.mxu3 %v1361_v7  ;;  %v1346_v6 = vld [vmem:[#allocation4 + $0x978] sm:$0xff]  ;;  %v1312_v7 = vld [vmem:[#allocation4 + $0x868] sm:$0xff] }
 0x1e0   : > { %1364 = vmatpush.msra.mxu2 %v1327_v8  ;;  %1384 = vmatpush.msra.mxu3 %v1359_v10  ;;  %v1344_v8 = vld [vmem:[#allocation4 + $0x968] sm:$0xff]  ;;  %v1310_v10 = vld [vmem:[#allocation4 + $0x858] sm:$0xff] }
 0x1e2   : > { %1365 = vmatpush.msra.mxu2 %v1325_v11  ;;  %1385 = vmatpush.msra.mxu3 %v1357_v12  ;;  %v1342_v11 = vld [vmem:[#allocation4 + $0x958] sm:$0xff]  ;;  %v1308_v12 = vld [vmem:[#allocation4 + $0x848] sm:$0xff] }
 0x1e4   : > { %1366 = vmatpush.msra.mxu2 %v1323_v13  ;;  %1386 = vmatpush.msra.mxu3 %v1355_v14  ;;  %v1340_v13 = vld [vmem:[#allocation4 + $0x948] sm:$0xff]  ;;  %v1306_v14 = vld [vmem:[#allocation4 + $0x838] sm:$0xff] }
 0x1e6   : > { %1367 = vmatpush.msra.mxu2 %v1321_v15  ;;  %1387 = vmatpush.msra.mxu3 %v1353_v16  ;;  %v1338_v15 = vld [vmem:[#allocation4 + $0x938] sm:$0xff]  ;;  %v1304_v16 = vld [vmem:[#allocation4 + $0x828] sm:$0xff] }
 0x1e8   : > { %1368 = vmatpush.msra.mxu2 %v1319_v17  ;;  %1388 = vmatpush.msra.mxu3 %v1351_v18  ;;  %v1336_v17 = vld [vmem:[#allocation4 + $0x928] sm:$0xff]  ;;  %v1302_v18 = vld [vmem:[#allocation4 + $0x818] sm:$0xff] }
 0x1ea   : > { %1369 = vmatpush.msra.mxu2 %v1317_v19  ;;  %1389 = vmatpush.msra.mxu3 %v1349_v22  ;;  %v1334_v19 = vld [vmem:[#allocation4 + $0x918] sm:$0xff]  ;;  %v1300_v22 = vld [vmem:[#allocation4 + $0x808] sm:$0xff] }
 0x1ec   : > { %1370 = vmatpush.msra.mxu2 %v1315_v24  ;;  %1390 = vmatpush.msra.mxu3 %v1347_v25  ;;  %v1332_v24 = vld [vmem:[#allocation4 + $0x908] sm:$0xff]  ;;  %v1528_v25 = vld [vmem:[#allocation4 + $0xaf0] sm:$0xff] }
 0x1ee   : > { %1371 = vmatpush.msra.mxu2 %v1313_v27  ;;  %1391 = vmatpush.msra.mxu3 %v1345_v28  ;;  %v1560_v27 = vld [vmem:[#allocation4 + $0xbf0] sm:$0xff]  ;;  %v1526_v28 = vld [vmem:[#allocation4 + $0xae0] sm:$0xff] }
 0x1f0   : > { %1372 = vmatpush.msra.mxu2 %v1311_v29  ;;  %1392 = vmatpush.msra.mxu3 %v1343_v30  ;;  %v1558_v29 = vld [vmem:[#allocation4 + $0xbe0] sm:$0xff]  ;;  %v1524_v30 = vld [vmem:[#allocation4 + $0xad0] sm:$0xff] }
 0x1f2   : > { %1373 = vmatpush.msra.mxu2 %v1309_v31  ;;  %1393 = vmatpush.msra.mxu3 %v1341_v32  ;;  %v1556_v31 = vld [vmem:[#allocation4 + $0xbd0] sm:$0xff]  ;;  %v1522_v32 = vld [vmem:[#allocation4 + $0xac0] sm:$0xff] }
 0x1f4   : > { %1374 = vmatpush.msra.mxu2 %v1307_v33  ;;  %1394 = vmatpush.msra.mxu3 %v1339_v34  ;;  %v1554_v33 = vld [vmem:[#allocation4 + $0xbc0] sm:$0xff]  ;;  %v1520_v34 = vld [vmem:[#allocation4 + $0xab0] sm:$0xff] }
 0x1f6   : > { %1375 = vmatpush.msra.mxu2 %v1305_v35  ;;  %1395 = vmatpush.msra.mxu3 %v1337_v36  ;;  %v1552_v35 = vld [vmem:[#allocation4 + $0xbb0] sm:$0xff]  ;;  %v1518_v36 = vld [vmem:[#allocation4 + $0xaa0] sm:$0xff] }
 0x1f8   : > { %1376 = vmatpush.msra.mxu2 %v1303_v37  ;;  %1396 = vmatpush.msra.mxu3 %v1335_v38  ;;  %v1550_v37 = vld [vmem:[#allocation4 + $0xba0] sm:$0xff]  ;;  %v1516_v38 = vld [vmem:[#allocation4 + $0xa90] sm:$0xff] }
 0x1fa   : > { %1377 = vmatpush.msra.mxu2 %v1301_v39  ;;  %1397 = vmatpush.msra.mxu3 %v1333_v40  ;;  %v1548_v39 = vld [vmem:[#allocation4 + $0xb90] sm:$0xff]  ;;  %v1514_v40 = vld [vmem:[#allocation4 + $0xa80] sm:$0xff] }
 0x1fc   : > { %1378 = vmatpush.msra.mxu2 %v1299_v41  ;;  %1398 = vmatpush.msra.mxu3 %v1331_v43  ;;  %v1546_v41 = vld [vmem:[#allocation4 + $0xb80] sm:$0xff]  ;;  %v1512_v43 = vld [vmem:[#allocation4 + $0xa70] sm:$0xff] }
 0x23e   : > { %v982_v49 = vpop.f32.mrf.mxu2  ;;  %v1002_v50 = vpop.f32.mrf.mxu3 }
 0x23f   : > { %v1003_v42 = vadd.f32 %v1002_v50, %v982_v49  ;;  %v1544_v49 = vld [vmem:[#allocation4 + $0xb70] sm:$0xff]  ;;  %v1510_v50 = vld [vmem:[#allocation4 + $0xa60] sm:$0xff] }
 0x241   : > { %v4037_v0 = vadd.f32 %v1003_v42, %v4017_v9  ;;  %v1326_v9 = vld [vmem:[#allocation4 + $0x8d8] sm:$0xff]  ;;  %v1542_v42 = vld [vmem:[#allocation4 + $0xb60] sm:$0xff] }
 0x246   : > { %v1076_v51 = vpop.f32.mrf.mxu2  ;;  %v1096_v5 = vpop.f32.mrf.mxu3 }
 0x247   : > { %1180 = vmatmul.f32.vlgmr.msrb.gmra.mxu0 %v1076_v51  ;;  %1200 = vmatmul.f32.vlgmr.msrb.gmra.mxu1 %v1096_v5 }
 0x248   : > { %1220 = vmatmul.f32.vlgmr.msrb.gmra.mxu2 %v1076_v51  ;;  %1240 = vmatmul.f32.vlgmr.msrb.gmra.mxu3 %v1096_v5  ;;  %v1508_v51 = vld [vmem:[#allocation4 + $0xa50] sm:$0xff] }
 0x249   : > { %3496 = vmatpush.msk.msrb.mxu2 %vm462_vm0, %v3989_v44  ;;  %3498 = vmatpush.msk.msrb.mxu3 %vm462_vm0, %v3991_v45  ;;  %v1322_v44 = vld [vmem:[#allocation4 + $0x8b8] sm:$0xff]  ;;  %v1540_v5 = vld [vmem:[#allocation4 + $0xb50] sm:$0xff] }
 0x24a   : > { %1403 = vmatpush.msrb.mxu0 %v1330_v47  ;;  %1423 = vmatpush.msrb.mxu1 %v1362_v52  ;;  %v1354_v45 = vld [vmem:[#allocation4 + $0x9b8] sm:$0xff]  ;;  %v1506_v47 = vld [vmem:[#allocation4 + $0xa40] sm:$0xff] }
 0x24b   : > { %v1538_v52 = vld [vmem:[#allocation4 + $0xb40] sm:$0xff] }
 0x24c   : > { %1404 = vmatpush.msrb.mxu0 %v1328_v53  ;;  %1424 = vmatpush.msrb.mxu1 %v1360_v54  ;;  %v1504_v53 = vld [vmem:[#allocation4 + $0xa30] sm:$0xff] }
 0x24d   : > { %v1536_v54 = vld [vmem:[#allocation4 + $0xb30] sm:$0xff] }
 0x24e   : > { %1405 = vmatpush.msrb.mxu0 %v1326_v9  ;;  %1425 = vmatpush.msrb.mxu1 %v1358_v55  ;;  %v1502_v9 = vld [vmem:[#allocation4 + $0xa20] sm:$0xff] }
 0x24f   : > { %3492 = vmatmul.msk.f32.vlgmr.msra.gmra.mxu0 %vm458_vm1, %v3490_v56  ;;  %3494 = vmatmul.msk.f32.vlgmr.msra.gmra.mxu1 %vm458_vm1, %v3490_v56  ;;  %v1534_v55 = vld [vmem:[#allocation4 + $0xb20] sm:$0xff]  ;;  %v1500_v56 = vld [vmem:[#allocation4 + $0xa10] sm:$0xff] }
 0x250   : > { %1406 = vmatpush.msrb.mxu0 %v1324_v57  ;;  %1426 = vmatpush.msrb.mxu1 %v1356_v58  ;;  %v1532_v57 = vld [vmem:[#allocation4 + $0xb10] sm:$0xff]  ;;  %v1498_v58 = vld [vmem:[#allocation4 + $0xa00] sm:$0xff] }
 0x252   : > { %1407 = vmatpush.msrb.mxu0 %v1322_v44  ;;  %1427 = vmatpush.msrb.mxu1 %v1354_v45  ;;  %v1530_v44 = vld [vmem:[#allocation4 + $0xb00] sm:$0xff]  ;;  %v4048_v45 = vpop.f32.mrf.mxu0 }
 0x254   : > { %1408 = vmatpush.msrb.mxu0 %v1320_v59  ;;  %1428 = vmatpush.msrb.mxu1 %v1352_v60  ;;  %v4050_v59 = vpop.f32.mrf.mxu1 }
 0x256   : > { %1409 = vmatpush.msrb.mxu0 %v1318_v61  ;;  %1429 = vmatpush.msrb.mxu1 %v1350_v62 }
 0x258   : > { %1410 = vmatpush.msrb.mxu0 %v1316_v2  ;;  %1430 = vmatpush.msrb.mxu1 %v1348_v3 }
 0x25a   : > { %1411 = vmatpush.msrb.mxu0 %v1314_v4  ;;  %1431 = vmatpush.msrb.mxu1 %v1346_v6  ;;  %v1529_v6 = vld [vmem:[#allocation4 + $0xaf8] sm:$0xff] }
 0x25c   : > { %1412 = vmatpush.msrb.mxu0 %v1312_v7  ;;  %1432 = vmatpush.msrb.mxu1 %v1344_v8  ;;  %v1561_v7 = vld [vmem:[#allocation4 + $0xbf8] sm:$0xff]  ;;  %v1527_v8 = vld [vmem:[#allocation4 + $0xae8] sm:$0xff] }
 0x25e   : > { %1413 = vmatpush.msrb.mxu0 %v1310_v10  ;;  %1433 = vmatpush.msrb.mxu1 %v1342_v11  ;;  %v1559_v10 = vld [vmem:[#allocation4 + $0xbe8] sm:$0xff]  ;;  %v1557_v11 = vld [vmem:[#allocation4 + $0xbd8] sm:$0xff] }
 0x260   : > { %1414 = vmatpush.msrb.mxu0 %v1308_v12  ;;  %1434 = vmatpush.msrb.mxu1 %v1340_v13  ;;  %v3495_v12 = vld [vmem:[%s4273_s2 + $0x28] sm:$0xff]  ;;  %v1523_v13 = vld [vmem:[#allocation4 + $0xac8] sm:$0xff] }
 0x262   : > { %1415 = vmatpush.msrb.mxu0 %v1306_v14  ;;  %1435 = vmatpush.msrb.mxu1 %v1338_v15  ;;  %v1555_v14 = vld [vmem:[#allocation4 + $0xbc8] sm:$0xff] }
 0x263   : > { %v1519_v15 = vld [vmem:[#allocation4 + $0xaa8] sm:$0xff] }
 0x264   : > { %1416 = vmatpush.msrb.mxu0 %v1304_v16  ;;  %1436 = vmatpush.msrb.mxu1 %v1336_v17  ;;  %v1551_v16 = vld [vmem:[#allocation4 + $0xba8] sm:$0xff]  ;;  %v1517_v17 = vld [vmem:[#allocation4 + $0xa98] sm:$0xff] }
 0x266   : > { %1417 = vmatpush.msrb.mxu0 %v1302_v18  ;;  %1437 = vmatpush.msrb.mxu1 %v1334_v19  ;;  %v1549_v18 = vld [vmem:[#allocation4 + $0xb98] sm:$0xff]  ;;  %v1515_v19 = vld [vmem:[#allocation4 + $0xa88] sm:$0xff] }
 0x268   : > { %1418 = vmatpush.msrb.mxu0 %v1300_v22  ;;  %1438 = vmatpush.msrb.mxu1 %v1332_v24  ;;  %v1547_v22 = vld [vmem:[#allocation4 + $0xb88] sm:$0xff]  ;;  %v1513_v24 = vld [vmem:[#allocation4 + $0xa78] sm:$0xff] }
 0x26a   : > { %1562 = vmatpush.msra.mxu0 %v1528_v25  ;;  %1582 = vmatpush.msra.mxu1 %v1560_v27  ;;  %v1545_v25 = vld [vmem:[#allocation4 + $0xb78] sm:$0xff]  ;;  %v1511_v27 = vld [vmem:[#allocation4 + $0xa68] sm:$0xff] }
 0x26c   : > { %1563 = vmatpush.msra.mxu0 %v1526_v28  ;;  %1583 = vmatpush.msra.mxu1 %v1558_v29  ;;  %v1543_v28 = vld [vmem:[#allocation4 + $0xb68] sm:$0xff]  ;;  %v1509_v29 = vld [vmem:[#allocation4 + $0xa58] sm:$0xff] }
 0x26e   : > { %1564 = vmatpush.msra.mxu0 %v1524_v30  ;;  %1584 = vmatpush.msra.mxu1 %v1556_v31  ;;  %v1541_v30 = vld [vmem:[#allocation4 + $0xb58] sm:$0xff]  ;;  %v1507_v31 = vld [vmem:[#allocation4 + $0xa48] sm:$0xff] }
 0x270   : > { %1565 = vmatpush.msra.mxu0 %v1522_v32  ;;  %1585 = vmatpush.msra.mxu1 %v1554_v33  ;;  %v1539_v32 = vld [vmem:[#allocation4 + $0xb48] sm:$0xff]  ;;  %v1505_v33 = vld [vmem:[#allocation4 + $0xa38] sm:$0xff] }
 0x272   : > { %1566 = vmatpush.msra.mxu0 %v1520_v34  ;;  %1586 = vmatpush.msra.mxu1 %v1552_v35  ;;  %v1537_v34 = vld [vmem:[#allocation4 + $0xb38] sm:$0xff]  ;;  %v1503_v35 = vld [vmem:[#allocation4 + $0xa28] sm:$0xff] }
 0x274   : > { %1567 = vmatpush.msra.mxu0 %v1518_v36  ;;  %1587 = vmatpush.msra.mxu1 %v1550_v37  ;;  %v1535_v36 = vld [vmem:[#allocation4 + $0xb28] sm:$0xff]  ;;  %v1501_v37 = vld [vmem:[#allocation4 + $0xa18] sm:$0xff] }
 0x276   : > { %1568 = vmatpush.msra.mxu0 %v1516_v38  ;;  %1588 = vmatpush.msra.mxu1 %v1548_v39  ;;  %v1533_v38 = vld [vmem:[#allocation4 + $0xb18] sm:$0xff]  ;;  %v1499_v39 = vld [vmem:[#allocation4 + $0xa08] sm:$0xff] }
 0x278   : > { %1569 = vmatpush.msra.mxu0 %v1514_v40  ;;  %1589 = vmatpush.msra.mxu1 %v1546_v41  ;;  %v1531_v40 = vld [vmem:[#allocation4 + $0xb08] sm:$0xff]  ;;  %v1727_v41 = vld [vmem:[#allocation4 + $0xcf0] sm:$0xff] }
 0x27a   : > { %1570 = vmatpush.msra.mxu0 %v1512_v43  ;;  %1590 = vmatpush.msra.mxu1 %v1544_v49  ;;  %v1759_v43 = vld [vmem:[#allocation4 + $0xdf0] sm:$0xff]  ;;  %v1725_v49 = vld [vmem:[#allocation4 + $0xce0] sm:$0xff] }
 0x27c   : > { %1571 = vmatpush.msra.mxu0 %v1510_v50  ;;  %1591 = vmatpush.msra.mxu1 %v1542_v42  ;;  %v1757_v50 = vld [vmem:[#allocation4 + $0xde0] sm:$0xff]  ;;  %v1723_v42 = vld [vmem:[#allocation4 + $0xcd0] sm:$0xff] }
 0x27e   : > { %1572 = vmatpush.msra.mxu0 %v1508_v51  ;;  %1592 = vmatpush.msra.mxu1 %v1540_v5  ;;  %v1755_v51 = vld [vmem:[#allocation4 + $0xdd0] sm:$0xff]  ;;  %v1721_v5 = vld [vmem:[#allocation4 + $0xcc0] sm:$0xff] }
 0x280   : > { %1573 = vmatpush.msra.mxu0 %v1506_v47  ;;  %1593 = vmatpush.msra.mxu1 %v1538_v52  ;;  %v1753_v47 = vld [vmem:[#allocation4 + $0xdc0] sm:$0xff]  ;;  %v1719_v52 = vld [vmem:[#allocation4 + $0xcb0] sm:$0xff] }
 0x282   : > { %1574 = vmatpush.msra.mxu0 %v1504_v53  ;;  %1594 = vmatpush.msra.mxu1 %v1536_v54  ;;  %v1751_v53 = vld [vmem:[#allocation4 + $0xdb0] sm:$0xff]  ;;  %v1717_v54 = vld [vmem:[#allocation4 + $0xca0] sm:$0xff] }
 0x284   : > { %1575 = vmatpush.msra.mxu0 %v1502_v9  ;;  %1595 = vmatpush.msra.mxu1 %v1534_v55  ;;  %v1749_v9 = vld [vmem:[#allocation4 + $0xda0] sm:$0xff]  ;;  %v1715_v55 = vld [vmem:[#allocation4 + $0xc90] sm:$0xff] }
 0x286   : > { %1576 = vmatpush.msra.mxu0 %v1500_v56  ;;  %1596 = vmatpush.msra.mxu1 %v1532_v57  ;;  %v1747_v56 = vld [vmem:[#allocation4 + $0xd90] sm:$0xff]  ;;  %v1713_v57 = vld [vmem:[#allocation4 + $0xc80] sm:$0xff] }
 0x288   : > { %1577 = vmatpush.msra.mxu0 %v1498_v58  ;;  %1597 = vmatpush.msra.mxu1 %v1530_v44  ;;  %v1745_v58 = vld [vmem:[#allocation4 + $0xd80] sm:$0xff]  ;;  %v1711_v44 = vld [vmem:[#allocation4 + $0xc70] sm:$0xff] }
 0x2c4   : > { %v1181_v60 = vpop.f32.mrf.mxu0  ;;  %v1201_v61 = vpop.f32.mrf.mxu1 }
 0x2c5   : > { %v1202_v62 = vadd.f32 %v1201_v61, %v1181_v60  ;;  %v1743_v60 = vld [vmem:[#allocation4 + $0xd70] sm:$0xff]  ;;  %v1709_v61 = vld [vmem:[#allocation4 + $0xc60] sm:$0xff] }
 0x2c7   : > { %v4053_v2 = vadd.f32 %v1202_v62, %v4037_v0  ;;  %v1525_v0 = vld [vmem:[#allocation4 + $0xad8] sm:$0xff]  ;;  %v1741_v62 = vld [vmem:[#allocation4 + $0xd60] sm:$0xff] }
 0x2cc   : > { %v1275_v3 = vpop.f32.mrf.mxu0  ;;  %v1295_v4 = vpop.f32.mrf.mxu1 }
 0x2cd   : > { %1379 = vmatmul.f32.vlgmr.msra.gmra.mxu2 %v1275_v3  ;;  %1399 = vmatmul.f32.vlgmr.msra.gmra.mxu3 %v1295_v4 }
 0x2ce   : > { %1419 = vmatmul.f32.vlgmr.msrb.gmra.mxu0 %v1275_v3  ;;  %1439 = vmatmul.f32.vlgmr.msrb.gmra.mxu1 %v1295_v4  ;;  %v1707_v3 = vld [vmem:[#allocation4 + $0xc50] sm:$0xff] }
 0x2cf   : > { %3501 = vmatpush.msk.msrb.mxu0 %vm462_vm0, %v3994_v63  ;;  %3503 = vmatpush.msk.msrb.mxu1 %vm462_vm0, %v3996_v1  ;;  %v1521_v63 = vld [vmem:[#allocation4 + $0xab8] sm:$0xff]  ;;  %v1739_v4 = vld [vmem:[#allocation4 + $0xd50] sm:$0xff] }
 0x2d0   : > { %1602 = vmatpush.msra.mxu2 %v1529_v6  ;;  %1622 = vmatpush.msra.mxu3 %v1561_v7  ;;  %v1553_v1 = vld [vmem:[#allocation4 + $0xbb8] sm:$0xff]  ;;  %v1705_v6 = vld [vmem:[#allocation4 + $0xc40] sm:$0xff] }
 0x2d1   : > { %v1737_v7 = vld [vmem:[#allocation4 + $0xd40] sm:$0xff] }
 0x2d2   : > { %1603 = vmatpush.msra.mxu2 %v1527_v8  ;;  %1623 = vmatpush.msra.mxu3 %v1559_v10  ;;  %v1703_v8 = vld [vmem:[#allocation4 + $0xc30] sm:$0xff] }
 0x2d3   : > { %v1735_v10 = vld [vmem:[#allocation4 + $0xd30] sm:$0xff] }
 0x2d4   : > { %1604 = vmatpush.msra.mxu2 %v1525_v0  ;;  %1624 = vmatpush.msra.mxu3 %v1557_v11  ;;  %v1701_v0 = vld [vmem:[#allocation4 + $0xc20] sm:$0xff] }
 0x2d5   : > { %3497 = vmatmul.msk.f32.vlgmr.msrb.gmra.mxu2 %vm458_vm1, %v3495_v12  ;;  %3499 = vmatmul.msk.f32.vlgmr.msrb.gmra.mxu3 %vm458_vm1, %v3495_v12  ;;  %v1733_v11 = vld [vmem:[#allocation4 + $0xd20] sm:$0xff]  ;;  %v1699_v12 = vld [vmem:[#allocation4 + $0xc10] sm:$0xff] }
 0x2d6   : > { %1605 = vmatpush.msra.mxu2 %v1523_v13  ;;  %1625 = vmatpush.msra.mxu3 %v1555_v14  ;;  %v1731_v13 = vld [vmem:[#allocation4 + $0xd10] sm:$0xff]  ;;  %v1697_v14 = vld [vmem:[#allocation4 + $0xc00] sm:$0xff] }
 0x2d8   : > { %1606 = vmatpush.msra.mxu2 %v1521_v63  ;;  %1626 = vmatpush.msra.mxu3 %v1553_v1  ;;  %v1729_v63 = vld [vmem:[#allocation4 + $0xd00] sm:$0xff]  ;;  %v4064_v1 = vpop.f32.mrf.mxu2 }
 0x2da   : > { %1607 = vmatpush.msra.mxu2 %v1519_v15  ;;  %1627 = vmatpush.msra.mxu3 %v1551_v16  ;;  %v4066_v15 = vpop.f32.mrf.mxu3 }
 0x2dc   : > { %1608 = vmatpush.msra.mxu2 %v1517_v17  ;;  %1628 = vmatpush.msra.mxu3 %v1549_v18 }
 0x2de   : > { %1609 = vmatpush.msra.mxu2 %v1515_v19  ;;  %1629 = vmatpush.msra.mxu3 %v1547_v22 }
 0x2e0   : > { %1610 = vmatpush.msra.mxu2 %v1513_v24  ;;  %1630 = vmatpush.msra.mxu3 %v1545_v25  ;;  %v1728_v25 = vld [vmem:[#allocation4 + $0xcf8] sm:$0xff] }
 0x2e2   : > { %1611 = vmatpush.msra.mxu2 %v1511_v27  ;;  %1631 = vmatpush.msra.mxu3 %v1543_v28  ;;  %v1760_v27 = vld [vmem:[#allocation4 + $0xdf8] sm:$0xff]  ;;  %v1726_v28 = vld [vmem:[#allocation4 + $0xce8] sm:$0xff] }
 0x2e4   : > { %1612 = vmatpush.msra.mxu2 %v1509_v29  ;;  %1632 = vmatpush.msra.mxu3 %v1541_v30  ;;  %v1758_v29 = vld [vmem:[#allocation4 + $0xde8] sm:$0xff]  ;;  %v1756_v30 = vld [vmem:[#allocation4 + $0xdd8] sm:$0xff] }
 0x2e6   : > { %1613 = vmatpush.msra.mxu2 %v1507_v31  ;;  %1633 = vmatpush.msra.mxu3 %v1539_v32  ;;  %v3500_v31 = vld [vmem:[%s4273_s2 + $0x30] sm:$0xff] }
 0x2e7   : > { %v1722_v32 = vld [vmem:[#allocation4 + $0xcc8] sm:$0xff] }
 0x2e8   : > { %1614 = vmatpush.msra.mxu2 %v1505_v33  ;;  %1634 = vmatpush.msra.mxu3 %v1537_v34  ;;  %v1754_v33 = vld [vmem:[#allocation4 + $0xdc8] sm:$0xff] }
 0x2e9   : > { %v1718_v34 = vld [vmem:[#allocation4 + $0xca8] sm:$0xff] }
 0x2ea   : > { %1615 = vmatpush.msra.mxu2 %v1503_v35  ;;  %1635 = vmatpush.msra.mxu3 %v1535_v36  ;;  %v1750_v35 = vld [vmem:[#allocation4 + $0xda8] sm:$0xff]  ;;  %v1716_v36 = vld [vmem:[#allocation4 + $0xc98] sm:$0xff] }
 0x2ec   : > { %1616 = vmatpush.msra.mxu2 %v1501_v37  ;;  %1636 = vmatpush.msra.mxu3 %v1533_v38  ;;  %v1748_v37 = vld [vmem:[#allocation4 + $0xd98] sm:$0xff]  ;;  %v1714_v38 = vld [vmem:[#allocation4 + $0xc88] sm:$0xff] }
 0x2ee   : > { %1617 = vmatpush.msra.mxu2 %v1499_v39  ;;  %1637 = vmatpush.msra.mxu3 %v1531_v40  ;;  %v1746_v39 = vld [vmem:[#allocation4 + $0xd88] sm:$0xff]  ;;  %v1712_v40 = vld [vmem:[#allocation4 + $0xc78] sm:$0xff] }
 0x2f0   : > { %1761 = vmatpush.msrb.mxu2 %v1727_v41  ;;  %1781 = vmatpush.msrb.mxu3 %v1759_v43  ;;  %v1744_v41 = vld [vmem:[#allocation4 + $0xd78] sm:$0xff]  ;;  %v1710_v43 = vld [vmem:[#allocation4 + $0xc68] sm:$0xff] }
 0x2f2   : > { %1762 = vmatpush.msrb.mxu2 %v1725_v49  ;;  %1782 = vmatpush.msrb.mxu3 %v1757_v50  ;;  %v1742_v49 = vld [vmem:[#allocation4 + $0xd68] sm:$0xff]  ;;  %v1708_v50 = vld [vmem:[#allocation4 + $0xc58] sm:$0xff] }
 0x2f4   : > { %1763 = vmatpush.msrb.mxu2 %v1723_v42  ;;  %1783 = vmatpush.msrb.mxu3 %v1755_v51  ;;  %v1740_v42 = vld [vmem:[#allocation4 + $0xd58] sm:$0xff]  ;;  %v1706_v51 = vld [vmem:[#allocation4 + $0xc48] sm:$0xff] }
 0x2f6   : > { %1764 = vmatpush.msrb.mxu2 %v1721_v5  ;;  %1784 = vmatpush.msrb.mxu3 %v1753_v47  ;;  %v1738_v5 = vld [vmem:[#allocation4 + $0xd48] sm:$0xff]  ;;  %v1704_v47 = vld [vmem:[#allocation4 + $0xc38] sm:$0xff] }
 0x2f8   : > { %1765 = vmatpush.msrb.mxu2 %v1719_v52  ;;  %1785 = vmatpush.msrb.mxu3 %v1751_v53  ;;  %v1736_v52 = vld [vmem:[#allocation4 + $0xd38] sm:$0xff]  ;;  %v1702_v53 = vld [vmem:[#allocation4 + $0xc28] sm:$0xff] }
 0x2fa   : > { %1766 = vmatpush.msrb.mxu2 %v1717_v54  ;;  %1786 = vmatpush.msrb.mxu3 %v1749_v9  ;;  %v1734_v54 = vld [vmem:[#allocation4 + $0xd28] sm:$0xff]  ;;  %v1700_v9 = vld [vmem:[#allocation4 + $0xc18] sm:$0xff] }
 0x2fc   : > { %1767 = vmatpush.msrb.mxu2 %v1715_v55  ;;  %1787 = vmatpush.msrb.mxu3 %v1747_v56  ;;  %v1732_v55 = vld [vmem:[#allocation4 + $0xd18] sm:$0xff]  ;;  %v1698_v56 = vld [vmem:[#allocation4 + $0xc08] sm:$0xff] }
 0x2fe   : > { %1768 = vmatpush.msrb.mxu2 %v1713_v57  ;;  %1788 = vmatpush.msrb.mxu3 %v1745_v58  ;;  %v1730_v57 = vld [vmem:[#allocation4 + $0xd08] sm:$0xff]  ;;  %v1926_v58 = vld [vmem:[#allocation4 + $0xef0] sm:$0xff] }
 0x300   : > { %1769 = vmatpush.msrb.mxu2 %v1711_v44  ;;  %1789 = vmatpush.msrb.mxu3 %v1743_v60  ;;  %v1958_v44 = vld [vmem:[#allocation4 + $0xff0] sm:$0xff]  ;;  %v1924_v60 = vld [vmem:[#allocation4 + $0xee0] sm:$0xff] }
 0x302   : > { %1770 = vmatpush.msrb.mxu2 %v1709_v61  ;;  %1790 = vmatpush.msrb.mxu3 %v1741_v62  ;;  %v1956_v61 = vld [vmem:[#allocation4 + $0xfe0] sm:$0xff]  ;;  %v1922_v62 = vld [vmem:[#allocation4 + $0xed0] sm:$0xff] }
 0x304   : > { %1771 = vmatpush.msrb.mxu2 %v1707_v3  ;;  %1791 = vmatpush.msrb.mxu3 %v1739_v4  ;;  %v1954_v3 = vld [vmem:[#allocation4 + $0xfd0] sm:$0xff]  ;;  %v1920_v4 = vld [vmem:[#allocation4 + $0xec0] sm:$0xff] }
 0x306   : > { %1772 = vmatpush.msrb.mxu2 %v1705_v6  ;;  %1792 = vmatpush.msrb.mxu3 %v1737_v7  ;;  %v1952_v6 = vld [vmem:[#allocation4 + $0xfc0] sm:$0xff]  ;;  %v1918_v7 = vld [vmem:[#allocation4 + $0xeb0] sm:$0xff] }
 0x308   : > { %1773 = vmatpush.msrb.mxu2 %v1703_v8  ;;  %1793 = vmatpush.msrb.mxu3 %v1735_v10  ;;  %v1950_v8 = vld [vmem:[#allocation4 + $0xfb0] sm:$0xff]  ;;  %v1916_v10 = vld [vmem:[#allocation4 + $0xea0] sm:$0xff] }
 0x30a   : > { %1774 = vmatpush.msrb.mxu2 %v1701_v0  ;;  %1794 = vmatpush.msrb.mxu3 %v1733_v11  ;;  %v1948_v0 = vld [vmem:[#allocation4 + $0xfa0] sm:$0xff]  ;;  %v1914_v11 = vld [vmem:[#allocation4 + $0xe90] sm:$0xff] }
 0x30c   : > { %1775 = vmatpush.msrb.mxu2 %v1699_v12  ;;  %1795 = vmatpush.msrb.mxu3 %v1731_v13  ;;  %v1946_v12 = vld [vmem:[#allocation4 + $0xf90] sm:$0xff]  ;;  %v1912_v13 = vld [vmem:[#allocation4 + $0xe80] sm:$0xff] }
 0x30e   : > { %1776 = vmatpush.msrb.mxu2 %v1697_v14  ;;  %1796 = vmatpush.msrb.mxu3 %v1729_v63  ;;  %v1944_v14 = vld [vmem:[#allocation4 + $0xf80] sm:$0xff]  ;;  %v1910_v63 = vld [vmem:[#allocation4 + $0xe70] sm:$0xff] }
 0x350   : > { %v1380_v16 = vpop.f32.mrf.mxu2  ;;  %v1400_v17 = vpop.f32.mrf.mxu3 }
 0x351   : > { %v1401_v18 = vadd.f32 %v1400_v17, %v1380_v16  ;;  %v1942_v16 = vld [vmem:[#allocation4 + $0xf70] sm:$0xff]  ;;  %v1908_v17 = vld [vmem:[#allocation4 + $0xe60] sm:$0xff] }
 0x353   : > { %v4069_v19 = vadd.f32 %v1401_v18, %v4053_v2  ;;  %v1724_v2 = vld [vmem:[#allocation4 + $0xcd8] sm:$0xff]  ;;  %v1940_v18 = vld [vmem:[#allocation4 + $0xf60] sm:$0xff] }
 0x358   : > { %v1474_v22 = vpop.f32.mrf.mxu2  ;;  %v1494_v24 = vpop.f32.mrf.mxu3 }
 0x359   : > { %1578 = vmatmul.f32.vlgmr.msra.gmra.mxu0 %v1474_v22  ;;  %1598 = vmatmul.f32.vlgmr.msra.gmra.mxu1 %v1494_v24 }
 0x35a   : > { %1618 = vmatmul.f32.vlgmr.msra.gmra.mxu2 %v1474_v22  ;;  %1638 = vmatmul.f32.vlgmr.msra.gmra.mxu3 %v1494_v24  ;;  %v1906_v22 = vld [vmem:[#allocation4 + $0xe50] sm:$0xff] }
 0x35b   : > { %3506 = vmatpush.msk.msra.mxu2 %vm462_vm0, %v3999_v20  ;;  %3508 = vmatpush.msk.msra.mxu3 %vm462_vm0, %v4001_v21  ;;  %v1720_v20 = vld [vmem:[#allocation4 + $0xcb8] sm:$0xff]  ;;  %v1938_v24 = vld [vmem:[#allocation4 + $0xf50] sm:$0xff] }
 0x35c   : > { %1801 = vmatpush.msra.mxu0 %v1728_v25  ;;  %1821 = vmatpush.msra.mxu1 %v1760_v27  ;;  %v1752_v21 = vld [vmem:[#allocation4 + $0xdb8] sm:$0xff]  ;;  %v1904_v25 = vld [vmem:[#allocation4 + $0xe40] sm:$0xff] }
 0x35d   : > { %v1936_v27 = vld [vmem:[#allocation4 + $0xf40] sm:$0xff] }
 0x35e   : > { %1802 = vmatpush.msra.mxu0 %v1726_v28  ;;  %1822 = vmatpush.msra.mxu1 %v1758_v29  ;;  %v1902_v28 = vld [vmem:[#allocation4 + $0xe30] sm:$0xff] }
 0x35f   : > { %v1934_v29 = vld [vmem:[#allocation4 + $0xf30] sm:$0xff] }
 0x360   : > { %1803 = vmatpush.msra.mxu0 %v1724_v2  ;;  %1823 = vmatpush.msra.mxu1 %v1756_v30  ;;  %v1900_v2 = vld [vmem:[#allocation4 + $0xe20] sm:$0xff] }
 0x361   : > { %3502 = vmatmul.msk.f32.vlgmr.msrb.gmra.mxu0 %vm458_vm1, %v3500_v31  ;;  %3504 = vmatmul.msk.f32.vlgmr.msrb.gmra.mxu1 %vm458_vm1, %v3500_v31  ;;  %v1932_v30 = vld [vmem:[#allocation4 + $0xf20] sm:$0xff]  ;;  %v1898_v31 = vld [vmem:[#allocation4 + $0xe10] sm:$0xff] }
 0x362   : > { %1804 = vmatpush.msra.mxu0 %v1722_v32  ;;  %1824 = vmatpush.msra.mxu1 %v1754_v33  ;;  %v1930_v32 = vld [vmem:[#allocation4 + $0xf10] sm:$0xff]  ;;  %v1896_v33 = vld [vmem:[#allocation4 + $0xe00] sm:$0xff] }
 0x364   : > { %1805 = vmatpush.msra.mxu0 %v1720_v20  ;;  %1825 = vmatpush.msra.mxu1 %v1752_v21  ;;  %v1928_v20 = vld [vmem:[#allocation4 + $0xf00] sm:$0xff]  ;;  %v4080_v21 = vpop.f32.mrf.mxu0 }
 0x366   : > { %1806 = vmatpush.msra.mxu0 %v1718_v34  ;;  %1826 = vmatpush.msra.mxu1 %v1750_v35  ;;  %v4082_v34 = vpop.f32.mrf.mxu1 }
 0x368   : > { %1807 = vmatpush.msra.mxu0 %v1716_v36  ;;  %1827 = vmatpush.msra.mxu1 %v1748_v37 }
 0x36a   : > { %1808 = vmatpush.msra.mxu0 %v1714_v38  ;;  %1828 = vmatpush.msra.mxu1 %v1746_v39 }
 0x36c   : > { %1809 = vmatpush.msra.mxu0 %v1712_v40  ;;  %1829 = vmatpush.msra.mxu1 %v1744_v41  ;;  %v1927_v41 = vld [vmem:[#allocation4 + $0xef8] sm:$0xff] }
 0x36e   : > { %1810 = vmatpush.msra.mxu0 %v1710_v43  ;;  %1830 = vmatpush.msra.mxu1 %v1742_v49  ;;  %v1959_v43 = vld [vmem:[#allocation4 + $0xff8] sm:$0xff] }
 0x36f   : > { %v2045_v49 = vld.sshfl [vmem:[#allocation1] sm:$0xff pattern:$0x75316420] }
 0x370   : > { %1811 = vmatpush.msra.mxu0 %v1708_v50  ;;  %1831 = vmatpush.msra.mxu1 %v1740_v42  ;;  %v2046_v50 = vld.sshfl [vmem:[#allocation1 + $0x8] sm:$0xff pattern:$0x75316420]  ;;  %v1925_v42 = vld [vmem:[#allocation4 + $0xee8] sm:$0xff] }
 0x372   : > { %1812 = vmatpush.msra.mxu0 %v1706_v51  ;;  %1832 = vmatpush.msra.mxu1 %v1738_v5  ;;  %v1957_v51 = vld [vmem:[#allocation4 + $0xfe8] sm:$0xff]  ;;  %v1955_v5 = vld [vmem:[#allocation4 + $0xfd8] sm:$0xff] }
 0x374   : > { %1813 = vmatpush.msra.mxu0 %v1704_v47  ;;  %1833 = vmatpush.msra.mxu1 %v1736_v52  ;;  %v3505_v47 = vld [vmem:[%s4273_s2 + $0x38] sm:$0xff] }
 0x375   : > { %v1921_v52 = vld [vmem:[#allocation4 + $0xec8] sm:$0xff] }
 0x376   : > { %1814 = vmatpush.msra.mxu0 %v1702_v53  ;;  %1834 = vmatpush.msra.mxu1 %v1734_v54  ;;  %v1953_v53 = vld [vmem:[#allocation4 + $0xfc8] sm:$0xff]  ;;  %v1919_v54 = vld [vmem:[#allocation4 + $0xeb8] sm:$0xff] }
 0x378   : > { %1815 = vmatpush.msra.mxu0 %v1700_v9  ;;  %1835 = vmatpush.msra.mxu1 %v1732_v55  ;;  %v1951_v9 = vld [vmem:[#allocation4 + $0xfb8] sm:$0xff]  ;;  %v1917_v55 = vld [vmem:[#allocation4 + $0xea8] sm:$0xff] }
 0x37a   : > { %1816 = vmatpush.msra.mxu0 %v1698_v56  ;;  %1836 = vmatpush.msra.mxu1 %v1730_v57  ;;  %v1949_v56 = vld [vmem:[#allocation4 + $0xfa8] sm:$0xff]  ;;  %v1915_v57 = vld [vmem:[#allocation4 + $0xe98] sm:$0xff] }
 0x37c   : > { %1960 = vmatpush.msrb.mxu0 %v1926_v58  ;;  %1980 = vmatpush.msrb.mxu1 %v1958_v44  ;;  %v1947_v58 = vld [vmem:[#allocation4 + $0xf98] sm:$0xff]  ;;  %v1913_v44 = vld [vmem:[#allocation4 + $0xe88] sm:$0xff] }
 0x37e   : > { %1961 = vmatpush.msrb.mxu0 %v1924_v60  ;;  %1981 = vmatpush.msrb.mxu1 %v1956_v61  ;;  %v1945_v60 = vld [vmem:[#allocation4 + $0xf88] sm:$0xff]  ;;  %v1911_v61 = vld [vmem:[#allocation4 + $0xe78] sm:$0xff] }
 0x380   : > { %1962 = vmatpush.msrb.mxu0 %v1922_v62  ;;  %1982 = vmatpush.msrb.mxu1 %v1954_v3  ;;  %v1943_v62 = vld [vmem:[#allocation4 + $0xf78] sm:$0xff]  ;;  %v1909_v3 = vld [vmem:[#allocation4 + $0xe68] sm:$0xff] }
 0x382   : > { %1963 = vmatpush.msrb.mxu0 %v1920_v4  ;;  %1983 = vmatpush.msrb.mxu1 %v1952_v6  ;;  %v1941_v4 = vld [vmem:[#allocation4 + $0xf68] sm:$0xff]  ;;  %v1907_v6 = vld [vmem:[#allocation4 + $0xe58] sm:$0xff] }
 0x384   : > { %1964 = vmatpush.msrb.mxu0 %v1918_v7  ;;  %1984 = vmatpush.msrb.mxu1 %v1950_v8  ;;  %v1939_v7 = vld [vmem:[#allocation4 + $0xf58] sm:$0xff]  ;;  %v1905_v8 = vld [vmem:[#allocation4 + $0xe48] sm:$0xff] }
 0x386   : > { %1965 = vmatpush.msrb.mxu0 %v1916_v10  ;;  %1985 = vmatpush.msrb.mxu1 %v1948_v0  ;;  %v1937_v10 = vld [vmem:[#allocation4 + $0xf48] sm:$0xff]  ;;  %v1903_v0 = vld [vmem:[#allocation4 + $0xe38] sm:$0xff] }
 0x388   : > { %1966 = vmatpush.msrb.mxu0 %v1914_v11  ;;  %1986 = vmatpush.msrb.mxu1 %v1946_v12  ;;  %v1935_v11 = vld [vmem:[#allocation4 + $0xf38] sm:$0xff]  ;;  %v1901_v12 = vld [vmem:[#allocation4 + $0xe28] sm:$0xff] }
 0x38a   : > { %1967 = vmatpush.msrb.mxu0 %v1912_v13  ;;  %1987 = vmatpush.msrb.mxu1 %v1944_v14  ;;  %v1933_v13 = vld [vmem:[#allocation4 + $0xf28] sm:$0xff]  ;;  %v1899_v14 = vld [vmem:[#allocation4 + $0xe18] sm:$0xff] }
 0x38c   : > { %1968 = vmatpush.msrb.mxu0 %v1910_v63  ;;  %1988 = vmatpush.msrb.mxu1 %v1942_v16  ;;  %v1931_v63 = vld [vmem:[#allocation4 + $0xf18] sm:$0xff]  ;;  %v1897_v16 = vld [vmem:[#allocation4 + $0xe08] sm:$0xff] }
 0x38e   : > { %1969 = vmatpush.msrb.mxu0 %v1908_v17  ;;  %1989 = vmatpush.msrb.mxu1 %v1940_v18  ;;  %v1929_v17 = vld [vmem:[#allocation4 + $0xf08] sm:$0xff]  ;;  %v2125_v18 = vld [vmem:[#allocation4 + $0x10f0] sm:$0xff] }
 0x390   : > { %1970 = vmatpush.msrb.mxu0 %v1906_v22  ;;  %1990 = vmatpush.msrb.mxu1 %v1938_v24  ;;  %v2157_v22 = vld [vmem:[#allocation4 + $0x11f0] sm:$0xff]  ;;  %v2123_v24 = vld [vmem:[#allocation4 + $0x10e0] sm:$0xff] }
 0x392   : > { %1971 = vmatpush.msrb.mxu0 %v1904_v25  ;;  %1991 = vmatpush.msrb.mxu1 %v1936_v27  ;;  %v2155_v25 = vld [vmem:[#allocation4 + $0x11e0] sm:$0xff]  ;;  %v2121_v27 = vld [vmem:[#allocation4 + $0x10d0] sm:$0xff] }
 0x394   : > { %1972 = vmatpush.msrb.mxu0 %v1902_v28  ;;  %1992 = vmatpush.msrb.mxu1 %v1934_v29  ;;  %v2153_v28 = vld [vmem:[#allocation4 + $0x11d0] sm:$0xff]  ;;  %v2119_v29 = vld [vmem:[#allocation4 + $0x10c0] sm:$0xff] }
 0x396   : > { %1973 = vmatpush.msrb.mxu0 %v1900_v2  ;;  %1993 = vmatpush.msrb.mxu1 %v1932_v30  ;;  %v2151_v2 = vld [vmem:[#allocation4 + $0x11c0] sm:$0xff]  ;;  %v2117_v30 = vld [vmem:[#allocation4 + $0x10b0] sm:$0xff] }
 0x398   : > { %1974 = vmatpush.msrb.mxu0 %v1898_v31  ;;  %1994 = vmatpush.msrb.mxu1 %v1930_v32  ;;  %v2149_v31 = vld [vmem:[#allocation4 + $0x11b0] sm:$0xff] }
 0x39a   : > { %1975 = vmatpush.msrb.mxu0 %v1896_v33  ;;  %1995 = vmatpush.msrb.mxu1 %v1928_v20  ;;  %v2115_v20 = vld [vmem:[#allocation4 + $0x10a0] sm:$0xff] }
 0x3d6   : > { %v1579_v35 = vpop.f32.mrf.mxu0  ;;  %v1599_v36 = vpop.f32.mrf.mxu1 }
 0x3d7   : > { %v1600_v37 = vadd.f32 %v1599_v36, %v1579_v35  ;;  %v2147_v35 = vld [vmem:[#allocation4 + $0x11a0] sm:$0xff]  ;;  %v2113_v36 = vld [vmem:[#allocation4 + $0x1090] sm:$0xff] }
 0x3d9   : > { %v4085_v38 = vadd.f32 %v1600_v37, %v4069_v19  ;;  %v1923_v19 = vld [vmem:[#allocation4 + $0xed8] sm:$0xff]  ;;  %v2145_v37 = vld [vmem:[#allocation4 + $0x1190] sm:$0xff] }
 0x3dd   : > { %v4094_v32 = vpop.f32.mrf.mxu2  ;;  %v4096_v33 = vpop.f32.mrf.mxu3 }
 0x3de   : > { %v1673_v39 = vpop.f32.mrf.mxu0  ;;  %v1693_v40 = vpop.f32.mrf.mxu1 }
 0x3df   : > { %1777 = vmatmul.f32.vlgmr.msrb.gmra.mxu2 %v1673_v39  ;;  %1797 = vmatmul.f32.vlgmr.msrb.gmra.mxu3 %v1693_v40 }
 0x3e0   : > { %1817 = vmatmul.f32.vlgmr.msra.gmra.mxu0 %v1673_v39  ;;  %1837 = vmatmul.f32.vlgmr.msra.gmra.mxu1 %v1693_v40  ;;  %v2111_v39 = vld [vmem:[#allocation4 + $0x1080] sm:$0xff] }
 0x3e1   : > { %3511 = vmatpush.msk.msra.mxu0 %vm462_vm0, %v2045_v49  ;;  %3513 = vmatpush.msk.msra.mxu1 %vm462_vm0, %v2046_v50  ;;  %v2143_v40 = vld [vmem:[#allocation4 + $0x1180] sm:$0xff] }
 0x3e2   : > { %2000 = vmatpush.msrb.mxu2 %v1927_v41  ;;  %2020 = vmatpush.msrb.mxu3 %v1959_v43  ;;  %v2109_v41 = vld [vmem:[#allocation4 + $0x1070] sm:$0xff] }
 0x3e3   : > { %v2141_v43 = vld [vmem:[#allocation4 + $0x1170] sm:$0xff] }
 0x3e4   : > { %2001 = vmatpush.msrb.mxu2 %v1925_v42  ;;  %2021 = vmatpush.msrb.mxu3 %v1957_v51  ;;  %v2107_v51 = vld [vmem:[#allocation4 + $0x1060] sm:$0xff] }
 0x3e6   : > { %2002 = vmatpush.msrb.mxu2 %v1923_v19  ;;  %2022 = vmatpush.msrb.mxu3 %v1955_v5  ;;  %v2139_v19 = vld [vmem:[#allocation4 + $0x1160] sm:$0xff] }
 0x3e7   : > { %3507 = vmatmul.msk.f32.vlgmr.msra.gmra.mxu2 %vm458_vm1, %v3505_v47  ;;  %3509 = vmatmul.msk.f32.vlgmr.msra.gmra.mxu3 %vm458_vm1, %v3505_v47  ;;  %v2105_v47 = vld [vmem:[#allocation4 + $0x1050] sm:$0xff] }
 0x3e8   : > { %2003 = vmatpush.msrb.mxu2 %v1921_v52  ;;  %2023 = vmatpush.msrb.mxu3 %v1953_v53  ;;  %v2137_v52 = vld [vmem:[#allocation4 + $0x1150] sm:$0xff] }
 0x3ea   : > { %2004 = vmatpush.msrb.mxu2 %v1919_v54  ;;  %2024 = vmatpush.msrb.mxu3 %v1951_v9  ;;  %v2126_v9 = vld [vmem:[#allocation4 + $0x10f8] sm:$0xff] }
 0x3ec   : > { %2005 = vmatpush.msrb.mxu2 %v1917_v55  ;;  %2025 = vmatpush.msrb.mxu3 %v1949_v56  ;;  %v2158_v55 = vld [vmem:[#allocation4 + $0x11f8] sm:$0xff]  ;;  %v2124_v56 = vld [vmem:[#allocation4 + $0x10e8] sm:$0xff] }
 0x3ee   : > { %2006 = vmatpush.msrb.mxu2 %v1915_v57  ;;  %2026 = vmatpush.msrb.mxu3 %v1947_v58  ;;  %v2156_v57 = vld [vmem:[#allocation4 + $0x11e8] sm:$0xff]  ;;  %v2154_v58 = vld [vmem:[#allocation4 + $0x11d8] sm:$0xff] }
 0x3f0   : > { %2007 = vmatpush.msrb.mxu2 %v1913_v44  ;;  %2027 = vmatpush.msrb.mxu3 %v1945_v60  ;;  %v3510_v44 = vld [vmem:[%s4273_s2 + $0x40] sm:$0xff]  ;;  %v2120_v60 = vld [vmem:[#allocation4 + $0x10c8] sm:$0xff] }
 0x3f2   : > { %2008 = vmatpush.msrb.mxu2 %v1911_v61  ;;  %2028 = vmatpush.msrb.mxu3 %v1943_v62  ;;  %v2152_v61 = vld [vmem:[#allocation4 + $0x11c8] sm:$0xff]  ;;  %v2118_v62 = vld [vmem:[#allocation4 + $0x10b8] sm:$0xff] }
 0x3f4   : > { %2009 = vmatpush.msrb.mxu2 %v1909_v3  ;;  %2029 = vmatpush.msrb.mxu3 %v1941_v4  ;;  %v2150_v3 = vld [vmem:[#allocation4 + $0x11b8] sm:$0xff]  ;;  %v2116_v4 = vld [vmem:[#allocation4 + $0x10a8] sm:$0xff] }
 0x3f6   : > { %2010 = vmatpush.msrb.mxu2 %v1907_v6  ;;  %2030 = vmatpush.msrb.mxu3 %v1939_v7  ;;  %v2148_v6 = vld [vmem:[#allocation4 + $0x11a8] sm:$0xff]  ;;  %v2114_v7 = vld [vmem:[#allocation4 + $0x1098] sm:$0xff] }
 0x3f8   : > { %2011 = vmatpush.msrb.mxu2 %v1905_v8  ;;  %2031 = vmatpush.msrb.mxu3 %v1937_v10  ;;  %v2146_v8 = vld [vmem:[#allocation4 + $0x1198] sm:$0xff]  ;;  %v2112_v10 = vld [vmem:[#allocation4 + $0x1088] sm:$0xff] }
 0x3fa   : > { %2012 = vmatpush.msrb.mxu2 %v1903_v0  ;;  %2032 = vmatpush.msrb.mxu3 %v1935_v11  ;;  %v2144_v0 = vld [vmem:[#allocation4 + $0x1188] sm:$0xff]  ;;  %v2110_v11 = vld [vmem:[#allocation4 + $0x1078] sm:$0xff] }
 0x3fc   : > { %2013 = vmatpush.msrb.mxu2 %v1901_v12  ;;  %2033 = vmatpush.msrb.mxu3 %v1933_v13  ;;  %v2142_v12 = vld [vmem:[#allocation4 + $0x1178] sm:$0xff]  ;;  %v2108_v13 = vld [vmem:[#allocation4 + $0x1068] sm:$0xff] }
 0x3fe   : > { %2014 = vmatpush.msrb.mxu2 %v1899_v14  ;;  %2034 = vmatpush.msrb.mxu3 %v1931_v63  ;;  %v2140_v14 = vld [vmem:[#allocation4 + $0x1168] sm:$0xff]  ;;  %v2106_v63 = vld [vmem:[#allocation4 + $0x1058] sm:$0xff] }
 0x400   : > { %2015 = vmatpush.msrb.mxu2 %v1897_v16  ;;  %2035 = vmatpush.msrb.mxu3 %v1929_v17  ;;  %v2138_v16 = vld [vmem:[#allocation4 + $0x1158] sm:$0xff]  ;;  %v2103_v17 = vld [vmem:[#allocation4 + $0x1040] sm:$0xff] }
 0x402   : > { %2159 = vmatpush.msra.mxu2 %v2125_v18  ;;  %2179 = vmatpush.msra.mxu3 %v2157_v22  ;;  %v2135_v18 = vld [vmem:[#allocation4 + $0x1140] sm:$0xff]  ;;  %v2104_v22 = vld [vmem:[#allocation4 + $0x1048] sm:$0xff] }
 0x404   : > { %2160 = vmatpush.msra.mxu2 %v2123_v24  ;;  %2180 = vmatpush.msra.mxu3 %v2155_v25  ;;  %v2136_v24 = vld [vmem:[#allocation4 + $0x1148] sm:$0xff]  ;;  %v2101_v25 = vld [vmem:[#allocation4 + $0x1030] sm:$0xff] }
 0x406   : > { %2161 = vmatpush.msra.mxu2 %v2121_v27  ;;  %2181 = vmatpush.msra.mxu3 %v2153_v28  ;;  %v2133_v27 = vld [vmem:[#allocation4 + $0x1130] sm:$0xff]  ;;  %v2102_v28 = vld [vmem:[#allocation4 + $0x1038] sm:$0xff] }
 0x408   : > { %2162 = vmatpush.msra.mxu2 %v2119_v29  ;;  %2182 = vmatpush.msra.mxu3 %v2151_v2  ;;  %v2134_v29 = vld [vmem:[#allocation4 + $0x1138] sm:$0xff]  ;;  %v2099_v2 = vld [vmem:[#allocation4 + $0x1020] sm:$0xff] }
 0x40a   : > { %2163 = vmatpush.msra.mxu2 %v2117_v30  ;;  %2183 = vmatpush.msra.mxu3 %v2149_v31  ;;  %v2131_v30 = vld [vmem:[#allocation4 + $0x1120] sm:$0xff]  ;;  %v2100_v31 = vld [vmem:[#allocation4 + $0x1028] sm:$0xff] }
 0x40c   : > { %2164 = vmatpush.msra.mxu2 %v2115_v20  ;;  %2184 = vmatpush.msra.mxu3 %v2147_v35  ;;  %v2132_v20 = vld [vmem:[#allocation4 + $0x1128] sm:$0xff]  ;;  %v2097_v35 = vld [vmem:[#allocation4 + $0x1010] sm:$0xff] }
 0x40e   : > { %2165 = vmatpush.msra.mxu2 %v2113_v36  ;;  %2185 = vmatpush.msra.mxu3 %v2145_v37  ;;  %v2129_v36 = vld [vmem:[#allocation4 + $0x1110] sm:$0xff]  ;;  %v2098_v37 = vld [vmem:[#allocation4 + $0x1018] sm:$0xff] }
 0x410   : > { %2166 = vmatpush.msra.mxu2 %v2111_v39  ;;  %2186 = vmatpush.msra.mxu3 %v2143_v40  ;;  %v2130_v39 = vld [vmem:[#allocation4 + $0x1118] sm:$0xff]  ;;  %v2095_v40 = vld [vmem:[#allocation4 + $0x1000] sm:$0xff] }
 0x412   : > { %2167 = vmatpush.msra.mxu2 %v2109_v41  ;;  %2187 = vmatpush.msra.mxu3 %v2141_v43  ;;  %v2127_v41 = vld [vmem:[#allocation4 + $0x1100] sm:$0xff]  ;;  %v2096_v43 = vld [vmem:[#allocation4 + $0x1008] sm:$0xff] }
 0x414   : > { %2168 = vmatpush.msra.mxu2 %v2107_v51  ;;  %2188 = vmatpush.msra.mxu3 %v2139_v19  ;;  %v2281_v51 = vld [vmem:[#allocation6 + $0xf0] sm:$0xff] }
 0x415   : > { %v2354_v19 = vld [vmem:[#allocation6 + $0x1f0] sm:$0xff] }
 0x416   : > { %2169 = vmatpush.msra.mxu2 %v2105_v47  ;;  %2189 = vmatpush.msra.mxu3 %v2137_v52  ;;  %v2266_v47 = vld [vmem:[#allocation6 + $0x78] sm:$0xff]  ;;  %v2280_v52 = vld [vmem:[#allocation6 + $0xe8] sm:$0xff] }
 0x418   : > { %2170 = vmatpush.msra.mxu2 %v2103_v17  ;;  %2190 = vmatpush.msra.mxu3 %v2135_v18  ;;  %v2348_v17 = vld [vmem:[#allocation6 + $0x1c0] sm:$0xff] }
 0x419   : > { %v2259_v18 = vld [vmem:[#allocation6 + $0x40] sm:$0xff] }
 0x41a   : > { %2171 = vmatpush.msra.mxu2 %v2101_v25  ;;  %2191 = vmatpush.msra.mxu3 %v2133_v27  ;;  %v2347_v25 = vld [vmem:[#allocation6 + $0x1b8] sm:$0xff] }
 0x41b   : > { %v2258_v27 = vld [vmem:[#allocation6 + $0x38] sm:$0xff] }
 0x41c   : > { %2172 = vmatpush.msra.mxu2 %v2099_v2  ;;  %2192 = vmatpush.msra.mxu3 %v2131_v30  ;;  %v2346_v2 = vld [vmem:[#allocation6 + $0x1b0] sm:$0xff] }
 0x41d   : > { %v2257_v30 = vld [vmem:[#allocation6 + $0x30] sm:$0xff] }
 0x41e   : > { %2173 = vmatpush.msra.mxu2 %v2097_v35  ;;  %2193 = vmatpush.msra.mxu3 %v2129_v36  ;;  %v2272_v36 = vld [vmem:[#allocation6 + $0xa8] sm:$0xff] }
 0x420   : > { %2174 = vmatpush.msra.mxu2 %v2095_v40  ;;  %2194 = vmatpush.msra.mxu3 %v2127_v41  ;;  %v2256_v40 = vld [vmem:[#allocation6 + $0x28] sm:$0xff] }
 0x421   : > { %v2329_v41 = vld [vmem:[#allocation6 + $0x128] sm:$0xff] }
 0x462   : > { %v1778_v49 = vpop.f32.mrf.mxu2  ;;  %v1798_v50 = vpop.f32.mrf.mxu3 }
 0x463   : > { %v1799_v42 = vadd.f32 %v1798_v50, %v1778_v49  ;;  %v2128_v49 = vld [vmem:[#allocation4 + $0x1108] sm:$0xff]  ;;  %v2282_v50 = vld [vmem:[#allocation6 + $0xf8] sm:$0xff] }
 0x465   : > { %v4099_v5 = vadd.f32 %v1799_v42, %v4085_v38  ;;  %v2122_v38 = vld [vmem:[#allocation4 + $0x10d8] sm:$0xff] }
 0x466   : > { %v2355_v42 = vld [vmem:[#allocation6 + $0x1f8] sm:$0xff] }
 0x46a   : > { %v1872_v53 = vpop.f32.mrf.mxu2  ;;  %v1892_v54 = vpop.f32.mrf.mxu3 }
 0x46b   : > { %1976 = vmatmul.f32.vlgmr.msrb.gmra.mxu0 %v1872_v53  ;;  %1996 = vmatmul.f32.vlgmr.msrb.gmra.mxu1 %v1892_v54 }
 0x46c   : > { %2016 = vmatmul.f32.vlgmr.msrb.gmra.mxu2 %v1872_v53  ;;  %2036 = vmatmul.f32.vlgmr.msrb.gmra.mxu3 %v1892_v54  ;;  %v2339_v53 = vld [vmem:[#allocation6 + $0x178] sm:$0xff]  ;;  %v2353_v54 = vld [vmem:[#allocation6 + $0x1e8] sm:$0xff] }
 0x46d   : > { %2199 = vmatpush.msrb.mxu0 %v2126_v9  ;;  %2219 = vmatpush.msrb.mxu1 %v2158_v55  ;;  %v2265_v9 = vld [vmem:[#allocation6 + $0x70] sm:$0xff] }
 0x46e   : > { %2303 = vmatpush.msrb.mxu3 %v2282_v50  ;;  %2283 = vmatpush.msrb.mxu2 %v2266_v47  ;;  %v2338_v55 = vld [vmem:[#allocation6 + $0x170] sm:$0xff]  ;;  %v2343_v47 = vld [vmem:[#allocation6 + $0x198] sm:$0xff] }
 0x46f   : > { %2200 = vmatpush.msrb.mxu0 %v2124_v56  ;;  %2220 = vmatpush.msrb.mxu1 %v2156_v57  ;;  %v2264_v56 = vld [vmem:[#allocation6 + $0x68] sm:$0xff]  ;;  %v2279_v57 = vld [vmem:[#allocation6 + $0xe0] sm:$0xff] }
 0x470   : > { %2304 = vmatpush.msrb.mxu3 %v2281_v51  ;;  %2284 = vmatpush.msrb.mxu2 %v2265_v9  ;;  %v2328_v51 = vld [vmem:[#allocation6 + $0x120] sm:$0xff] }
 0x471   : > { %2201 = vmatpush.msrb.mxu0 %v2122_v38  ;;  %2221 = vmatpush.msrb.mxu1 %v2154_v58  ;;  %v2352_v38 = vld [vmem:[#allocation6 + $0x1e0] sm:$0xff]  ;;  %v2337_v58 = vld [vmem:[#allocation6 + $0x168] sm:$0xff] }
 0x472   : > { %2305 = vmatpush.msrb.mxu3 %v2280_v52  ;;  %2285 = vmatpush.msrb.mxu2 %v2264_v56  ;;  %v2254_v52 = vld [vmem:[#allocation6 + $0x18] sm:$0xff]  ;;  %v2253_v56 = vld [vmem:[#allocation6 + $0x10] sm:$0xff] }
 0x473   : > { %3512 = vmatmul.msk.f32.vlgmr.msra.gmra.mxu0 %vm458_vm1, %v3510_v44  ;;  %3514 = vmatmul.msk.f32.vlgmr.msra.gmra.mxu1 %vm458_vm1, %v3510_v44  ;;  %v2263_v44 = vld [vmem:[#allocation6 + $0x60] sm:$0xff] }
 0x474   : > { %2202 = vmatpush.msrb.mxu0 %v2120_v60  ;;  %2222 = vmatpush.msrb.mxu1 %v2152_v61  ;;  %v2336_v60 = vld [vmem:[#allocation6 + $0x160] sm:$0xff]  ;;  %v2278_v61 = vld [vmem:[#allocation6 + $0xd8] sm:$0xff] }
 0x475   : > { %2306 = vmatpush.msrb.mxu3 %v2279_v57  ;;  %2286 = vmatpush.msrb.mxu2 %v2263_v44  ;;  %v2326_v57 = vld [vmem:[#allocation6 + $0x110] sm:$0xff]  ;;  %v2252_v44 = vld [vmem:[#allocation6 + $0x8] sm:$0xff] }
 0x476   : > { %2203 = vmatpush.msrb.mxu0 %v2118_v62  ;;  %2223 = vmatpush.msrb.mxu1 %v2150_v3  ;;  %v2351_v62 = vld [vmem:[#allocation6 + $0x1d8] sm:$0xff] }
 0x477   : > { %v2262_v3 = vld [vmem:[#allocation6 + $0x58] sm:$0xff]  ;;  %2307 = vmatpush.msrb.mxu3 %v2278_v61  ;;  %v2267_v61 = vld [vmem:[#allocation6 + $0x80] sm:$0xff] }
 0x478   : > { %2204 = vmatpush.msrb.mxu0 %v2116_v4  ;;  %2224 = vmatpush.msrb.mxu1 %v2148_v6  ;;  %v2335_v4 = vld [vmem:[#allocation6 + $0x158] sm:$0xff]  ;;  %v2277_v6 = vld [vmem:[#allocation6 + $0xd0] sm:$0xff] }
 0x479   : > { %2287 = vmatpush.msrb.mxu2 %v2262_v3  ;;  %2308 = vmatpush.msrb.mxu3 %v2277_v6  ;;  %v2428_v3 = vld [vmem:[#allocation6 + $0x2f8] sm:$0xff]  ;;  %v2251_v6 = vld [vmem:[#allocation6] sm:$0xff] }
 0x47a   : > { %2205 = vmatpush.msrb.mxu0 %v2114_v7  ;;  %2225 = vmatpush.msrb.mxu1 %v2146_v8  ;;  %v2350_v7 = vld [vmem:[#allocation6 + $0x1d0] sm:$0xff] }
 0x47b   : > { %v2261_v8 = vld [vmem:[#allocation6 + $0x50] sm:$0xff] }
 0x47c   : > { %2206 = vmatpush.msrb.mxu0 %v2112_v10  ;;  %2226 = vmatpush.msrb.mxu1 %v2144_v0  ;;  %v2334_v10 = vld [vmem:[#allocation6 + $0x150] sm:$0xff]  ;;  %v4106_v0 = vpop.f32.mrf.mxu0 }
 0x47d   : > { %2288 = vmatpush.msrb.mxu2 %v2261_v8  ;;  %v2427_v8 = vld [vmem:[#allocation6 + $0x2f0] sm:$0xff] }
 0x47e   : > { %2207 = vmatpush.msrb.mxu0 %v2110_v11  ;;  %2227 = vmatpush.msrb.mxu1 %v2142_v12  ;;  %v4108_v11 = vpop.f32.mrf.mxu1  ;;  %v2276_v12 = vld [vmem:[#allocation6 + $0xc8] sm:$0xff] }
 0x47f   : > { %2309 = vmatpush.msrb.mxu3 %v2276_v12  ;;  %v2412_v12 = vld [vmem:[#allocation6 + $0x278] sm:$0xff] }
 0x480   : > { %2208 = vmatpush.msrb.mxu0 %v2108_v13  ;;  %2228 = vmatpush.msrb.mxu1 %v2140_v14  ;;  %v2349_v13 = vld [vmem:[#allocation6 + $0x1c8] sm:$0xff] }
 0x481   : > { %v2260_v14 = vld [vmem:[#allocation6 + $0x48] sm:$0xff] }
 0x482   : > { %2209 = vmatpush.msrb.mxu0 %v2106_v63  ;;  %2229 = vmatpush.msrb.mxu1 %v2138_v16  ;;  %v2333_v63 = vld [vmem:[#allocation6 + $0x148] sm:$0xff]  ;;  %v2275_v16 = vld [vmem:[#allocation6 + $0xc0] sm:$0xff] }
 0x483   : > { %2289 = vmatpush.msrb.mxu2 %v2260_v14  ;;  %2310 = vmatpush.msrb.mxu3 %v2275_v16  ;;  %v2426_v14 = vld [vmem:[#allocation6 + $0x2e8] sm:$0xff]  ;;  %v2411_v16 = vld [vmem:[#allocation6 + $0x270] sm:$0xff] }
 0x484   : > { %2210 = vmatpush.msrb.mxu0 %v2104_v22  ;;  %2230 = vmatpush.msrb.mxu1 %v2136_v24  ;;  %v2332_v22 = vld [vmem:[#allocation6 + $0x140] sm:$0xff]  ;;  %v2274_v24 = vld [vmem:[#allocation6 + $0xb8] sm:$0xff] }
 0x485   : > { %2290 = vmatpush.msrb.mxu2 %v2259_v18  ;;  %2311 = vmatpush.msrb.mxu3 %v2274_v24  ;;  %v2425_v18 = vld [vmem:[#allocation6 + $0x2e0] sm:$0xff]  ;;  %v2410_v24 = vld [vmem:[#allocation6 + $0x268] sm:$0xff] }
 0x486   : > { %2211 = vmatpush.msrb.mxu0 %v2102_v28  ;;  %2231 = vmatpush.msrb.mxu1 %v2134_v29  ;;  %v2331_v28 = vld [vmem:[#allocation6 + $0x138] sm:$0xff]  ;;  %v2273_v29 = vld [vmem:[#allocation6 + $0xb0] sm:$0xff] }
 0x487   : > { %2291 = vmatpush.msrb.mxu2 %v2258_v27  ;;  %2312 = vmatpush.msrb.mxu3 %v2273_v29  ;;  %v2424_v27 = vld [vmem:[#allocation6 + $0x2d8] sm:$0xff]  ;;  %v2409_v29 = vld [vmem:[#allocation6 + $0x260] sm:$0xff] }
 0x488   : > { %2212 = vmatpush.msrb.mxu0 %v2100_v31  ;;  %2232 = vmatpush.msrb.mxu1 %v2132_v20  ;;  %v2330_v31 = vld [vmem:[#allocation6 + $0x130] sm:$0xff] }
 0x489   : > { %2292 = vmatpush.msrb.mxu2 %v2257_v30  ;;  %2313 = vmatpush.msrb.mxu3 %v2272_v36  ;;  %v2423_v30 = vld [vmem:[#allocation6 + $0x2d0] sm:$0xff]  ;;  %v2408_v36 = vld [vmem:[#allocation6 + $0x258] sm:$0xff] }
 0x48a   : > { %2213 = vmatpush.msrb.mxu0 %v2098_v37  ;;  %2233 = vmatpush.msrb.mxu1 %v2130_v39  ;;  %v2345_v37 = vld [vmem:[#allocation6 + $0x1a8] sm:$0xff] }
 0x48b   : > { %2293 = vmatpush.msrb.mxu2 %v2256_v40  ;;  %v2494_v40 = vld [vmem:[#allocation6 + $0x3c0] sm:$0xff] }
 0x48c   : > { %2214 = vmatpush.msrb.mxu0 %v2096_v43  ;;  %2234 = vmatpush.msrb.mxu1 %v2128_v49  ;;  %v2271_v43 = vld [vmem:[#allocation6 + $0xa0] sm:$0xff] }
 0x48d   : > { %v2344_v49 = vld [vmem:[#allocation6 + $0x1a0] sm:$0xff]  ;;  %2314 = vmatpush.msrb.mxu3 %v2271_v43  ;;  %v2420_v43 = vld [vmem:[#allocation6 + $0x2b8] sm:$0xff] }
 0x48e   : > { %2376 = vmatpush.msra.mxu1 %v2355_v42  ;;  %2356 = vmatpush.msra.mxu0 %v2339_v53  ;;  %v2255_v42 = vld [vmem:[#allocation6 + $0x20] sm:$0xff]  ;;  %v2327_v53 = vld [vmem:[#allocation6 + $0x118] sm:$0xff] }
 0x48f   : > { %2294 = vmatpush.msrb.mxu2 %v2255_v42  ;;  %v2493_v42 = vld [vmem:[#allocation6 + $0x3b8] sm:$0xff] }
 0x490   : > { %2377 = vmatpush.msra.mxu1 %v2354_v19  ;;  %2357 = vmatpush.msra.mxu0 %v2338_v55  ;;  %v2270_v19 = vld [vmem:[#allocation6 + $0x98] sm:$0xff]  ;;  %v2342_v55 = vld [vmem:[#allocation6 + $0x190] sm:$0xff] }
 0x491   : > { %2315 = vmatpush.msrb.mxu3 %v2270_v19  ;;  %2295 = vmatpush.msrb.mxu2 %v2254_v52  ;;  %v2419_v19 = vld [vmem:[#allocation6 + $0x2b0] sm:$0xff] }
 0x492   : > { %2378 = vmatpush.msra.mxu1 %v2353_v54  ;;  %2358 = vmatpush.msra.mxu0 %v2337_v58  ;;  %v2341_v58 = vld [vmem:[#allocation6 + $0x188] sm:$0xff]  ;;  %v2492_v52 = vld [vmem:[#allocation6 + $0x3b0] sm:$0xff] }
 0x493   : > { %2296 = vmatpush.msrb.mxu2 %v2253_v56  ;;  %v2417_v56 = vld [vmem:[#allocation6 + $0x2a0] sm:$0xff] }
 0x494   : > { %2379 = vmatpush.msra.mxu1 %v2352_v38  ;;  %2359 = vmatpush.msra.mxu0 %v2336_v60  ;;  %v2268_v38 = vld [vmem:[#allocation6 + $0x88] sm:$0xff] }
 0x495   : > { %v2325_v60 = vld [vmem:[#allocation6 + $0x108] sm:$0xff]  ;;  %2297 = vmatpush.msrb.mxu2 %v2252_v44  ;;  %v2416_v44 = vld [vmem:[#allocation6 + $0x298] sm:$0xff] }
 0x496   : > { %2380 = vmatpush.msra.mxu1 %v2351_v62  ;;  %2360 = vmatpush.msra.mxu0 %v2335_v4  ;;  %v2340_v62 = vld [vmem:[#allocation6 + $0x180] sm:$0xff]  ;;  %v2501_v4 = vld [vmem:[#allocation6 + $0x3f8] sm:$0xff] }
 0x497   : > { %2298 = vmatpush.msrb.mxu2 %v2251_v6  ;;  %v2488_v6 = vld [vmem:[#allocation6 + $0x390] sm:$0xff] }
 0x498   : > { %2381 = vmatpush.msra.mxu1 %v2350_v7  ;;  %2361 = vmatpush.msra.mxu0 %v2334_v10  ;;  %v2324_v7 = vld [vmem:[#allocation6 + $0x100] sm:$0xff]  ;;  %v2500_v10 = vld [vmem:[#allocation6 + $0x3f0] sm:$0xff] }
 0x49a   : > { %2382 = vmatpush.msra.mxu1 %v2349_v13  ;;  %2362 = vmatpush.msra.mxu0 %v2333_v63  ;;  %v2485_v13 = vld [vmem:[#allocation6 + $0x378] sm:$0xff]  ;;  %v2499_v63 = vld [vmem:[#allocation6 + $0x3e8] sm:$0xff] }
 0x49c   : > { %2383 = vmatpush.msra.mxu1 %v2348_v17  ;;  %2363 = vmatpush.msra.mxu0 %v2332_v22  ;;  %v2484_v17 = vld [vmem:[#allocation6 + $0x370] sm:$0xff]  ;;  %v2498_v22 = vld [vmem:[#allocation6 + $0x3e0] sm:$0xff] }
 0x49e   : > { %2384 = vmatpush.msra.mxu1 %v2347_v25  ;;  %2364 = vmatpush.msra.mxu0 %v2331_v28  ;;  %v2483_v25 = vld [vmem:[#allocation6 + $0x368] sm:$0xff]  ;;  %v2497_v28 = vld [vmem:[#allocation6 + $0x3d8] sm:$0xff] }
 0x4a0   : > { %2385 = vmatpush.msra.mxu1 %v2346_v2  ;;  %2365 = vmatpush.msra.mxu0 %v2330_v31  ;;  %v2482_v2 = vld [vmem:[#allocation6 + $0x360] sm:$0xff]  ;;  %v2496_v31 = vld [vmem:[#allocation6 + $0x3d0] sm:$0xff] }
 0x4a2   : > { %2386 = vmatpush.msra.mxu1 %v2345_v37  ;;  %2366 = vmatpush.msra.mxu0 %v2329_v41  ;;  %v2421_v37 = vld [vmem:[#allocation6 + $0x2c0] sm:$0xff]  ;;  %v2407_v41 = vld [vmem:[#allocation6 + $0x250] sm:$0xff] }
 0x4a4   : > { %2387 = vmatpush.msra.mxu1 %v2344_v49  ;;  %2367 = vmatpush.msra.mxu0 %v2328_v51  ;;  %v2480_v49 = vld [vmem:[#allocation6 + $0x350] sm:$0xff]  ;;  %v2406_v51 = vld [vmem:[#allocation6 + $0x248] sm:$0xff] }
 0x4a6   : > { %2388 = vmatpush.msra.mxu1 %v2343_v47  ;;  %2368 = vmatpush.msra.mxu0 %v2327_v53  ;;  %v2479_v47 = vld [vmem:[#allocation6 + $0x348] sm:$0xff]  ;;  %v2405_v53 = vld [vmem:[#allocation6 + $0x240] sm:$0xff] }
 0x4a8   : > { %2389 = vmatpush.msra.mxu1 %v2342_v55  ;;  %2369 = vmatpush.msra.mxu0 %v2326_v57  ;;  %v2404_v55 = vld [vmem:[#allocation6 + $0x238] sm:$0xff] }
 0x4a9   : > { %v2477_v57 = vld [vmem:[#allocation6 + $0x338] sm:$0xff] }
 0x4aa   : > { %2390 = vmatpush.msra.mxu1 %v2341_v58  ;;  %2370 = vmatpush.msra.mxu0 %v2325_v60  ;;  %v2403_v58 = vld [vmem:[#allocation6 + $0x230] sm:$0xff] }
 0x4ab   : > { %v2476_v60 = vld [vmem:[#allocation6 + $0x330] sm:$0xff] }
 0x4ac   : > { %2391 = vmatpush.msra.mxu1 %v2340_v62  ;;  %2371 = vmatpush.msra.mxu0 %v2324_v7  ;;  %v2402_v62 = vld [vmem:[#allocation6 + $0x228] sm:$0xff]  ;;  %v766_v7 = vadd.f32 %v4030_v23, %v4028_v46  ;;  %v1043_v46 = vadd.f32 %v4050_v59, %v4048_v45  ;;  %v2399_v23 = vld [vmem:[#allocation6 + $0x210] sm:$0xff]  ;;  %v1441_v45 = vadd.f32 %v4082_v34, %v4080_v21  ;;  %v2397_v59 = vld [vmem:[#allocation6 + $0x200] sm:$0xff] }
 0x4e8   : > { %v1977_v20 = vpop.f32.mrf.mxu0  ;;  %v1997_v35 = vpop.f32.mrf.mxu1 }
 0x4e9   : > { %v1998_v39 = vadd.f32 %v1997_v35, %v1977_v20  ;;  %v2422_v20 = vld [vmem:[#allocation6 + $0x2c8] sm:$0xff] }
 0x4ea   : > { %v2495_v35 = vld [vmem:[#allocation6 + $0x3c8] sm:$0xff] }
 0x4eb   : > { %v4111_v50 = vadd.f32 %v1998_v39, %v4099_v5  ;;  %v2269_v5 = vld [vmem:[#allocation6 + $0x90] sm:$0xff]  ;;  %v2481_v39 = vld [vmem:[#allocation6 + $0x358] sm:$0xff] }
 0x4ec   : > { %2316 = vmatpush.msrb.mxu3 %v2269_v5  ;;  %v2491_v5 = vld [vmem:[#allocation6 + $0x3a8] sm:$0xff] }
 0x4ee   : > { %2317 = vmatpush.msrb.mxu3 %v2268_v38  ;;  %v2490_v38 = vld [vmem:[#allocation6 + $0x3a0] sm:$0xff] }
 0x4f0   : > { %v2071_v54 = vpop.f32.mrf.mxu0  ;;  %v2091_v9 = vpop.f32.mrf.mxu1  ;;  %2318 = vmatpush.msrb.mxu3 %v2267_v61  ;;  %v2489_v61 = vld [vmem:[#allocation6 + $0x398] sm:$0xff] }
 0x4f1   : > { %2175 = vmatmul.f32.vlgmr.msra.gmra.mxu2 %v2071_v54  ;;  %2195 = vmatmul.f32.vlgmr.msra.gmra.mxu3 %v2091_v9 }
 0x4f2   : > { %2215 = vmatmul.f32.vlgmr.msrb.gmra.mxu0 %v2071_v54  ;;  %2235 = vmatmul.f32.vlgmr.msrb.gmra.mxu1 %v2091_v9  ;;  %v2418_v54 = vld [vmem:[#allocation6 + $0x2a8] sm:$0xff]  ;;  %v2478_v9 = vld [vmem:[#allocation6 + $0x340] sm:$0xff] }
 0x4f3   : > { %2449 = vmatpush.msra.mxu3 %v2428_v3  ;;  %2522 = vmatpush.msrb.mxu1 %v2501_v4  ;;  %v2415_v3 = vld [vmem:[#allocation6 + $0x290] sm:$0xff]  ;;  %v2475_v4 = vld [vmem:[#allocation6 + $0x328] sm:$0xff] }
 0x4f4   : > { %2429 = vmatpush.msra.mxu2 %v2412_v12  ;;  %2502 = vmatpush.msrb.mxu0 %v2485_v13  ;;  %v2474_v12 = vld [vmem:[#allocation6 + $0x320] sm:$0xff]  ;;  %v2487_v13 = vld [vmem:[#allocation6 + $0x388] sm:$0xff] }
 0x4f5   : > { %2450 = vmatpush.msra.mxu3 %v2427_v8  ;;  %2523 = vmatpush.msrb.mxu1 %v2500_v10  ;;  %v2401_v8 = vld [vmem:[#allocation6 + $0x220] sm:$0xff]  ;;  %v2414_v10 = vld [vmem:[#allocation6 + $0x288] sm:$0xff] }
 0x4f6   : > { %2430 = vmatpush.msra.mxu2 %v2411_v16  ;;  %2503 = vmatpush.msrb.mxu0 %v2484_v17  ;;  %v2413_v16 = vld [vmem:[#allocation6 + $0x280] sm:$0xff]  ;;  %v2473_v17 = vld [vmem:[#allocation6 + $0x318] sm:$0xff] }
 0x4f7   : > { %2451 = vmatpush.msra.mxu3 %v2426_v14  ;;  %2524 = vmatpush.msrb.mxu1 %v2499_v63  ;;  %v826_v14 = vadd.f32 %v4032_v26, %v766_v7  ;;  %v2400_v63 = vld [vmem:[#allocation6 + $0x218] sm:$0xff]  ;;  %v1242_v26 = vadd.f32 %v4066_v15, %v4064_v1  ;;  %v2037_v1 = vpop.f32.mrf.mxu3 }
 0x4f8   : > { %2431 = vmatpush.msra.mxu2 %v2410_v24  ;;  %2504 = vmatpush.msrb.mxu0 %v2483_v25  ;;  %v2398_v25 = vld [vmem:[#allocation6 + $0x208] sm:$0xff] }
 0x4f9   : > { %2452 = vmatpush.msra.mxu3 %v2425_v18  ;;  %2525 = vmatpush.msrb.mxu1 %v2498_v22  ;;  %v2486_v18 = vld [vmem:[#allocation6 + $0x380] sm:$0xff]  ;;  %v2472_v22 = vld [vmem:[#allocation6 + $0x310] sm:$0xff]  ;;  %v846_v24 = vadd.f32 %v4034_v48, %v826_v14  ;;  %v1640_v48 = vadd.f32 %v4096_v33, %v4094_v32  ;;  %v2584_v14 = vld [vmem:[#allocation7 + $0x38] sm:$0xff] }
 0x4fa   : > { %2432 = vmatpush.msra.mxu2 %v2409_v29  ;;  %2505 = vmatpush.msrb.mxu0 %v2482_v2  ;;  %v2470_v29 = vld [vmem:[#allocation6 + $0x300] sm:$0xff] }
 0x4fb   : > { %2453 = vmatpush.msra.mxu3 %v2424_v27  ;;  %2526 = vmatpush.msrb.mxu1 %v2497_v28  ;;  %v2471_v27 = vld [vmem:[#allocation6 + $0x308] sm:$0xff]  ;;  %v1046_v28 = vadd.f32 %v1043_v46, %v846_v24  ;;  %v3537_v24 = vld [vmem:[%s4277_s6 + $0x40] sm:$0xff] }
 0x4fc   : > { %2433 = vmatpush.msra.mxu2 %v2408_v36  ;;  %2506 = vmatpush.msrb.mxu0 %v2481_v39  ;;  %v3518_v46 = vld [vmem:[%s4277_s6 + $0x18] sm:$0xff] }
 0x4fd   : > { %2454 = vmatpush.msra.mxu3 %v2423_v30  ;;  %2527 = vmatpush.msrb.mxu1 %v2496_v31  ;;  %v1245_v2 = vadd.f32 %v1242_v26, %v1046_v28  ;;  %v2017_v30 = vpop.f32.mrf.mxu2  ;;  %v1839_v31 = vadd.f32 %v4108_v11, %v4106_v0  ;;  %v2580_v26 = vld [vmem:[#allocation7 + $0x18] sm:$0xff] }
 0x4fe   : > { %2434 = vmatpush.msra.mxu2 %v2407_v41  ;;  %2507 = vmatpush.msrb.mxu0 %v2480_v49  ;;  %v2245_v41 = vpop.permute.xlu0 %2244  ;;  %v2725_v28 = vld [vmem:[#allocation7 + $0xb8] sm:$0xff] }
 0x4ff   : > { %2455 = vmatpush.msra.mxu3 %v2422_v20  ;;  %2528 = vmatpush.msrb.mxu1 %v2495_v35  ;;  %v1444_v15 = vadd.f32 %v1441_v45, %v1245_v2  ;;  %v2038_v35 = vadd.f32 %v2037_v1, %v2017_v30  ;;  %v2724_v45 = vld [vmem:[#allocation7 + $0xb0] sm:$0xff]  ;;  %v2722_v2 = vld [vmem:[#allocation7 + $0xa0] sm:$0xff] }
 0x500   : > { %2435 = vmatpush.msra.mxu2 %v2406_v51  ;;  %2508 = vmatpush.msrb.mxu0 %v2479_v47  ;;  %v2624_v47 = vld [vmem:[#allocation7 + $0x70] sm:$0xff]  ;;  %v3538_v1 = vld [vmem:[%s4277_s6 + $0x48] sm:$0xff] }
 0x501   : > { %2456 = vmatpush.msra.mxu3 %v2421_v37  ;;  %2529 = vmatpush.msrb.mxu1 %v2494_v40  ;;  %v1643_v20 = vadd.f32 %v1640_v48, %v1444_v15  ;;  %v2721_v48 = vld [vmem:[#allocation7 + $0x98] sm:$0xff]  ;;  %v2720_v30 = vld [vmem:[#allocation7 + $0x90] sm:$0xff]  ;;  %v2719_v15 = vld [vmem:[#allocation7 + $0x88] sm:$0xff] }
 0x502   : > { %2436 = vmatpush.msra.mxu2 %v2405_v53  ;;  %2509 = vmatpush.msrb.mxu0 %v2478_v9  ;;  %v2622_v53 = vld [vmem:[#allocation7 + $0x60] sm:$0xff]  ;;  %v2619_v9 = vld [vmem:[#allocation7 + $0x48] sm:$0xff] }
 0x503   : > { %2457 = vmatpush.msra.mxu3 %v2420_v43  ;;  %2530 = vmatpush.msrb.mxu1 %v2493_v42  ;;  %v1842_v21 = vadd.f32 %v1839_v31, %v1643_v20  ;;  %v2718_v31 = vld [vmem:[#allocation7 + $0x80] sm:$0xff]  ;;  %v3549_v20 = vld [vmem:[%s4277_s6 + $0x60] sm:$0xff] }
 0x504   : > { %2437 = vmatpush.msra.mxu2 %v2404_v55  ;;  %2510 = vmatpush.msrb.mxu0 %v2477_v57 }
 0x505   : > { %2458 = vmatpush.msra.mxu3 %v2419_v19  ;;  %2531 = vmatpush.msrb.mxu1 %v2492_v52  ;;  %v2041_v37 = vadd.f32 %v2038_v35, %v1842_v21  ;;  %v2625_v19 = vld [vmem:[#allocation7 + $0x78] sm:$0xff]  ;;  %v2623_v52 = vld [vmem:[#allocation7 + $0x68] sm:$0xff] }
 0x506   : > { %2438 = vmatpush.msra.mxu2 %v2403_v58  ;;  %2511 = vmatpush.msrb.mxu0 %v2476_v60  ;;  %v3550_v35 = vld [vmem:[%s4277_s6 + $0x68] sm:$0xff] }
 0x507   : > { %2459 = vmatpush.msra.mxu3 %v2418_v54  ;;  %2532 = vmatpush.msrb.mxu1 %v2491_v5  ;;  %v2621_v54 = vld [vmem:[#allocation7 + $0x58] sm:$0xff]  ;;  %v2618_v5 = vld [vmem:[#allocation7 + $0x40] sm:$0xff] }
 0x508   : > { %2439 = vmatpush.msra.mxu2 %v2402_v62  ;;  %2512 = vmatpush.msrb.mxu0 %v2475_v4 }
 0x509   : > { %2460 = vmatpush.msra.mxu3 %v2417_v56  ;;  %2533 = vmatpush.msrb.mxu1 %v2490_v38 }
 0x50a   : > { %2440 = vmatpush.msra.mxu2 %v2401_v8  ;;  %2513 = vmatpush.msrb.mxu0 %v2474_v12  ;;  %v2545_v12 = vld [vmem:[%s4277_s6] sm:$0xff] }
 0x50b   : > { %2461 = vmatpush.msra.mxu3 %v2416_v44  ;;  %2534 = vmatpush.msrb.mxu1 %v2489_v61 }
 0x50c   : > { %2441 = vmatpush.msra.mxu2 %v2400_v63  ;;  %2514 = vmatpush.msrb.mxu0 %v2473_v17  ;;  %v2583_v63 = vld [vmem:[#allocation7 + $0x30] sm:$0xff]  ;;  %v2546_v17 = vld [vmem:[%s4277_s6 + $0x8] sm:$0xff] }
 0x50d   : > { %2462 = vmatpush.msra.mxu3 %v2415_v3  ;;  %2535 = vmatpush.msrb.mxu1 %v2488_v6 }
 0x50e   : > { %2442 = vmatpush.msra.mxu2 %v2399_v23  ;;  %2515 = vmatpush.msrb.mxu0 %v2472_v22  ;;  %v3525_v23 = vld [vmem:[%s4277_s6 + $0x20] sm:$0xff]  ;;  %v3526_v22 = vld [vmem:[%s4277_s6 + $0x28] sm:$0xff] }
 0x50f   : > { %2463 = vmatpush.msra.mxu3 %v2414_v10  ;;  %2536 = vmatpush.msrb.mxu1 %v2487_v13  ;;  %v3517_v13 = vld [vmem:[%s4277_s6 + $0x10] sm:$0xff] }
 0x510   : > { %2443 = vmatpush.msra.mxu2 %v2398_v25  ;;  %2516 = vmatpush.msrb.mxu0 %v2471_v27  ;;  %v2579_v25 = vld [vmem:[#allocation7 + $0x10] sm:$0xff]  ;;  %v2578_v27 = vld [vmem:[#allocation7 + $0x8] sm:$0xff] }
 0x511   : > { %2464 = vmatpush.msra.mxu3 %v2413_v16  ;;  %2537 = vmatpush.msrb.mxu1 %v2486_v18  ;;  %v2582_v16 = vld [vmem:[#allocation7 + $0x28] sm:$0xff]  ;;  %v2581_v18 = vld [vmem:[#allocation7 + $0x20] sm:$0xff] }
 0x512   : > { %2444 = vmatpush.msra.mxu2 %v2397_v59  ;;  %2517 = vmatpush.msrb.mxu0 %v2470_v29  ;;  %v2577_v59 = vld [vmem:[#allocation7] sm:$0xff]  ;;  %v2723_v29 = vld [vmem:[#allocation7 + $0xa8] sm:$0xff] }
 0x56f   : > { %v2216_v34 = vpop.f32.mrf.mxu0  ;;  %v2236_v36 = vpop.f32.mrf.mxu1 }
 0x570   : > { %v2237_v39 = vadd.f32 %v2236_v36, %v2216_v34  ;;  %v3561_v36 = vld [vmem:[%s4277_s6 + $0x80] sm:$0xff] }
 0x572   : > { %v2240_v40 = vadd.f32 %v2237_v39, %v2041_v37 }
 0x574   : > { %v2248_v43 = vadd.f32 %v2245_v41, %v2240_v40  ;;  %v2176_v32 = vpop.f32.mrf.mxu2  ;;  %v2196_v33 = vpop.f32.mrf.mxu3  ;;  %v3562_v40 = vld [vmem:[%s4277_s6 + $0x88] sm:$0xff] }
 0x575   : > { %v2197_v49 = vadd.f32 %v2196_v33, %v2176_v32  ;;  %v3532_v32 = vld [vmem:[%s4277_s6 + $0x38] sm:$0xff] }
 0x576   : > { %v2250_v42 = vmax.f32 %v2248_v43, 0.0 }
 0x577   : > { %v2239_v51 = vadd.f32 %v2197_v49, %v4111_v50  ;;  %v2620_v50 = vld [vmem:[#allocation7 + $0x50] sm:$0xff]  ;;  %v2869_v49 = vld [vmem:[#allocation7 + $0x138] sm:$0xff] }
 0x578   : > { %2319 = vmatmul.f32.vlgmr.msrb.gmra.mxu3 %v2250_v42  ;;  %2392 = vmatmul.f32.vlgmr.msra.gmra.mxu1 %v2250_v42 }
 0x579   : > { %v2247_v0 = vadd.f32 %v2245_v41, %v2239_v51  ;;  %2670 = vmatpush.msra.mxu1 %v2584_v14  ;;  %v3531_v41 = vld [vmem:[%s4277_s6 + $0x30] sm:$0xff]  ;;  %v3544_v51 = vld [vmem:[%s4277_s6 + $0x58] sm:$0xff] }
 0x57a   : > { %v2938_v14 = vld [vmem:[#allocation7 + $0x160] sm:$0xff] }
 0x57b   : > { %v2249_v11 = vmax.f32 %v2247_v0, 0.0  ;;  %2671 = vmatpush.msra.mxu1 %v2583_v63  ;;  %v3555_v0 = vld [vmem:[%s4277_s6 + $0x70] sm:$0xff]  ;;  %v3008_v63 = vld [vmem:[#allocation7 + $0x190] sm:$0xff] }
 0x57d   : > { %2299 = vmatmul.f32.vlgmr.msrb.gmra.mxu2 %v2249_v11  ;;  %2372 = vmatmul.f32.vlgmr.msra.gmra.mxu0 %v2249_v11 }
 0x57e   : > { %2641 = vmatpush.msra.mxu0 %v2625_v19  ;;  %2672 = vmatpush.msra.mxu1 %v2582_v16  ;;  %v2868_v19 = vld [vmem:[#allocation7 + $0x130] sm:$0xff]  ;;  %v2937_v16 = vld [vmem:[#allocation7 + $0x158] sm:$0xff] }
 0x580   : > { %2465 = vmatmul.f32.vlgmr.msra.gmra.mxu3 %v2250_v42  ;;  %2538 = vmatmul.f32.vlgmr.msrb.gmra.mxu1 %v2250_v42  ;;  %v3543_v42 = vld [vmem:[%s4277_s6 + $0x50] sm:$0xff] }
 0x581   : > { %2642 = vmatpush.msra.mxu0 %v2624_v47  ;;  %2673 = vmatpush.msra.mxu1 %v2581_v18  ;;  %v2797_v47 = vld [vmem:[#allocation7 + $0xf8] sm:$0xff] }
 0x583   : > { %2643 = vmatpush.msra.mxu0 %v2623_v52  ;;  %2674 = vmatpush.msra.mxu1 %v2580_v26  ;;  %v2867_v52 = vld [vmem:[#allocation7 + $0x128] sm:$0xff] }
 0x585   : > { %2445 = vmatmul.f32.vlgmr.msra.gmra.mxu2 %v2249_v11  ;;  %2518 = vmatmul.f32.vlgmr.msrb.gmra.mxu0 %v2249_v11  ;;  %v3556_v11 = vld [vmem:[%s4277_s6 + $0x78] sm:$0xff] }
 0x586   : > { %2644 = vmatpush.msra.mxu0 %v2622_v53  ;;  %2675 = vmatpush.msra.mxu1 %v2579_v25  ;;  %v2796_v53 = vld [vmem:[#allocation7 + $0xf0] sm:$0xff]  ;;  %v2934_v25 = vld [vmem:[#allocation7 + $0x140] sm:$0xff] }
 0x588   : > { %2645 = vmatpush.msra.mxu0 %v2621_v54  ;;  %2676 = vmatpush.msra.mxu1 %v2578_v27  ;;  %v2866_v54 = vld [vmem:[#allocation7 + $0x120] sm:$0xff]  ;;  %v3156_v27 = vld [vmem:[#allocation7 + $0x230] sm:$0xff] }
 0x58a   : > { %2646 = vmatpush.msra.mxu0 %v2620_v50  ;;  %2677 = vmatpush.msra.mxu1 %v2577_v59  ;;  %v2795_v50 = vld [vmem:[#allocation7 + $0xe8] sm:$0xff]  ;;  %v3154_v59 = vld [vmem:[#allocation7 + $0x220] sm:$0xff] }
 0x58c   : > { %2647 = vmatpush.msra.mxu0 %v2619_v9  ;;  %2812 = vmatpush.msrb.mxu1 %v2797_v47  ;;  %v2865_v9 = vld [vmem:[#allocation7 + $0x118] sm:$0xff] }
 0x58e   : > { %2648 = vmatpush.msra.mxu0 %v2618_v5  ;;  %2813 = vmatpush.msrb.mxu1 %v2796_v53  ;;  %v2794_v5 = vld [vmem:[#allocation7 + $0xe0] sm:$0xff] }
 0x590   : > { %2814 = vmatpush.msrb.mxu1 %v2795_v50  ;;  %v3250_v50 = vld [vmem:[#allocation9 + $0x78] sm:$0xff] }
 0x592   : > { %2815 = vmatpush.msrb.mxu1 %v2794_v5  ;;  %v3314_v5 = vld [vmem:[#allocation9 + $0xf8] sm:$0xff] }
 0x5f5   : > { %v2393_v56 = vpop.f32.mrf.mxu1 }
 0x5fa   : > { %v2373_v55 = vpop.f32.mrf.mxu0 }
 0x5fb   : > { %v2320_v57 = vpop.f32.mrf.mxu3  ;;  %v2394_v3 = vadd.f32 %v2393_v56, %v2373_v55  ;;  %v2864_v55 = vld [vmem:[#allocation7 + $0x110] sm:$0xff]  ;;  %v2793_v56 = vld [vmem:[#allocation7 + $0xd8] sm:$0xff] }
 0x5fc   : > { %2816 = vmatpush.msrb.mxu1 %v2793_v56  ;;  %v3249_v56 = vld [vmem:[#allocation9 + $0x70] sm:$0xff] }
 0x5fd   : > { %v2539_v44 = vpop.f32.mrf.mxu1 }
 0x600   : > { %v2300_v38 = vpop.f32.mrf.mxu2 }
 0x601   : > { %v2321_v60 = vadd.f32 %v2320_v57, %v2300_v38  ;;  %v2863_v38 = vld [vmem:[#allocation7 + $0x108] sm:$0xff] }
 0x602   : > { %v2519_v58 = vpop.f32.mrf.mxu0 }
 0x603   : > { %v2466_v61 = vpop.f32.mrf.mxu3  ;;  %v2540_v4 = vadd.f32 %v2539_v44, %v2519_v58  ;;  %v2542_v7 = vmax.f32 %v2321_v60, %v2394_v3  ;;  %v2792_v58 = vld [vmem:[#allocation7 + $0xd0] sm:$0xff]  ;;  %v2862_v44 = vld [vmem:[#allocation7 + $0x100] sm:$0xff]  ;;  %v2791_v60 = vld [vmem:[#allocation7 + $0xc8] sm:$0xff] }
 0x604   : > { %2817 = vmatpush.msrb.mxu1 %v2792_v58  ;;  %v3012_v3 = vld [vmem:[#allocation7 + $0x1b0] sm:$0xff]  ;;  %v3210_v58 = vld [vmem:[#allocation9 + $0x28] sm:$0xff] }
 0x606   : > { %2818 = vmatpush.msrb.mxu1 %v2791_v60  ;;  %v3280_v60 = vld [vmem:[#allocation9 + $0xa8] sm:$0xff] }
 0x608   : > { %v2446_v62 = vpop.f32.mrf.mxu2 }
 0x609   : > { %v2467_v6 = vadd.f32 %v2466_v61, %v2446_v62  ;;  %v3013_v61 = vld [vmem:[#allocation7 + $0x1b8] sm:$0xff]  ;;  %v2790_v62 = vld [vmem:[#allocation7 + $0xc0] sm:$0xff] }
 0x60a   : > { %2819 = vmatpush.msrb.mxu1 %v2790_v62 }
 0x60b   : > { %v2543_v8 = vmax.f32 %v2467_v6, %v2540_v4  ;;  %v2941_v4 = vld [vmem:[#allocation7 + $0x178] sm:$0xff]  ;;  %v3011_v6 = vld [vmem:[#allocation7 + $0x1a8] sm:$0xff] }
 0x60d   : > { %v4128_v10 = vmax.f32 %v2542_v7, %v2543_v8  ;;  %v2940_v8 = vld [vmem:[#allocation7 + $0x170] sm:$0xff] }
 0x60f   : > { %2569 = vmatpush.msrb.mxu2 %v4128_v10  ;;  %2609 = vmatpush.msrb.mxu3 %v4128_v10 }
 0x610   : > { %2781 = vmatpush.msrb.mxu0 %v4128_v10  ;;  %3515 = vmatmul.msk.f32.vlgmr.msrb.gmra.mxu2 %vm2547_vm2, %v2545_v12  ;;  %v2939_v12 = vld [vmem:[#allocation7 + $0x168] sm:$0xff] }
 0x611   : > { %3519 = vmatmul.msk.f32.vlgmr.msrb.gmra.mxu3 %vm2547_vm2, %v3517_v13  ;;  %2709 = vmatpush.msra.mxu2 %v4128_v10  ;;  %v3009_v13 = vld [vmem:[#allocation7 + $0x198] sm:$0xff] }
 0x612   : > { %2740 = vmatpush.msra.mxu3 %v2725_v28  ;;  %v3155_v28 = vld [vmem:[#allocation7 + $0x228] sm:$0xff] }
 0x613   : > { %2853 = vmatpush.msrb.mxu2 %v4128_v10 }
 0x614   : > { %2741 = vmatpush.msra.mxu3 %v2724_v45 }
 0x616   : > { %2742 = vmatpush.msra.mxu3 %v2723_v29  ;;  %v3153_v29 = vld [vmem:[#allocation7 + $0x218] sm:$0xff] }
 0x618   : > { %3516 = vmatmul.msk.f32.gmra.mxu2 %vm2547_vm2, %v2546_v17  ;;  %2743 = vmatpush.msra.mxu3 %v2722_v2  ;;  %v3007_v17 = vld [vmem:[#allocation7 + $0x188] sm:$0xff] }
 0x619   : > { %3520 = vmatmul.msk.f32.gmra.mxu3 %vm2547_vm2, %v3518_v46  ;;  %v2936_v46 = vld [vmem:[#allocation7 + $0x150] sm:$0xff] }
 0x61a   : > { %2744 = vmatpush.msra.mxu3 %v2721_v48  ;;  %v3152_v48 = vld [vmem:[#allocation7 + $0x210] sm:$0xff] }
 0x61c   : > { %2745 = vmatpush.msra.mxu3 %v2720_v30  ;;  %v3151_v30 = vld [vmem:[#allocation7 + $0x208] sm:$0xff] }
 0x61e   : > { %2746 = vmatpush.msra.mxu3 %v2719_v15  ;;  %v3150_v15 = vld [vmem:[#allocation7 + $0x200] sm:$0xff] }
 0x620   : > { %3527 = vmatmul.msk.f32.vlgmr.msra.gmra.mxu2 %vm2547_vm2, %v3525_v23  ;;  %2747 = vmatpush.msra.mxu3 %v2718_v31  ;;  %v3006_v23 = vld [vmem:[#allocation7 + $0x180] sm:$0xff]  ;;  %v3085_v31 = vld [vmem:[#allocation7 + $0x1f8] sm:$0xff] }
 0x621   : > { %2997 = vmatpush.msra.mxu2 %v4128_v10 }
 0x622   : > { %2884 = vmatpush.msrb.mxu3 %v2869_v49 }
 0x624   : > { %2885 = vmatpush.msrb.mxu3 %v2868_v19 }
 0x626   : > { %2886 = vmatpush.msrb.mxu3 %v2867_v52 }
 0x628   : > { %3528 = vmatmul.msk.f32.gmra.mxu2 %vm2547_vm2, %v3526_v22  ;;  %2887 = vmatpush.msrb.mxu3 %v2866_v54  ;;  %v2935_v22 = vld [vmem:[#allocation7 + $0x148] sm:$0xff]  ;;  %v3212_v54 = vld [vmem:[#allocation9 + $0x38] sm:$0xff] }
 0x62a   : > { %2888 = vmatpush.msrb.mxu3 %v2865_v9  ;;  %v3282_v9 = vld [vmem:[#allocation9 + $0xb8] sm:$0xff] }
 0x62c   : > { %2889 = vmatpush.msrb.mxu3 %v2864_v55  ;;  %v3211_v55 = vld [vmem:[#allocation9 + $0x30] sm:$0xff] }
 0x62e   : > { %2890 = vmatpush.msrb.mxu3 %v2863_v38  ;;  %v3313_v38 = vld [vmem:[#allocation9 + $0xf0] sm:$0xff] }
 0x630   : > { %3539 = vmatmul.msk.f32.vlgmr.msrb.gmra.mxu2 %vm2547_vm2, %v3537_v24  ;;  %2891 = vmatpush.msrb.mxu3 %v2862_v44  ;;  %v3157_v24 = vld [vmem:[#allocation7 + $0x238] sm:$0xff]  ;;  %v3248_v44 = vld [vmem:[#allocation9 + $0x68] sm:$0xff] }
 0x631   : > { %3141 = vmatpush.msrb.mxu2 %v4128_v10 }
 0x638   : > { %3540 = vmatmul.msk.f32.gmra.mxu2 %vm2547_vm2, %v3538_v1 }
 0x640   : > { %3551 = vmatmul.msk.f32.vlgmr.msra.gmra.mxu2 %vm2547_vm2, %v3549_v20 }
 0x641   : > { %3291 = vmatpush.msra.mxu2 %v3282_v9 }
 0x648   : > { %3552 = vmatmul.msk.f32.gmra.mxu2 %vm2547_vm2, %v3550_v35  ;;  %v3084_v35 = vld [vmem:[#allocation7 + $0x1f0] sm:$0xff] }
 0x650   : > { %3563 = vmatmul.msk.f32.vlgmr.msrb.gmra.mxu2 %vm2547_vm2, %v3561_v36  ;;  %v3082_v36 = vld [vmem:[#allocation7 + $0x1e0] sm:$0xff] }
 0x658   : > { %3564 = vmatmul.msk.f32.gmra.mxu2 %vm2547_vm2, %v3562_v40  ;;  %v3080_v40 = vld [vmem:[#allocation7 + $0x1d0] sm:$0xff] }
 0x693   : > { %v2571_v21 = vpop.f32.mrf.mxu2 }
 0x694   : > { %v2611_v34 = vpop.f32.mrf.mxu3  ;;  %3523 = vmatmul.msk.f32.vlgmr.msra.gmra.mxu1 %vm2626_vm3, %v2571_v21  ;;  %v3083_v21 = vld [vmem:[#allocation7 + $0x1e8] sm:$0xff] }
 0x695   : > { %3521 = vmatmul.msk.f32.vlgmr.msra.gmra.mxu0 %vm2626_vm3, %v2611_v34  ;;  %2956 = vmatpush.msra.mxu1 %v2941_v4  ;;  %v3209_v4 = vld [vmem:[#allocation9 + $0x20] sm:$0xff] }
 0x696   : > { %2925 = vmatpush.msra.mxu0 %v4128_v10 }
 0x697   : > { %2957 = vmatpush.msra.mxu1 %v2940_v8  ;;  %v3311_v8 = vld [vmem:[#allocation9 + $0xe0] sm:$0xff] }
 0x699   : > { %2958 = vmatpush.msra.mxu1 %v2939_v12  ;;  %v3246_v12 = vld [vmem:[#allocation9 + $0x58] sm:$0xff] }
 0x69b   : > { %v2574_v37 = vpop.f32.mrf.mxu2  ;;  %2959 = vmatpush.msra.mxu1 %v2938_v14  ;;  %v3310_v14 = vld [vmem:[#allocation9 + $0xd8] sm:$0xff] }
 0x69c   : > { %v2614_v39 = vpop.f32.mrf.mxu3  ;;  %3524 = vmatmul.msk.f32.gmra.mxu1 %vm2626_vm3, %v2574_v37  ;;  %v3081_v37 = vld [vmem:[#allocation7 + $0x1d8] sm:$0xff] }
 0x69d   : > { %3522 = vmatmul.msk.f32.gmra.mxu0 %vm2626_vm3, %v2614_v39  ;;  %2960 = vmatpush.msra.mxu1 %v2937_v16  ;;  %v3245_v16 = vld [vmem:[#allocation9 + $0x50] sm:$0xff] }
 0x69f   : > { %2961 = vmatpush.msra.mxu1 %v2936_v46  ;;  %v3309_v46 = vld [vmem:[#allocation9 + $0xd0] sm:$0xff] }
 0x6a1   : > { %2962 = vmatpush.msra.mxu1 %v2935_v22  ;;  %v3244_v22 = vld [vmem:[#allocation9 + $0x48] sm:$0xff] }
 0x6a3   : > { %v2711_v43 = vpop.f32.mrf.mxu2  ;;  %2963 = vmatpush.msra.mxu1 %v2934_v25  ;;  %v3308_v25 = vld [vmem:[#allocation9 + $0xc8] sm:$0xff] }
 0x6a4   : > { %3529 = vmatmul.msk.f32.vlgmr.msra.gmra.mxu3 %vm2626_vm3, %v2711_v43  ;;  %v3079_v43 = vld [vmem:[#allocation7 + $0x1c8] sm:$0xff] }
 0x6a5   : > { %3533 = vmatmul.msk.f32.vlgmr.msrb.gmra.mxu0 %vm2547_vm2, %v3531_v41  ;;  %3028 = vmatpush.msra.mxu3 %v3013_v61  ;;  %v3189_v41 = vld [vmem:[%s4278_s7] sm:$0xff]  ;;  %v3312_v61 = vld [vmem:[#allocation9 + $0xe8] sm:$0xff] }
 0x6a6   : > { %3069 = vmatpush.msrb.mxu0 %v4128_v10  ;;  %v3010_v10 = vld [vmem:[#allocation7 + $0x1a0] sm:$0xff]  ;;  %3193 = vperm.xlu1 %3645, %v3189_v41  }
 0x6a7   : > { %3029 = vmatpush.msra.mxu3 %v3012_v3 }
 0x6a9   : > { %3030 = vmatpush.msra.mxu3 %v3011_v6  ;;  %v3247_v6 = vld [vmem:[#allocation9 + $0x60] sm:$0xff] }
 0x6ab   : > { %v2714_v33 = vpop.f32.mrf.mxu2  ;;  %3031 = vmatpush.msra.mxu3 %v3010_v10  ;;  %v3208_v10 = vld [vmem:[#allocation9 + $0x18] sm:$0xff] }
 0x6ac   : > { %3530 = vmatmul.msk.f32.gmra.mxu3 %vm2626_vm3, %v2714_v33  ;;  %v3190_v33 = vld [vmem:[%s4278_s7 + $0x8] sm:$0xff] }
 0x6ad   : > { %3534 = vmatmul.msk.f32.gmra.mxu0 %vm2547_vm2, %v3532_v32  ;;  %3032 = vmatpush.msra.mxu3 %v3009_v13  ;;  %v3078_v32 = vld [vmem:[#allocation7 + $0x1c0] sm:$0xff]  ;;  %v3278_v13 = vld [vmem:[#allocation9 + $0x98] sm:$0xff] }
 0x6ae   : > { %3198 = vperm.xlu1 %3645, %v3190_v33  }
 0x6af   : > { %3033 = vmatpush.msra.mxu3 %v3008_v63  ;;  %v3207_v63 = vld [vmem:[#allocation9 + $0x10] sm:$0xff] }
 0x6b1   : > { %3034 = vmatpush.msra.mxu3 %v3007_v17  ;;  %v3277_v17 = vld [vmem:[#allocation9 + $0x90] sm:$0xff] }
 0x6b3   : > { %v2855_v57 = vpop.f32.mrf.mxu2  ;;  %3035 = vmatpush.msra.mxu3 %v3006_v23  ;;  %v3206_v23 = vld [vmem:[#allocation9 + $0x8] sm:$0xff] }
 0x6b4   : > { %3541 = vmatmul.msk.f32.vlgmr.msrb.gmra.mxu3 %vm2626_vm3, %v2855_v57  ;;  %v3281_v57 = vld [vmem:[#allocation9 + $0xb0] sm:$0xff] }
 0x6b5   : > { %3545 = vmatmul.msk.f32.vlgmr.msra.gmra.mxu0 %vm2547_vm2, %v3543_v42  ;;  %3172 = vmatpush.msrb.mxu3 %v3157_v24  ;;  %v3276_v24 = vld [vmem:[#allocation9 + $0x88] sm:$0xff] }
 0x6b6   : > { %3227 = vmatpush.msra.mxu0 %v3212_v54  ;;  %3292 = vmatpush.msra.mxu2 %v3281_v57 }
 0x6b7   : > { %3173 = vmatpush.msrb.mxu3 %v3156_v27  ;;  %v3205_v27 = vld [vmem:[#allocation9] sm:$0xff] }
 0x6b8   : > { %3228 = vmatpush.msra.mxu0 %v3211_v55  ;;  %3293 = vmatpush.msra.mxu2 %v3280_v60 }
 0x6b9   : > { %3174 = vmatpush.msrb.mxu3 %v3155_v28 }
 0x6ba   : > { %3229 = vmatpush.msra.mxu0 %v3210_v58 }
 0x6bb   : > { %v2858_v7 = vpop.f32.mrf.mxu2  ;;  %3175 = vmatpush.msrb.mxu3 %v3154_v59  ;;  %v3275_v59 = vld [vmem:[#allocation9 + $0x80] sm:$0xff] }
 0x6bc   : > { %3542 = vmatmul.msk.f32.gmra.mxu3 %vm2626_vm3, %v2858_v7  ;;  %v3279_v7 = vld [vmem:[#allocation9 + $0xa0] sm:$0xff]  ;;  %3230 = vmatpush.msra.mxu0 %v3209_v4 }
 0x6bd   : > { %3546 = vmatmul.msk.f32.gmra.mxu0 %vm2547_vm2, %v3544_v51  ;;  %3176 = vmatpush.msrb.mxu3 %v3153_v29  ;;  %v3307_v29 = vld [vmem:[#allocation9 + $0xc0] sm:$0xff] }
 0x6be   : > { %3294 = vmatpush.msra.mxu2 %v3279_v7  ;;  %3231 = vmatpush.msra.mxu0 %v3208_v10 }
 0x6bf   : > { %3177 = vmatpush.msrb.mxu3 %v3152_v48 }
 0x6c0   : > { %3295 = vmatpush.msra.mxu2 %v3278_v13  ;;  %3232 = vmatpush.msra.mxu0 %v3207_v63 }
 0x6c1   : > { %3178 = vmatpush.msrb.mxu3 %v3151_v30 }
 0x6c2   : > { %3296 = vmatpush.msra.mxu2 %v3277_v17  ;;  %3233 = vmatpush.msra.mxu0 %v3206_v23 }
 0x6c3   : > { %v2999_v18 = vpop.f32.mrf.mxu2  ;;  %3179 = vmatpush.msrb.mxu3 %v3150_v15 }
 0x6c4   : > { %3553 = vmatmul.msk.f32.vlgmr.msra.gmra.mxu3 %vm2626_vm3, %v2999_v18  ;;  %3297 = vmatpush.msra.mxu2 %v3276_v24 }
 0x6c5   : > { %3557 = vmatmul.msk.f32.vlgmr.msrb.gmra.mxu0 %vm2547_vm2, %v3555_v0  ;;  %3323 = vmatpush.msra.mxu3 %v3314_v5 }
 0x6c6   : > { %3234 = vmatpush.msra.mxu0 %v3205_v27  ;;  %3298 = vmatpush.msra.mxu2 %v3275_v59 }
 0x6c7   : > { %3324 = vmatpush.msra.mxu3 %v3313_v38 }
 0x6c9   : > { %3325 = vmatpush.msra.mxu3 %v3312_v61 }
 0x6cb   : > { %v3002_v45 = vpop.f32.mrf.mxu2  ;;  %3326 = vmatpush.msra.mxu3 %v3311_v8 }
 0x6cc   : > { %3554 = vmatmul.msk.f32.gmra.mxu3 %vm2626_vm3, %v3002_v45  ;;  %v3243_v45 = vld [vmem:[#allocation9 + $0x40] sm:$0xff] }
 0x6cd   : > { %3558 = vmatmul.msk.f32.gmra.mxu0 %vm2547_vm2, %v3556_v11  ;;  %3327 = vmatpush.msra.mxu3 %v3310_v14 }
 0x6cf   : > { %3328 = vmatpush.msra.mxu3 %v3309_v46 }
 0x6d1   : > { %3329 = vmatpush.msra.mxu3 %v3308_v25 }
 0x6d3   : > { %v3143_v1 = vpop.f32.mrf.mxu2  ;;  %3330 = vmatpush.msra.mxu3 %v3307_v29 }
 0x6d4   : > { %3565 = vmatmul.msk.f32.vlgmr.msrb.gmra.mxu3 %vm2626_vm3, %v3143_v1 }
 0x6db   : > { %v3146_v34 = vpop.f32.mrf.mxu2 }
 0x6dc   : > { %3566 = vmatmul.msk.f32.gmra.mxu3 %vm2626_vm3, %v3146_v34 }
 0x711   : > { %v4241_v19 = vpop.f32.mrf.mxu1 }
 0x712   : > { %v4220_v26 = vpop.f32.mrf.mxu0 }
 0x713   : > { %v2680_v30 = vadd.f32 %v4241_v19, %v4220_v26 }
 0x718   : > { %v3194_v26 = vpop.permute.xlu1 %3193 }
 0x719   : > { %v4247_v53 = vpop.f32.mrf.mxu1 }
 0x71a   : > { %v4223_v2 = vpop.f32.mrf.mxu0 }
 0x722   : > { %v2783_v20 = vpop.f32.mrf.mxu0 }
 0x723   : > { %3535 = vmatmul.msk.f32.vlgmr.msrb.gmra.mxu1 %vm2626_vm3, %v2783_v20 }
 0x724   : > { %3100 = vmatpush.msrb.mxu1 %v3085_v31 }
 0x726   : > { %3101 = vmatpush.msrb.mxu1 %v3084_v35  ;;  %v2683_v35 = vadd.f32 %v4247_v53, %v4223_v2 }
 0x727   : > { %v4239_v11 = vpop.f32.mrf.mxu3 }
 0x728   : > { %3102 = vmatpush.msrb.mxu1 %v3083_v21  ;;  %v2755_v1 = vadd.f32 %v4239_v11, %v2680_v30 }
 0x72a   : > { %v2786_v39 = vpop.f32.mrf.mxu0  ;;  %3103 = vmatpush.msrb.mxu1 %v3082_v36 }
 0x72b   : > { %3536 = vmatmul.msk.f32.gmra.mxu1 %vm2626_vm3, %v2786_v39 }
 0x72c   : > { %3104 = vmatpush.msrb.mxu1 %v3081_v37 }
 0x72e   : > { %3105 = vmatpush.msrb.mxu1 %v3080_v40 }
 0x72f   : > { %v4243_v47 = vpop.f32.mrf.mxu3 }
 0x730   : > { %3106 = vmatpush.msrb.mxu1 %v3079_v43  ;;  %v2756_v34 = vadd.f32 %v4243_v47, %v2683_v35 }
 0x732   : > { %v2927_v49 = vpop.f32.mrf.mxu0  ;;  %3107 = vmatpush.msrb.mxu1 %v3078_v32 }
 0x733   : > { %3547 = vmatmul.msk.f32.vlgmr.msra.gmra.mxu1 %vm2626_vm3, %v2927_v49 }
 0x734   : > { %3259 = vmatpush.msra.mxu1 %v3250_v50 }
 0x736   : > { %3260 = vmatpush.msra.mxu1 %v3249_v56 }
 0x737   : > { %v4245_v52 = vpop.f32.mrf.mxu3 }
 0x738   : > { %3261 = vmatpush.msra.mxu1 %v3248_v44 }
 0x73a   : > { %v2930_v42 = vpop.f32.mrf.mxu0  ;;  %3262 = vmatpush.msra.mxu1 %v3247_v6 }
 0x73b   : > { %3548 = vmatmul.msk.f32.gmra.mxu1 %vm2626_vm3, %v2930_v42 }
 0x73c   : > { %3263 = vmatpush.msra.mxu1 %v3246_v12 }
 0x73e   : > { %3264 = vmatpush.msra.mxu1 %v3245_v16 }
 0x73f   : > { %v2896_v3 = vpop.f32.mrf.mxu3 }
 0x740   : > { %3265 = vmatpush.msra.mxu1 %v3244_v22 }
 0x742   : > { %v3071_v51 = vpop.f32.mrf.mxu0  ;;  %3266 = vmatpush.msra.mxu1 %v3243_v45 }
 0x743   : > { %3559 = vmatmul.msk.f32.vlgmr.msrb.gmra.mxu1 %vm2626_vm3, %v3071_v51 }
 0x747   : > { %v3037_v28 = vpop.f32.mrf.mxu3 }
 0x74a   : > { %v3074_v0 = vpop.f32.mrf.mxu0 }
 0x74b   : > { %3560 = vmatmul.msk.f32.gmra.mxu1 %vm2626_vm3, %v3074_v0 }
 0x74f   : > { %v3040_v15 = vpop.f32.mrf.mxu3 }
 0x757   : > { %v3181_v39 = vpop.f32.mrf.mxu3 }
 0x75f   : > { %v3184_v19 = vpop.f32.mrf.mxu3 }
 0x7a0   : > { %v2821_v62 = vpop.f32.mrf.mxu1 }
 0x7a1   : > { %v2827_v31 = vadd.f32 %v2821_v62, %v2755_v1 }
 0x7a3   : > { %v2899_v21 = vadd.f32 %v4245_v52, %v2827_v31  ;;  %v3199_v52 = vpop.permute.xlu1 %3198 }
 0x7a8   : > { %v2824_v18 = vpop.f32.mrf.mxu1 }
 0x7a9   : > { %v2828_v37 = vadd.f32 %v2824_v18, %v2756_v34 }
 0x7ab   : > { %v2900_v43 = vadd.f32 %v2896_v3, %v2828_v37 }
 0x7b0   : > { %v2965_v48 = vpop.f32.mrf.mxu1 }
 0x7b1   : > { %v2971_v36 = vadd.f32 %v2965_v48, %v2899_v21 }
 0x7b3   : > { %v3043_v40 = vadd.f32 %v3037_v28, %v2971_v36 }
 0x7b8   : > { %v2968_v20 = vpop.f32.mrf.mxu1 }
 0x7b9   : > { %v2972_v33 = vadd.f32 %v2968_v20, %v2900_v43 }
 0x7bb   : > { %v3044_v51 = vadd.f32 %v3040_v15, %v2972_v33 }
 0x7c0   : > { %v3109_v41 = vpop.f32.mrf.mxu1 }
 0x7c1   : > { %v3115_v32 = vadd.f32 %v3109_v41, %v3043_v40 }
 0x7c3   : > { %v3187_v49 = vadd.f32 %v3181_v39, %v3115_v32 }
 0x7c5   : > { %v3201_v42 = vadd.f32 %v3194_v26, %v3187_v49 }
 0x7c7   : > { %v3203_v0 = vmax.f32 %v3201_v42, 0.0 }
 0x7c8   : > { %v3112_v11 = vpop.f32.mrf.mxu1 }
 0x7c9   : > { %v3116_v2 = vadd.f32 %v3112_v11, %v3044_v51  ;;  %3567 = vmatmul.msk.f32.vlgmr.msra.gmra.mxu0 %vm2626_vm3, %v3203_v0  ;;  %3569 = vmatmul.msk.f32.vlgmr.msra.gmra.mxu1 %vm2626_vm3, %v3203_v0 }
 0x7ca   : > { %3571 = vmatmul.msk.f32.vlgmr.msra.gmra.mxu2 %vm2626_vm3, %v3203_v0  ;;  %3573 = vmatmul.msk.f32.vlgmr.msra.gmra.mxu3 %vm2626_vm3, %v3203_v0 }
 0x7cb   : > { %v3188_v47 = vadd.f32 %v3184_v19, %v3116_v2 }
 0x7cd   : > { %v3202_v53 = vadd.f32 %v3199_v52, %v3188_v47 }
 0x7cf   : > { %v3204_v54 = vmax.f32 %v3202_v53, 0.0 }
 0x7d1   : > { %3568 = vmatmul.msk.f32.gmra.mxu0 %vm2626_vm3, %v3204_v54  ;;  %3570 = vmatmul.msk.f32.gmra.mxu1 %vm2626_vm3, %v3204_v54 }
 0x7d2   : > { %3572 = vmatmul.msk.f32.gmra.mxu2 %vm2626_vm3, %v3204_v54  ;;  %3574 = vmatmul.msk.f32.gmra.mxu3 %vm2626_vm3, %v3204_v54 }
 0x846   : > { %v3236_v50 = vpop.f32.mrf.mxu0  ;;  %v3268_v9 = vpop.f32.mrf.mxu1 }
 0x847   : > { %v3338_v56 = vmax.f32 %v3236_v50, %v3268_v9 }
 0x84d   : > { %v3300_v5 = vpop.f32.mrf.mxu2  ;;  %v3332_v55 = vpop.f32.mrf.mxu3 }
 0x84e   : > { %v3340_v57 = vmax.f32 %v3300_v5, %v3332_v55  ;;  %v3239_v58 = vpop.f32.mrf.mxu0  ;;  %v3271_v44 = vpop.f32.mrf.mxu1 }
 0x84f   : > { %v3339_v62 = vmax.f32 %v3239_v58, %v3271_v44 }
 0x850   : > { %v3342_v38 = vmax.f32 %v3338_v56, %v3340_v57 }
 0x852   : > { %3345 = vst.msk [vmem:[%s440_s27] sm:$0xff] %vm3344_vm4, %v3342_v38 }
 0x855   : > { %v3303_v60 = vpop.f32.mrf.mxu2  ;;  %v3335_v61 = vpop.f32.mrf.mxu3 }
 0x856   : > { %v3341_v3 = vmax.f32 %v3303_v60, %v3335_v61 }
 0x858   : > { %v3343_v4 = vmax.f32 %v3339_v62, %v3341_v3 }
 0x85a   : > { %3346 = vst.msk [vmem:[%s440_s27 + $0x8] sm:$0xff] %vm3344_vm4, %v3343_v4 }
 0x85b PF: > { %s23_s13 = sadd.s32 1, %s3814_s13  }
 0x85c   : > { %p20_p7 = scmp.ge.s32.totalorder %s23_s13, 4  }
 0x85e   :  { %22 = sbr.rel (!%p20_p7) target bundleno = 3 (0x3), region = 149 }
 0x863   :  { %3368 = vsyncpa [#allocation3], 1 }
 0x864   :  { %3370 = vsyncpa [#allocation3 + $0x1], 1 }
 0x865   :  { %3371 = vsyncpa [#allocation5], 1 }
 0x866   :  { %3372 = vsyncpa [#allocation8], 1 }

</bundles_post_ra>
